<compile_context>
chip_gen: v6e
topology: v6e:2x2x1
jax: 0.10.0
libtpu: 0.0.40
codegen_flags: <defaults>
</compile_context>

<pallas_src>
import functools

import numpy as np
import jax
import jax.numpy as jnp
from jax import lax
from jax.experimental import pallas as pl
from jax.experimental.pallas import tpu as pltpu

H_IN = W_IN = 28
KH = KW = 3
H_CONV = W_CONV = 26          # 28 - 3 + 1
POOL = 2
H_POOL = W_POOL = 13          # pooled output
HP = H_IN // POOL             # 14 : side of one even/odd parity plane
C_OUT = 64
N_TAPS = KH * KW              # 9
N_SLABS = 16                  # (row-shift a, col-shift b) x (row parity, col parity)
LANES = 256                   # 14*14 = 196 parity pixels padded to 2*128 lanes
FC_IN = C_OUT * H_POOL * W_POOL   # 10816
FC_OUT = 10
OUT_PAD = 128                 # lane-dense logits row; wrapper slices [:, :10]

# Kernel lane index is L = p*14 + q (pooled row/col p,q in 0..12).  For pool
# offset (di,dj) and tap (ky,kx):
#   img[2p+di+ky, 2q+dj+kx] = parity_plane[(di+ky)&1, (dj+kx)&1][p+a, q+b]
# with a=(di+ky)>>1, b=(dj+kx)>>1, i.e. a lane-roll of the flat parity plane by
# a*14+b (one of 0,1,14,15).  So the 3x3 conv for each pool offset is one
# (64,16) x (16,256) dot against the 16 rolled parity slabs.


def _slab_scatter_mats():
    """(4, 9, 16): per pool offset, scatter the 9 conv taps into the 16 slabs."""
    mats = np.zeros((POOL * POOL, N_TAPS, N_SLABS), np.float32)
    for di in range(POOL):
        for dj in range(POOL):
            s = di * POOL + dj
            for ky in range(KH):
                for kx in range(KW):
                    a, al = divmod(di + ky, 2)
                    b, be = divmod(dj + kx, 2)
                    mats[s, ky * KW + kx, (a * 2 + b) * 4 + (al * 2 + be)] = 1.0
    return mats


_SLAB_MATS = _slab_scatter_mats()      # numpy constant, baked into the jit


def _fused_cnn_kernel(x_ref, ws_ref, bc_ref, wf_ref, bf_ref, o_ref,
                      feat_ref, taps_ref):
    """conv3x3 + bias + ReLU + 2x2 maxpool + Linear for a tile of TB images.

    x_ref   : (TB, 4, 256) f32   parity-split images; row = 2*(row par)+(col par),
                                 lane = i*14 + j (zeros for lanes >= 196)
    ws_ref  : (4, 64, 16)  f32   conv weight per pool offset, scattered on slabs
    bc_ref  : (64, 1)      f32   conv bias
    wf_ref  : (10, 64, 256) bf16 fc weight, [out, chan, p*14+q] (zeros elsewhere)
    bf_ref  : (1, 128)     f32   fc bias, zero padded to 128 lanes
    o_ref   : (1, TB, 128) f32   logits (first 10 lanes meaningful)
    feat_ref: (TB, 64, 256) bf16 VMEM scratch of pooled ReLU features
    taps_ref: (16, 256)    f32   VMEM scratch for the rolled parity slabs
    """
    tb = x_ref.shape[0]
    bc = bc_ref[...]                                          # (64, 1)

    def conv_one_image(i, carry):
        x = x_ref[i]                                          # (4, 256) f32
        # 16 slabs: parity planes rolled left by 0 / 1 / 14 / 15 lanes.
        # (cyclic wrap only lands on lanes whose FC weight is zero)
        taps_ref[0:4, :] = x
        taps_ref[4:8, :] = jnp.roll(x, -1, axis=1)
        taps_ref[8:12, :] = jnp.roll(x, -HP, axis=1)
        taps_ref[12:16, :] = jnp.roll(x, -(HP + 1), axis=1)
        taps = taps_ref[...]                                  # (16, 256) f32
        # One small MXU dot per pool offset, fused running max.
        m = jnp.dot(ws_ref[0], taps, preferred_element_type=jnp.float32)
        for s in range(1, POOL * POOL):
            m = jnp.maximum(
                m, jnp.dot(ws_ref[s], taps, preferred_element_type=jnp.float32))
        # bias + ReLU after the max (valid: per-channel bias, monotone ReLU).
        feat_ref[i] = jnp.maximum(m + bc, 0.0).astype(jnp.bfloat16)
        return carry

    lax.fori_loop(0, tb, conv_one_image, 0)

    # FC batched over the tile: output-major loop so each weight slab is read
    # once per tile; bf16 multiplies, f32 accumulation; lane-dense output row.
    lane = lax.broadcasted_iota(jnp.int32, (1, OUT_PAD), 1)
    acc = jnp.broadcast_to(bf_ref[...], (tb, OUT_PAD))        # (TB, 128) f32
    feats = feat_ref[...]                                     # (TB, 64, 256) bf16
    for o in range(FC_OUT):
        prod = feats * wf_ref[o]                              # bf16 multiply
        part = jnp.sum(prod, axis=2, keepdims=True, dtype=jnp.float32)  # (TB,64,1)
        col = jnp.sum(part, axis=1, keepdims=True)            # (TB, 1, 1)
        acc = acc + jnp.where(lane == o, col[:, :, 0], 0.0)   # (TB, 128)
    o_ref[0] = acc


def _parity_split(x):
    """(n,1,28,28) f32 -> (n,4,256) f32; row = parity, lane = i*14 + j."""
    n = x.shape[0]
    xs = x[:, 0]                                              # (n, 28, 28)
    p = xs.reshape(n, HP, 2, HP, 2).transpose(0, 2, 4, 1, 3)  # (n, 2, 2, 14, 14)
    p = p.reshape(n, POOL * POOL, HP * HP)                    # (n, 4, 196)
    return jnp.pad(p, ((0, 0), (0, 0), (0, LANES - HP * HP)))  # (n, 4, 256)


@functools.partial(jax.jit, static_argnames=("batch_tile",))
def cnn_forward(x, w_conv, b_conv, w_fc, b_fc, batch_tile=32):
    n = x.shape[0]
    # Tile heuristic: big tiles amortize the ~0.35us/step pipeline overhead;
    # only create a 2nd grid step (so a 2-TensorCore chip can split the grid)
    # once there is enough work for the extra step to be free.
    num_tiles = max(1, pl.cdiv(n, batch_tile))
    if n >= 16:
        num_tiles = max(num_tiles, 2)
    tb = pl.cdiv(n, num_tiles)
    num_tiles = pl.cdiv(n, tb)
    n_pad = num_tiles * tb
    if n_pad != n:
        x = jnp.pad(x, ((0, n_pad - n), (0, 0), (0, 0), (0, 0)))

    xp = _parity_split(x.astype(jnp.float32))                 # (n_pad, 4, 256)
    w9 = w_conv.reshape(C_OUT, N_TAPS).astype(jnp.float32)    # tap = ky*3+kx
    ws = jnp.einsum("ct,stk->sck", w9, _SLAB_MATS)            # (4, 64, 16) f32
    bc = b_conv.reshape(C_OUT, 1).astype(jnp.float32)
    # Absorb PyTorch's (C,H,W) flatten order into the FC weight layout
    # [o, c, p*14+q]; padded lanes are zero so garbage feat lanes cancel.
    wf = w_fc.reshape(FC_OUT, C_OUT, H_POOL, W_POOL).astype(jnp.float32)
    wf = jnp.pad(wf, ((0, 0), (0, 0), (0, 0), (0, HP - W_POOL)))   # q: 13 -> 14
    wf = wf.reshape(FC_OUT, C_OUT, H_POOL * HP)
    wf = jnp.pad(wf, ((0, 0), (0, 0), (0, LANES - H_POOL * HP)))
    wf = wf.astype(jnp.bfloat16)
    bf = jnp.pad(b_fc.reshape(1, FC_OUT),
                 ((0, 0), (0, OUT_PAD - FC_OUT))).astype(jnp.float32)

    out = pl.pallas_call(
        _fused_cnn_kernel,
        out_shape=jax.ShapeDtypeStruct((num_tiles, tb, OUT_PAD), jnp.float32),
        grid=(num_tiles,),
        in_specs=[
            pl.BlockSpec((tb, POOL * POOL, LANES), lambda i: (i, 0, 0)),   # images
            pl.BlockSpec((POOL * POOL, C_OUT, N_SLABS), lambda i: (0, 0, 0)),  # conv w
            pl.BlockSpec((C_OUT, 1), lambda i: (0, 0)),                    # conv b
            pl.BlockSpec((FC_OUT, C_OUT, LANES), lambda i: (0, 0, 0)),     # fc w
            pl.BlockSpec((1, OUT_PAD), lambda i: (0, 0)),                  # fc b
        ],
        out_specs=pl.BlockSpec((1, tb, OUT_PAD), lambda i: (i, 0, 0)),
        scratch_shapes=[
            pltpu.VMEM((tb, C_OUT, LANES), jnp.bfloat16),    # pooled features
            pltpu.VMEM((N_SLABS, LANES), jnp.float32),       # rolled tap slabs
        ],
        compiler_params=pltpu.CompilerParams(
            dimension_semantics=("parallel",)),
    )(xp, ws, bc, wf, bf)

    return out.reshape(n_pad, OUT_PAD)[:n, :FC_OUT]


def cnn_reference(x, w_conv, b_conv, w_fc, b_fc):
    # Plain-JAX NCHW reference matching PyTorch semantics (fp32 HIGHEST).
    n = x.shape[0]
    y = lax.conv_general_dilated(
        x, w_conv, window_strides=(1, 1), padding="VALID",
        dimension_numbers=("NCHW", "OIHW", "NCHW"),
        precision=lax.Precision.HIGHEST)
    y = jnp.maximum(y + b_conv[None, :, None, None], 0.0)
    y = y.reshape(n, C_OUT, H_POOL, POOL, W_POOL, POOL).max(axis=(3, 5))
    f = y.reshape(n, FC_IN)
    return jnp.dot(f, w_fc.T, precision=lax.Precision.HIGHEST) + b_fc[None, :]


if __name__ == "__main__":
    key = jax.random.PRNGKey(0)
    kx, kw1, kb1, kw2, kb2 = jax.random.split(key, 5)
    # Input spatial size 28x28 is forced by the module (64*13*13 FC input).
    x = jax.random.normal(kx, (2, 1, H_IN, W_IN), jnp.float32)
    w_conv = jax.random.normal(kw1, (C_OUT, 1, KH, KW), jnp.float32) * (1.0 / 3.0)
    b_conv = jax.random.normal(kb1, (C_OUT,), jnp.float32) * 0.1
    w_fc = jax.random.normal(kw2, (FC_OUT, FC_IN), jnp.float32) * 0.01
    b_fc = jax.random.normal(kb2, (FC_OUT,), jnp.float32) * 0.1

    out = jax.block_until_ready(cnn_forward(x, w_conv, b_conv, w_fc, b_fc))
    ref = cnn_reference(x, w_conv, b_conv, w_fc, b_fc)
    assert out.shape == (2, FC_OUT)
    assert jnp.allclose(out, ref, atol=2e-2, rtol=2e-2), \
        float(jnp.max(jnp.abs(out - ref)))
    print("KERNEL_OK")
</pallas_src>

<mosaic_0001>
module attributes {stable_mosaic.version = 11 : i64} {
  func.func @_fused_cnn_kernel(%arg0: i32, %arg1: memref<2x4x256xf32, #tpu.memory_space<vmem>>, %arg2: memref<4x64x16xf32, #tpu.memory_space<vmem>>, %arg3: memref<64x1xf32, #tpu.memory_space<vmem>>, %arg4: memref<10x64x256xbf16, #tpu.memory_space<vmem>>, %arg5: memref<1x128xf32, #tpu.memory_space<vmem>>, %arg6: memref<1x2x128xf32, #tpu.memory_space<vmem>>, %arg7: memref<2x64x256xbf16, #tpu.memory_space<vmem>>, %arg8: memref<16x256xf32, #tpu.memory_space<vmem>>) attributes {dimension_semantics = [#tpu.dimension_semantics<parallel>], iteration_bounds = array<i64: 1>, scalar_prefetch = 0 : i64, scratch_operands = 2 : i64, tpu.core_type = #tpu.core_type<tc>, window_params = [{transform_indices = @transform_0, window_bounds = array<i64: 2, 4, 256>}, {pipeline_mode = #tpu.pipeline_mode<synchronous>, transform_indices = @transform_1, window_bounds = array<i64: 4, 64, 16>}, {pipeline_mode = #tpu.pipeline_mode<synchronous>, transform_indices = @transform_2, window_bounds = array<i64: 64, 1>}, {pipeline_mode = #tpu.pipeline_mode<synchronous>, transform_indices = @transform_3, window_bounds = array<i64: 10, 64, 256>}, {pipeline_mode = #tpu.pipeline_mode<synchronous>, transform_indices = @transform_4, window_bounds = array<i64: 1, 128>}, {transform_indices = @transform_5, window_bounds = array<i64: 1, 2, 128>}]} {
    %c0 = arith.constant 0 : index
    %c0_0 = arith.constant 0 : index
    %0 = vector.load %arg3[%c0, %c0_0] : memref<64x1xf32, #tpu.memory_space<vmem>>, vector<64x1xf32>
    %c0_i32 = arith.constant 0 : i32
    %c2_i32 = arith.constant 2 : i32
    %1 = arith.addi %c0_i32, %c2_i32 : i32
    %c1_i32 = arith.constant 1 : i32
    scf.for %arg9 = %c0_i32 to %1 step %c1_i32  : i32 {
      %210 = arith.index_cast %arg9 : i32 to index
      %c0_63 = arith.constant 0 : index
      %c0_64 = arith.constant 0 : index
      %211 = vector.load %arg1[%210, %c0_63, %c0_64] : memref<2x4x256xf32, #tpu.memory_space<vmem>>, vector<1x4x256xf32>
      %212 = vector.shape_cast %211 : vector<1x4x256xf32> to vector<4x256xf32>
      %c0_65 = arith.constant 0 : index
      %c0_66 = arith.constant 0 : index
      %213 = vector.load %arg8[%c0_65, %c0_66] : memref<16x256xf32, #tpu.memory_space<vmem>>, vector<4x256xf32>
      tpu.vector_store %arg8[%c0_65, %c0_66], %212 {strides = array<i32>} : memref<16x256xf32, #tpu.memory_space<vmem>>, vector<4x256xf32>,
      %214 = vector.extract_strided_slice %212 {offsets = [0, 1], sizes = [4, 255], strides = [1, 1]} : vector<4x256xf32> to vector<4x255xf32>
      %215 = vector.extract_strided_slice %212 {offsets = [0, 0], sizes = [4, 1], strides = [1, 1]} : vector<4x256xf32> to vector<4x1xf32>
      %216 = tpu.concatenate %214, %215 in 1 : vector<4x255xf32>, vector<4x1xf32> -> vector<4x256xf32>
      %c4_67 = arith.constant 4 : index
      %c0_68 = arith.constant 0 : index
      %217 = vector.load %arg8[%c4_67, %c0_68] : memref<16x256xf32, #tpu.memory_space<vmem>>, vector<4x256xf32>
      tpu.vector_store %arg8[%c4_67, %c0_68], %216 {strides = array<i32>} : memref<16x256xf32, #tpu.memory_space<vmem>>, vector<4x256xf32>,
      %218 = vector.extract_strided_slice %212 {offsets = [0, 14], sizes = [4, 242], strides = [1, 1]} : vector<4x256xf32> to vector<4x242xf32>
      %219 = vector.extract_strided_slice %212 {offsets = [0, 0], sizes = [4, 14], strides = [1, 1]} : vector<4x256xf32> to vector<4x14xf32>
      %220 = tpu.concatenate %218, %219 in 1 : vector<4x242xf32>, vector<4x14xf32> -> vector<4x256xf32>
      %c8_69 = arith.constant 8 : index
      %c0_70 = arith.constant 0 : index
      %221 = vector.load %arg8[%c8_69, %c0_70] : memref<16x256xf32, #tpu.memory_space<vmem>>, vector<4x256xf32>
      tpu.vector_store %arg8[%c8_69, %c0_70], %220 {strides = array<i32>} : memref<16x256xf32, #tpu.memory_space<vmem>>, vector<4x256xf32>,
      %222 = vector.extract_strided_slice %212 {offsets = [0, 15], sizes = [4, 241], strides = [1, 1]} : vector<4x256xf32> to vector<4x241xf32>
      %223 = vector.extract_strided_slice %212 {offsets = [0, 0], sizes = [4, 15], strides = [1, 1]} : vector<4x256xf32> to vector<4x15xf32>
      %224 = tpu.concatenate %222, %223 in 1 : vector<4x241xf32>, vector<4x15xf32> -> vector<4x256xf32>
      %c12 = arith.constant 12 : index
      %c0_71 = arith.constant 0 : index
      %225 = vector.load %arg8[%c12, %c0_71] : memref<16x256xf32, #tpu.memory_space<vmem>>, vector<4x256xf32>
      tpu.vector_store %arg8[%c12, %c0_71], %224 {strides = array<i32>} : memref<16x256xf32, #tpu.memory_space<vmem>>, vector<4x256xf32>,
      %c0_72 = arith.constant 0 : index
      %c0_73 = arith.constant 0 : index
      %226 = vector.load %arg8[%c0_72, %c0_73] : memref<16x256xf32, #tpu.memory_space<vmem>>, vector<16x256xf32>
      %c0_74 = arith.constant 0 : index
      %c0_75 = arith.constant 0 : index
      %c0_76 = arith.constant 0 : index
      %227 = vector.load %arg2[%c0_74, %c0_75, %c0_76] : memref<4x64x16xf32, #tpu.memory_space<vmem>>, vector<1x64x16xf32>
      %228 = vector.shape_cast %227 : vector<1x64x16xf32> to vector<64x16xf32>
      %cst_77 = arith.constant dense<0.000000e+00> : vector<64x256xf32>
      %229 = tpu.matmul %228, %226, %cst_77 {dimension_numbers = #tpu.dot_dimension_numbers<[1], [0], [0], [1], [0, 0, 1, 1], [], []>} : vector<64x16xf32>, vector<16x256xf32>, vector<64x256xf32> -> vector<64x256xf32>
      %c1_78 = arith.constant 1 : index
      %c0_79 = arith.constant 0 : index
      %c0_80 = arith.constant 0 : index
      %230 = vector.load %arg2[%c1_78, %c0_79, %c0_80] : memref<4x64x16xf32, #tpu.memory_space<vmem>>, vector<1x64x16xf32>
      %231 = vector.shape_cast %230 : vector<1x64x16xf32> to vector<64x16xf32>
      %cst_81 = arith.constant dense<0.000000e+00> : vector<64x256xf32>
      %232 = tpu.matmul %231, %226, %cst_81 {dimension_numbers = #tpu.dot_dimension_numbers<[1], [0], [0], [1], [0, 0, 1, 1], [], []>} : vector<64x16xf32>, vector<16x256xf32>, vector<64x256xf32> -> vector<64x256xf32>
      %233 = arith.maximumf %229, %232 : vector<64x256xf32>
      %c2_82 = arith.constant 2 : index
      %c0_83 = arith.constant 0 : index
      %c0_84 = arith.constant 0 : index
      %234 = vector.load %arg2[%c2_82, %c0_83, %c0_84] : memref<4x64x16xf32, #tpu.memory_space<vmem>>, vector<1x64x16xf32>
      %235 = vector.shape_cast %234 : vector<1x64x16xf32> to vector<64x16xf32>
      %cst_85 = arith.constant dense<0.000000e+00> : vector<64x256xf32>
      %236 = tpu.matmul %235, %226, %cst_85 {dimension_numbers = #tpu.dot_dimension_numbers<[1], [0], [0], [1], [0, 0, 1, 1], [], []>} : vector<64x16xf32>, vector<16x256xf32>, vector<64x256xf32> -> vector<64x256xf32>
      %237 = arith.maximumf %233, %236 : vector<64x256xf32>
      %c3_86 = arith.constant 3 : index
      %c0_87 = arith.constant 0 : index
      %c0_88 = arith.constant 0 : index
      %238 = vector.load %arg2[%c3_86, %c0_87, %c0_88] : memref<4x64x16xf32, #tpu.memory_space<vmem>>, vector<1x64x16xf32>
      %239 = vector.shape_cast %238 : vector<1x64x16xf32> to vector<64x16xf32>
      %cst_89 = arith.constant dense<0.000000e+00> : vector<64x256xf32>
      %240 = tpu.matmul %239, %226, %cst_89 {dimension_numbers = #tpu.dot_dimension_numbers<[1], [0], [0], [1], [0, 0, 1, 1], [], []>} : vector<64x16xf32>, vector<16x256xf32>, vector<64x256xf32> -> vector<64x256xf32>
      %241 = arith.maximumf %237, %240 : vector<64x256xf32>
      %242 = vector.broadcast %0 : vector<64x1xf32> to vector<64x256xf32>
      %243 = arith.addf %241, %242 : vector<64x256xf32>
      %cst_90 = arith.constant 0.000000e+00 : f32
      %244 = vector.broadcast %cst_90 : f32 to vector<64x256xf32>
      %245 = arith.maximumf %243, %244 : vector<64x256xf32>
      %246 = arith.truncf %245 : vector<64x256xf32> to vector<64x256xbf16>
      %247 = arith.index_cast %arg9 : i32 to index
      %c0_91 = arith.constant 0 : index
      %c0_92 = arith.constant 0 : index
      %248 = vector.load %arg7[%247, %c0_91, %c0_92] : memref<2x64x256xbf16, #tpu.memory_space<vmem>>, vector<1x64x256xbf16>
      %249 = vector.shape_cast %248 : vector<1x64x256xbf16> to vector<64x256xbf16>
      %250 = vector.shape_cast %246 : vector<64x256xbf16> to vector<1x64x256xbf16>
      tpu.vector_store %arg7[%247, %c0_91, %c0_92], %250 {strides = array<i32>} : memref<2x64x256xbf16, #tpu.memory_space<vmem>>, vector<1x64x256xbf16>,
    }
    %c2_i32_1 = arith.constant 2 : i32
    %2 = tpu.iota {dimensions = array<i32: 1>} : vector<1x128xi32>
    %c0_2 = arith.constant 0 : index
    %c0_3 = arith.constant 0 : index
    %3 = vector.load %arg5[%c0_2, %c0_3] : memref<1x128xf32, #tpu.memory_space<vmem>>, vector<1x128xf32>
    %4 = vector.shape_cast %3 : vector<1x128xf32> to vector<1x128xf32>
    %5 = vector.broadcast %4 : vector<1x128xf32> to vector<2x128xf32>
    %c0_4 = arith.constant 0 : index
    %c0_5 = arith.constant 0 : index
    %c0_6 = arith.constant 0 : index
    %6 = vector.load %arg7[%c0_4, %c0_5, %c0_6] : memref<2x64x256xbf16, #tpu.memory_space<vmem>>, vector<2x64x256xbf16>
    %c0_7 = arith.constant 0 : index
    %c0_8 = arith.constant 0 : index
    %c0_9 = arith.constant 0 : index
    %7 = vector.load %arg4[%c0_7, %c0_8, %c0_9] : memref<10x64x256xbf16, #tpu.memory_space<vmem>>, vector<1x64x256xbf16>
    %8 = vector.shape_cast %7 : vector<1x64x256xbf16> to vector<64x256xbf16>
    %9 = vector.shape_cast %8 : vector<64x256xbf16> to vector<1x64x256xbf16>
    %10 = vector.broadcast %9 : vector<1x64x256xbf16> to vector<2x64x256xbf16>
    %11 = arith.mulf %6, %10 : vector<2x64x256xbf16>
    %12 = arith.extf %11 : vector<2x64x256xbf16> to vector<2x64x256xf32>
    %cst = arith.constant dense<0.000000e+00> : vector<2x64xf32>
    %13 = vector.multi_reduction <add>, %12, %cst [2] : vector<2x64x256xf32> to vector<2x64xf32>
    %14 = vector.shape_cast %13 : vector<2x64xf32> to vector<2x64x1xf32>
    %cst_10 = arith.constant dense<0.000000e+00> : vector<2x1xf32>
    %15 = vector.multi_reduction <add>, %14, %cst_10 [1] : vector<2x64x1xf32> to vector<2x1xf32>
    %16 = vector.shape_cast %15 : vector<2x1xf32> to vector<2x1x1xf32>
    %c0_i32_11 = arith.constant 0 : i32
    %17 = vector.broadcast %c0_i32_11 : i32 to vector<1x128xi32>
    %18 = arith.cmpi eq, %2, %17 : vector<1x128xi32>
    %19 = vector.shape_cast %16 : vector<2x1x1xf32> to vector<2x1xf32>
    %cst_12 = arith.constant 0.000000e+00 : f32
    %20 = vector.shape_cast %18 : vector<1x128xi1> to vector<1x128xi1>
    %21 = vector.broadcast %20 : vector<1x128xi1> to vector<2x128xi1>
    %22 = vector.shape_cast %19 : vector<2x1xf32> to vector<2x1xf32>
    %23 = vector.broadcast %22 : vector<2x1xf32> to vector<2x128xf32>
    %24 = vector.broadcast %cst_12 : f32 to vector<2x128xf32>
    %25 = arith.select %21, %23, %24 : vector<2x128xi1>, vector<2x128xf32>
    %26 = arith.addf %5, %25 : vector<2x128xf32>
    %c1 = arith.constant 1 : index
    %c0_13 = arith.constant 0 : index
    %c0_14 = arith.constant 0 : index
    %27 = vector.load %arg4[%c1, %c0_13, %c0_14] : memref<10x64x256xbf16, #tpu.memory_space<vmem>>, vector<1x64x256xbf16>
    %28 = vector.shape_cast %27 : vector<1x64x256xbf16> to vector<64x256xbf16>
    %29 = vector.shape_cast %28 : vector<64x256xbf16> to vector<1x64x256xbf16>
    %30 = vector.broadcast %29 : vector<1x64x256xbf16> to vector<2x64x256xbf16>
    %31 = arith.mulf %6, %30 : vector<2x64x256xbf16>
    %32 = arith.extf %31 : vector<2x64x256xbf16> to vector<2x64x256xf32>
    %cst_15 = arith.constant dense<0.000000e+00> : vector<2x64xf32>
    %33 = vector.multi_reduction <add>, %32, %cst_15 [2] : vector<2x64x256xf32> to vector<2x64xf32>
    %34 = vector.shape_cast %33 : vector<2x64xf32> to vector<2x64x1xf32>
    %cst_16 = arith.constant dense<0.000000e+00> : vector<2x1xf32>
    %35 = vector.multi_reduction <add>, %34, %cst_16 [1] : vector<2x64x1xf32> to vector<2x1xf32>
    %36 = vector.shape_cast %35 : vector<2x1xf32> to vector<2x1x1xf32>
    %c1_i32_17 = arith.constant 1 : i32
    %37 = vector.broadcast %c1_i32_17 : i32 to vector<1x128xi32>
    %38 = arith.cmpi eq, %2, %37 : vector<1x128xi32>
    %39 = vector.shape_cast %36 : vector<2x1x1xf32> to vector<2x1xf32>
    %cst_18 = arith.constant 0.000000e+00 : f32
    %40 = vector.shape_cast %38 : vector<1x128xi1> to vector<1x128xi1>
    %41 = vector.broadcast %40 : vector<1x128xi1> to vector<2x128xi1>
    %42 = vector.shape_cast %39 : vector<2x1xf32> to vector<2x1xf32>
    %43 = vector.broadcast %42 : vector<2x1xf32> to vector<2x128xf32>
    %44 = vector.broadcast %cst_18 : f32 to vector<2x128xf32>
    %45 = arith.select %41, %43, %44 : vector<2x128xi1>, vector<2x128xf32>
    %46 = arith.addf %26, %45 : vector<2x128xf32>
    %c2 = arith.constant 2 : index
    %c0_19 = arith.constant 0 : index
    %c0_20 = arith.constant 0 : index
    %47 = vector.load %arg4[%c2, %c0_19, %c0_20] : memref<10x64x256xbf16, #tpu.memory_space<vmem>>, vector<1x64x256xbf16>
    %48 = vector.shape_cast %47 : vector<1x64x256xbf16> to vector<64x256xbf16>
    %49 = vector.shape_cast %48 : vector<64x256xbf16> to vector<1x64x256xbf16>
    %50 = vector.broadcast %49 : vector<1x64x256xbf16> to vector<2x64x256xbf16>
    %51 = arith.mulf %6, %50 : vector<2x64x256xbf16>
    %52 = arith.extf %51 : vector<2x64x256xbf16> to vector<2x64x256xf32>
    %cst_21 = arith.constant dense<0.000000e+00> : vector<2x64xf32>
    %53 = vector.multi_reduction <add>, %52, %cst_21 [2] : vector<2x64x256xf32> to vector<2x64xf32>
    %54 = vector.shape_cast %53 : vector<2x64xf32> to vector<2x64x1xf32>
    %cst_22 = arith.constant dense<0.000000e+00> : vector<2x1xf32>
    %55 = vector.multi_reduction <add>, %54, %cst_22 [1] : vector<2x64x1xf32> to vector<2x1xf32>
    %56 = vector.shape_cast %55 : vector<2x1xf32> to vector<2x1x1xf32>
    %c2_i32_23 = arith.constant 2 : i32
    %57 = vector.broadcast %c2_i32_23 : i32 to vector<1x128xi32>
    %58 = arith.cmpi eq, %2, %57 : vector<1x128xi32>
    %59 = vector.shape_cast %56 : vector<2x1x1xf32> to vector<2x1xf32>
    %cst_24 = arith.constant 0.000000e+00 : f32
    %60 = vector.shape_cast %58 : vector<1x128xi1> to vector<1x128xi1>
    %61 = vector.broadcast %60 : vector<1x128xi1> to vector<2x128xi1>
    %62 = vector.shape_cast %59 : vector<2x1xf32> to vector<2x1xf32>
    %63 = vector.broadcast %62 : vector<2x1xf32> to vector<2x128xf32>
    %64 = vector.broadcast %cst_24 : f32 to vector<2x128xf32>
    %65 = arith.select %61, %63, %64 : vector<2x128xi1>, vector<2x128xf32>
    %66 = arith.addf %46, %65 : vector<2x128xf32>
    %c3 = arith.constant 3 : index
    %c0_25 = arith.constant 0 : index
    %c0_26 = arith.constant 0 : index
    %67 = vector.load %arg4[%c3, %c0_25, %c0_26] : memref<10x64x256xbf16, #tpu.memory_space<vmem>>, vector<1x64x256xbf16>
    %68 = vector.shape_cast %67 : vector<1x64x256xbf16> to vector<64x256xbf16>
    %69 = vector.shape_cast %68 : vector<64x256xbf16> to vector<1x64x256xbf16>
    %70 = vector.broadcast %69 : vector<1x64x256xbf16> to vector<2x64x256xbf16>
    %71 = arith.mulf %6, %70 : vector<2x64x256xbf16>
    %72 = arith.extf %71 : vector<2x64x256xbf16> to vector<2x64x256xf32>
    %cst_27 = arith.constant dense<0.000000e+00> : vector<2x64xf32>
    %73 = vector.multi_reduction <add>, %72, %cst_27 [2] : vector<2x64x256xf32> to vector<2x64xf32>
    %74 = vector.shape_cast %73 : vector<2x64xf32> to vector<2x64x1xf32>
    %cst_28 = arith.constant dense<0.000000e+00> : vector<2x1xf32>
    %75 = vector.multi_reduction <add>, %74, %cst_28 [1] : vector<2x64x1xf32> to vector<2x1xf32>
    %76 = vector.shape_cast %75 : vector<2x1xf32> to vector<2x1x1xf32>
    %c3_i32 = arith.constant 3 : i32
    %77 = vector.broadcast %c3_i32 : i32 to vector<1x128xi32>
    %78 = arith.cmpi eq, %2, %77 : vector<1x128xi32>
    %79 = vector.shape_cast %76 : vector<2x1x1xf32> to vector<2x1xf32>
    %cst_29 = arith.constant 0.000000e+00 : f32
    %80 = vector.shape_cast %78 : vector<1x128xi1> to vector<1x128xi1>
    %81 = vector.broadcast %80 : vector<1x128xi1> to vector<2x128xi1>
    %82 = vector.shape_cast %79 : vector<2x1xf32> to vector<2x1xf32>
    %83 = vector.broadcast %82 : vector<2x1xf32> to vector<2x128xf32>
    %84 = vector.broadcast %cst_29 : f32 to vector<2x128xf32>
    %85 = arith.select %81, %83, %84 : vector<2x128xi1>, vector<2x128xf32>
    %86 = arith.addf %66, %85 : vector<2x128xf32>
    %c4 = arith.constant 4 : index
    %c0_30 = arith.constant 0 : index
    %c0_31 = arith.constant 0 : index
    %87 = vector.load %arg4[%c4, %c0_30, %c0_31] : memref<10x64x256xbf16, #tpu.memory_space<vmem>>, vector<1x64x256xbf16>
    %88 = vector.shape_cast %87 : vector<1x64x256xbf16> to vector<64x256xbf16>
    %89 = vector.shape_cast %88 : vector<64x256xbf16> to vector<1x64x256xbf16>
    %90 = vector.broadcast %89 : vector<1x64x256xbf16> to vector<2x64x256xbf16>
    %91 = arith.mulf %6, %90 : vector<2x64x256xbf16>
    %92 = arith.extf %91 : vector<2x64x256xbf16> to vector<2x64x256xf32>
    %cst_32 = arith.constant dense<0.000000e+00> : vector<2x64xf32>
    %93 = vector.multi_reduction <add>, %92, %cst_32 [2] : vector<2x64x256xf32> to vector<2x64xf32>
    %94 = vector.shape_cast %93 : vector<2x64xf32> to vector<2x64x1xf32>
    %cst_33 = arith.constant dense<0.000000e+00> : vector<2x1xf32>
    %95 = vector.multi_reduction <add>, %94, %cst_33 [1] : vector<2x64x1xf32> to vector<2x1xf32>
    %96 = vector.shape_cast %95 : vector<2x1xf32> to vector<2x1x1xf32>
    %c4_i32 = arith.constant 4 : i32
    %97 = vector.broadcast %c4_i32 : i32 to vector<1x128xi32>
    %98 = arith.cmpi eq, %2, %97 : vector<1x128xi32>
    %99 = vector.shape_cast %96 : vector<2x1x1xf32> to vector<2x1xf32>
    %cst_34 = arith.constant 0.000000e+00 : f32
    %100 = vector.shape_cast %98 : vector<1x128xi1> to vector<1x128xi1>
    %101 = vector.broadcast %100 : vector<1x128xi1> to vector<2x128xi1>
    %102 = vector.shape_cast %99 : vector<2x1xf32> to vector<2x1xf32>
    %103 = vector.broadcast %102 : vector<2x1xf32> to vector<2x128xf32>
    %104 = vector.broadcast %cst_34 : f32 to vector<2x128xf32>
    %105 = arith.select %101, %103, %104 : vector<2x128xi1>, vector<2x128xf32>
    %106 = arith.addf %86, %105 : vector<2x128xf32>
    %c5 = arith.constant 5 : index
    %c0_35 = arith.constant 0 : index
    %c0_36 = arith.constant 0 : index
    %107 = vector.load %arg4[%c5, %c0_35, %c0_36] : memref<10x64x256xbf16, #tpu.memory_space<vmem>>, vector<1x64x256xbf16>
    %108 = vector.shape_cast %107 : vector<1x64x256xbf16> to vector<64x256xbf16>
    %109 = vector.shape_cast %108 : vector<64x256xbf16> to vector<1x64x256xbf16>
    %110 = vector.broadcast %109 : vector<1x64x256xbf16> to vector<2x64x256xbf16>
    %111 = arith.mulf %6, %110 : vector<2x64x256xbf16>
    %112 = arith.extf %111 : vector<2x64x256xbf16> to vector<2x64x256xf32>
    %cst_37 = arith.constant dense<0.000000e+00> : vector<2x64xf32>
    %113 = vector.multi_reduction <add>, %112, %cst_37 [2] : vector<2x64x256xf32> to vector<2x64xf32>
    %114 = vector.shape_cast %113 : vector<2x64xf32> to vector<2x64x1xf32>
    %cst_38 = arith.constant dense<0.000000e+00> : vector<2x1xf32>
    %115 = vector.multi_reduction <add>, %114, %cst_38 [1] : vector<2x64x1xf32> to vector<2x1xf32>
    %116 = vector.shape_cast %115 : vector<2x1xf32> to vector<2x1x1xf32>
    %c5_i32 = arith.constant 5 : i32
    %117 = vector.broadcast %c5_i32 : i32 to vector<1x128xi32>
    %118 = arith.cmpi eq, %2, %117 : vector<1x128xi32>
    %119 = vector.shape_cast %116 : vector<2x1x1xf32> to vector<2x1xf32>
    %cst_39 = arith.constant 0.000000e+00 : f32
    %120 = vector.shape_cast %118 : vector<1x128xi1> to vector<1x128xi1>
    %121 = vector.broadcast %120 : vector<1x128xi1> to vector<2x128xi1>
    %122 = vector.shape_cast %119 : vector<2x1xf32> to vector<2x1xf32>
    %123 = vector.broadcast %122 : vector<2x1xf32> to vector<2x128xf32>
    %124 = vector.broadcast %cst_39 : f32 to vector<2x128xf32>
    %125 = arith.select %121, %123, %124 : vector<2x128xi1>, vector<2x128xf32>
    %126 = arith.addf %106, %125 : vector<2x128xf32>
    %c6 = arith.constant 6 : index
    %c0_40 = arith.constant 0 : index
    %c0_41 = arith.constant 0 : index
    %127 = vector.load %arg4[%c6, %c0_40, %c0_41] : memref<10x64x256xbf16, #tpu.memory_space<vmem>>, vector<1x64x256xbf16>
    %128 = vector.shape_cast %127 : vector<1x64x256xbf16> to vector<64x256xbf16>
    %129 = vector.shape_cast %128 : vector<64x256xbf16> to vector<1x64x256xbf16>
    %130 = vector.broadcast %129 : vector<1x64x256xbf16> to vector<2x64x256xbf16>
    %131 = arith.mulf %6, %130 : vector<2x64x256xbf16>
    %132 = arith.extf %131 : vector<2x64x256xbf16> to vector<2x64x256xf32>
    %cst_42 = arith.constant dense<0.000000e+00> : vector<2x64xf32>
    %133 = vector.multi_reduction <add>, %132, %cst_42 [2] : vector<2x64x256xf32> to vector<2x64xf32>
    %134 = vector.shape_cast %133 : vector<2x64xf32> to vector<2x64x1xf32>
    %cst_43 = arith.constant dense<0.000000e+00> : vector<2x1xf32>
    %135 = vector.multi_reduction <add>, %134, %cst_43 [1] : vector<2x64x1xf32> to vector<2x1xf32>
    %136 = vector.shape_cast %135 : vector<2x1xf32> to vector<2x1x1xf32>
    %c6_i32 = arith.constant 6 : i32
    %137 = vector.broadcast %c6_i32 : i32 to vector<1x128xi32>
    %138 = arith.cmpi eq, %2, %137 : vector<1x128xi32>
    %139 = vector.shape_cast %136 : vector<2x1x1xf32> to vector<2x1xf32>
    %cst_44 = arith.constant 0.000000e+00 : f32
    %140 = vector.shape_cast %138 : vector<1x128xi1> to vector<1x128xi1>
    %141 = vector.broadcast %140 : vector<1x128xi1> to vector<2x128xi1>
    %142 = vector.shape_cast %139 : vector<2x1xf32> to vector<2x1xf32>
    %143 = vector.broadcast %142 : vector<2x1xf32> to vector<2x128xf32>
    %144 = vector.broadcast %cst_44 : f32 to vector<2x128xf32>
    %145 = arith.select %141, %143, %144 : vector<2x128xi1>, vector<2x128xf32>
    %146 = arith.addf %126, %145 : vector<2x128xf32>
    %c7 = arith.constant 7 : index
    %c0_45 = arith.constant 0 : index
    %c0_46 = arith.constant 0 : index
    %147 = vector.load %arg4[%c7, %c0_45, %c0_46] : memref<10x64x256xbf16, #tpu.memory_space<vmem>>, vector<1x64x256xbf16>
    %148 = vector.shape_cast %147 : vector<1x64x256xbf16> to vector<64x256xbf16>
    %149 = vector.shape_cast %148 : vector<64x256xbf16> to vector<1x64x256xbf16>
    %150 = vector.broadcast %149 : vector<1x64x256xbf16> to vector<2x64x256xbf16>
    %151 = arith.mulf %6, %150 : vector<2x64x256xbf16>
    %152 = arith.extf %151 : vector<2x64x256xbf16> to vector<2x64x256xf32>
    %cst_47 = arith.constant dense<0.000000e+00> : vector<2x64xf32>
    %153 = vector.multi_reduction <add>, %152, %cst_47 [2] : vector<2x64x256xf32> to vector<2x64xf32>
    %154 = vector.shape_cast %153 : vector<2x64xf32> to vector<2x64x1xf32>
    %cst_48 = arith.constant dense<0.000000e+00> : vector<2x1xf32>
    %155 = vector.multi_reduction <add>, %154, %cst_48 [1] : vector<2x64x1xf32> to vector<2x1xf32>
    %156 = vector.shape_cast %155 : vector<2x1xf32> to vector<2x1x1xf32>
    %c7_i32 = arith.constant 7 : i32
    %157 = vector.broadcast %c7_i32 : i32 to vector<1x128xi32>
    %158 = arith.cmpi eq, %2, %157 : vector<1x128xi32>
    %159 = vector.shape_cast %156 : vector<2x1x1xf32> to vector<2x1xf32>
    %cst_49 = arith.constant 0.000000e+00 : f32
    %160 = vector.shape_cast %158 : vector<1x128xi1> to vector<1x128xi1>
    %161 = vector.broadcast %160 : vector<1x128xi1> to vector<2x128xi1>
    %162 = vector.shape_cast %159 : vector<2x1xf32> to vector<2x1xf32>
    %163 = vector.broadcast %162 : vector<2x1xf32> to vector<2x128xf32>
    %164 = vector.broadcast %cst_49 : f32 to vector<2x128xf32>
    %165 = arith.select %161, %163, %164 : vector<2x128xi1>, vector<2x128xf32>
    %166 = arith.addf %146, %165 : vector<2x128xf32>
    %c8 = arith.constant 8 : index
    %c0_50 = arith.constant 0 : index
    %c0_51 = arith.constant 0 : index
    %167 = vector.load %arg4[%c8, %c0_50, %c0_51] : memref<10x64x256xbf16, #tpu.memory_space<vmem>>, vector<1x64x256xbf16>
    %168 = vector.shape_cast %167 : vector<1x64x256xbf16> to vector<64x256xbf16>
    %169 = vector.shape_cast %168 : vector<64x256xbf16> to vector<1x64x256xbf16>
    %170 = vector.broadcast %169 : vector<1x64x256xbf16> to vector<2x64x256xbf16>
    %171 = arith.mulf %6, %170 : vector<2x64x256xbf16>
    %172 = arith.extf %171 : vector<2x64x256xbf16> to vector<2x64x256xf32>
    %cst_52 = arith.constant dense<0.000000e+00> : vector<2x64xf32>
    %173 = vector.multi_reduction <add>, %172, %cst_52 [2] : vector<2x64x256xf32> to vector<2x64xf32>
    %174 = vector.shape_cast %173 : vector<2x64xf32> to vector<2x64x1xf32>
    %cst_53 = arith.constant dense<0.000000e+00> : vector<2x1xf32>
    %175 = vector.multi_reduction <add>, %174, %cst_53 [1] : vector<2x64x1xf32> to vector<2x1xf32>
    %176 = vector.shape_cast %175 : vector<2x1xf32> to vector<2x1x1xf32>
    %c8_i32 = arith.constant 8 : i32
    %177 = vector.broadcast %c8_i32 : i32 to vector<1x128xi32>
    %178 = arith.cmpi eq, %2, %177 : vector<1x128xi32>
    %179 = vector.shape_cast %176 : vector<2x1x1xf32> to vector<2x1xf32>
    %cst_54 = arith.constant 0.000000e+00 : f32
    %180 = vector.shape_cast %178 : vector<1x128xi1> to vector<1x128xi1>
    %181 = vector.broadcast %180 : vector<1x128xi1> to vector<2x128xi1>
    %182 = vector.shape_cast %179 : vector<2x1xf32> to vector<2x1xf32>
    %183 = vector.broadcast %182 : vector<2x1xf32> to vector<2x128xf32>
    %184 = vector.broadcast %cst_54 : f32 to vector<2x128xf32>
    %185 = arith.select %181, %183, %184 : vector<2x128xi1>, vector<2x128xf32>
    %186 = arith.addf %166, %185 : vector<2x128xf32>
    %c9 = arith.constant 9 : index
    %c0_55 = arith.constant 0 : index
    %c0_56 = arith.constant 0 : index
    %187 = vector.load %arg4[%c9, %c0_55, %c0_56] : memref<10x64x256xbf16, #tpu.memory_space<vmem>>, vector<1x64x256xbf16>
    %188 = vector.shape_cast %187 : vector<1x64x256xbf16> to vector<64x256xbf16>
    %189 = vector.shape_cast %188 : vector<64x256xbf16> to vector<1x64x256xbf16>
    %190 = vector.broadcast %189 : vector<1x64x256xbf16> to vector<2x64x256xbf16>
    %191 = arith.mulf %6, %190 : vector<2x64x256xbf16>
    %192 = arith.extf %191 : vector<2x64x256xbf16> to vector<2x64x256xf32>
    %cst_57 = arith.constant dense<0.000000e+00> : vector<2x64xf32>
    %193 = vector.multi_reduction <add>, %192, %cst_57 [2] : vector<2x64x256xf32> to vector<2x64xf32>
    %194 = vector.shape_cast %193 : vector<2x64xf32> to vector<2x64x1xf32>
    %cst_58 = arith.constant dense<0.000000e+00> : vector<2x1xf32>
    %195 = vector.multi_reduction <add>, %194, %cst_58 [1] : vector<2x64x1xf32> to vector<2x1xf32>
    %196 = vector.shape_cast %195 : vector<2x1xf32> to vector<2x1x1xf32>
    %c9_i32 = arith.constant 9 : i32
    %197 = vector.broadcast %c9_i32 : i32 to vector<1x128xi32>
    %198 = arith.cmpi eq, %2, %197 : vector<1x128xi32>
    %199 = vector.shape_cast %196 : vector<2x1x1xf32> to vector<2x1xf32>
    %cst_59 = arith.constant 0.000000e+00 : f32
    %200 = vector.shape_cast %198 : vector<1x128xi1> to vector<1x128xi1>
    %201 = vector.broadcast %200 : vector<1x128xi1> to vector<2x128xi1>
    %202 = vector.shape_cast %199 : vector<2x1xf32> to vector<2x1xf32>
    %203 = vector.broadcast %202 : vector<2x1xf32> to vector<2x128xf32>
    %204 = vector.broadcast %cst_59 : f32 to vector<2x128xf32>
    %205 = arith.select %201, %203, %204 : vector<2x128xi1>, vector<2x128xf32>
    %206 = arith.addf %186, %205 : vector<2x128xf32>
    %c0_60 = arith.constant 0 : index
    %c0_61 = arith.constant 0 : index
    %c0_62 = arith.constant 0 : index
    %207 = vector.load %arg6[%c0_60, %c0_61, %c0_62] : memref<1x2x128xf32, #tpu.memory_space<vmem>>, vector<1x2x128xf32>
    %208 = vector.shape_cast %207 : vector<1x2x128xf32> to vector<2x128xf32>
    %209 = vector.shape_cast %206 : vector<2x128xf32> to vector<1x2x128xf32>
    tpu.vector_store %arg6[%c0_60, %c0_61, %c0_62], %209 {strides = array<i32>} : memref<1x2x128xf32, #tpu.memory_space<vmem>>, vector<1x2x128xf32>,
    return
  }
  func.func @transform_0(%arg0: i32) -> (i32, i32, i32) {
    %c0_i32 = arith.constant 0 : i32
    %c0_i32_0 = arith.constant 0 : i32
    %c0_i32_1 = arith.constant 0 : i32
    return %arg0, %c0_i32, %c0_i32_0 : i32, i32, i32
  }
  func.func @transform_1(%arg0: i32) -> (i32, i32, i32) {
    %c0_i32 = arith.constant 0 : i32
    %c0_i32_0 = arith.constant 0 : i32
    %c0_i32_1 = arith.constant 0 : i32
    %c0_i32_2 = arith.constant 0 : i32
    return %c0_i32, %c0_i32_0, %c0_i32_1 : i32, i32, i32
  }
  func.func @transform_2(%arg0: i32) -> (i32, i32) {
    %c0_i32 = arith.constant 0 : i32
    %c0_i32_0 = arith.constant 0 : i32
    %c0_i32_1 = arith.constant 0 : i32
    return %c0_i32, %c0_i32_0 : i32, i32
  }
  func.func @transform_3(%arg0: i32) -> (i32, i32, i32) {
    %c0_i32 = arith.constant 0 : i32
    %c0_i32_0 = arith.constant 0 : i32
    %c0_i32_1 = arith.constant 0 : i32
    %c0_i32_2 = arith.constant 0 : i32
    return %c0_i32, %c0_i32_0, %c0_i32_1 : i32, i32, i32
  }
  func.func @transform_4(%arg0: i32) -> (i32, i32) {
    %c0_i32 = arith.constant 0 : i32
    %c0_i32_0 = arith.constant 0 : i32
    %c0_i32_1 = arith.constant 0 : i32
    return %c0_i32, %c0_i32_0 : i32, i32
  }
  func.func @transform_5(%arg0: i32) -> (i32, i32, i32) {
    %c0_i32 = arith.constant 0 : i32
    %c0_i32_0 = arith.constant 0 : i32
    %c0_i32_1 = arith.constant 0 : i32
    return %arg0, %c0_i32, %c0_i32_0 : i32, i32, i32
  }
}

</mosaic_0001>

<bundles_post_ra>
// kernel: squeeze.1
= control target key start
LH: loop header
LB: loop body
LE: loop exit
PB: predicated region body
PF: predicated region fallthrough
CT: control target
= control target key end

     0   :  { %vm282_vm0 = vcmask 1047556   ;;  %s2270_s27 = smov 126   ;;  %s2272_s5 = smov 122   ;;  %vm142_vm1 = vcmask 15360   ;;  %s4092_s0 = inlined_call_operand.vmem [shape: f32[2,1,28,28], index: 0, kind: input, shape index: {}]   ;;  %s4093_s1 = inlined_call_operand.vmem [shape: f32[2,14,2,14,2], index: 1, kind: output, shape index: {}]  }
   0x1   :  { %v1863_v0 = vld [vmem:[%s4092_s0 + $0x6] sm:$0x3]  ;;  %v1864_v1 = vld [vmem:[%s4092_s0 + $0x4] sm:$0x3]  ;;  %v1865_v2 = vld [vmem:[%s4092_s0 + $0x2] sm:$0x3] }
   0x2   :  { %129 = vst [vmem:[#allocation0 + $0x18] sm:$0x3] %v1863_v0  ;;  %134 = vst [vmem:[#allocation0 + $0x10] sm:$0x3] %v1864_v1  ;;  %v139_v3 = vld [vmem:[%s4092_s0] sm:$0x3] }
   0x3   :  { %138 = vst [vmem:[#allocation0 + $0x8] sm:$0x3] %v1865_v2  ;;  %v1859_v4 = vld [vmem:[%s4092_s0 + $0xe] sm:$0x3]  ;;  %140 = vst [vmem:[#allocation0] sm:$0x3] %v139_v3 }
   0x4   :  { %109 = vst [vmem:[#allocation0 + $0x38] sm:$0x3] %v1859_v4  ;;  %v1860_v5 = vld [vmem:[%s4092_s0 + $0xc] sm:$0x3]  ;;  %v1861_v6 = vld [vmem:[%s4092_s0 + $0xa] sm:$0x3] }
   0x5   :  { %v1862_v7 = vld [vmem:[%s4092_s0 + $0x8] sm:$0x3]  ;;  %114 = vst [vmem:[#allocation0 + $0x30] sm:$0x3] %v1860_v5  ;;  %119 = vst [vmem:[#allocation0 + $0x28] sm:$0x3] %v1861_v6 }
   0x6   :  { %124 = vst [vmem:[#allocation0 + $0x20] sm:$0x3] %v1862_v7  ;;  %v1855_v8 = vld [vmem:[%s4092_s0 + $0x16] sm:$0x3]  ;;  %v1856_v9 = vld [vmem:[%s4092_s0 + $0x14] sm:$0x3] }
   0x7   :  { %v1857_v10 = vld [vmem:[%s4092_s0 + $0x12] sm:$0x3]  ;;  %89 = vst [vmem:[#allocation0 + $0x58] sm:$0x3] %v1855_v8  ;;  %94 = vst [vmem:[#allocation0 + $0x50] sm:$0x3] %v1856_v9 }
   0x8   :  { %99 = vst [vmem:[#allocation0 + $0x48] sm:$0x3] %v1857_v10  ;;  %v1858_v11 = vld [vmem:[%s4092_s0 + $0x10] sm:$0x3]  ;;  %v1851_v12 = vld [vmem:[%s4092_s0 + $0x1e] sm:$0x3] }
   0x9   :  { %v1852_v13 = vld [vmem:[%s4092_s0 + $0x1c] sm:$0x3]  ;;  %104 = vst [vmem:[#allocation0 + $0x40] sm:$0x3] %v1858_v11  ;;  %69 = vst [vmem:[#allocation0 + $0x78] sm:$0x3] %v1851_v12 }
   0xa   :  { %74 = vst [vmem:[#allocation0 + $0x70] sm:$0x3] %v1852_v13  ;;  %v1853_v14 = vld [vmem:[%s4092_s0 + $0x1a] sm:$0x3]  ;;  %v1854_v15 = vld [vmem:[%s4092_s0 + $0x18] sm:$0x3] }
   0xb   :  { %v1847_v16 = vld [vmem:[%s4092_s0 + $0x26] sm:$0x3]  ;;  %79 = vst [vmem:[#allocation0 + $0x68] sm:$0x3] %v1853_v14  ;;  %84 = vst [vmem:[#allocation0 + $0x60] sm:$0x3] %v1854_v15 }
   0xc   :  { %49 = vst [vmem:[#allocation0 + $0x98] sm:$0x3] %v1847_v16  ;;  %v1848_v17 = vld [vmem:[%s4092_s0 + $0x24] sm:$0x3]  ;;  %v1849_v18 = vld [vmem:[%s4092_s0 + $0x22] sm:$0x3] }
   0xd   :  { %v1850_v19 = vld [vmem:[%s4092_s0 + $0x20] sm:$0x3]  ;;  %54 = vst [vmem:[#allocation0 + $0x90] sm:$0x3] %v1848_v17  ;;  %59 = vst [vmem:[#allocation0 + $0x88] sm:$0x3] %v1849_v18 }
   0xe   :  { %64 = vst [vmem:[#allocation0 + $0x80] sm:$0x3] %v1850_v19  ;;  %v1843_v20 = vld [vmem:[%s4092_s0 + $0x2e] sm:$0x3]  ;;  %v1844_v21 = vld [vmem:[%s4092_s0 + $0x2c] sm:$0x3] }
   0xf   :  { %v1845_v22 = vld [vmem:[%s4092_s0 + $0x2a] sm:$0x3]  ;;  %v281_v23 = vld.sshfl [vmem:[#allocation0 + $0x10] sm:$0xff pattern:$0x98100000]   ;;  %s2273_s6 = smov 120  }
  0x10   :  { %29 = vst [vmem:[#allocation0 + $0xb8] sm:$0x3] %v1843_v20  ;;  %34 = vst [vmem:[#allocation0 + $0xb0] sm:$0x3] %v1844_v21  ;;  %v1846_v24 = vld [vmem:[%s4092_s0 + $0x28] sm:$0x3] }
  0x11   :  { %39 = vst [vmem:[#allocation0 + $0xa8] sm:$0x3] %v1845_v22  ;;  %v279_v25 = vld.sshfl [vmem:[#allocation0] sm:$0xff pattern:$0x99999810]   ;;  %s2274_s7 = smov 118  }
  0x12   :  { %44 = vst [vmem:[#allocation0 + $0xa0] sm:$0x3] %v1846_v24  ;;  %v1839_v26 = vld [vmem:[%s4092_s0 + $0x36] sm:$0x3]  ;;  %v2369_v27 = vsel %vm282_vm0, %v281_v23, %v279_v25  ;;  %v1840_v31 = vld [vmem:[%s4092_s0 + $0x34] sm:$0x3] }
  0x13   :  { %v296_v28 = vld.sshfl [vmem:[#allocation0 + $0x20] sm:$0xff pattern:$0x99999810]   ;;  %v298_v29 = vld.sshfl [vmem:[#allocation0 + $0x30] sm:$0xff pattern:$0x98100000]   ;;  %284 = vrot.lane.b32.xlu0 %v2369_v27, %s2270_s27 }
  0x14   :  { %9 = vst [vmem:[#allocation0 + $0xd8] sm:$0x3] %v1839_v26  ;;  %v315_v30 = vld.sshfl [vmem:[#allocation0 + $0x50] sm:$0xff pattern:$0x98100000]   ;;  %v2376_v32 = vsel %vm282_vm0, %v298_v29, %v296_v28  ;;  %s2275_s8 = smov 116  }
  0x15   :  { %v313_v33 = vld.sshfl [vmem:[#allocation0 + $0x40] sm:$0xff pattern:$0x99999810]   ;;  %v332_v34 = vld.sshfl [vmem:[#allocation0 + $0x70] sm:$0xff pattern:$0x98100000]  }
  0x16   :  { %14 = vst [vmem:[#allocation0 + $0xd0] sm:$0x3] %v1840_v31  ;;  %v2379_v35 = vsel %vm282_vm0, %v315_v30, %v313_v33  ;;  %v330_v36 = vld.sshfl [vmem:[#allocation0 + $0x60] sm:$0xff pattern:$0x99999810]   ;;  %s2276_s9 = smov 114  }
  0x17   :  { %v1841_v37 = vld [vmem:[%s4092_s0 + $0x32] sm:$0x3]  ;;  %318 = vrot.lane.b32.xlu1 %v2379_v35, %s2270_s27  ;;  %v347_v38 = vld.sshfl [vmem:[#allocation0 + $0x80] sm:$0xff pattern:$0x99999810]   ;;  %301 = vrot.lane.b32.xlu0 %v2376_v32, %s2270_s27  ;;  %v2387_v40 = vsel %vm282_vm0, %v332_v34, %v330_v36  ;;  %s2277_s10 = smov 112  }
  0x18   :  { %v349_v39 = vld.sshfl [vmem:[#allocation0 + $0x90] sm:$0xff pattern:$0x98100000]   ;;  %19 = vst [vmem:[#allocation0 + $0xc8] sm:$0x3] %v1841_v37  ;;  %s2278_s11 = smov 110  }
  0x19   :  { %v1842_v41 = vld [vmem:[%s4092_s0 + $0x30] sm:$0x3]  ;;  %v2393_v42 = vsel %vm282_vm0, %v349_v39, %v347_v38  ;;  %v364_v43 = vld.sshfl [vmem:[#allocation0 + $0xa0] sm:$0xff pattern:$0x99999810]   ;;  %s2271_s0 = smov 124  }
  0x1a   :  { %v366_v44 = vld.sshfl [vmem:[#allocation0 + $0xb0] sm:$0xff pattern:$0x98100000]   ;;  %24 = vst [vmem:[#allocation0 + $0xc0] sm:$0x3] %v1842_v41  ;;  %s2279_s30 = smov 108  }
  0x1b   :  { %335 = vrot.lane.b32.xlu1 %v2387_v40, %s2270_s27  ;;  %352 = vrot.lane.b32.xlu0 %v2393_v42, %s2270_s27  ;;  %v2398_v45 = vsel %vm282_vm0, %v366_v44, %v364_v43  ;;  %s2281_s24 = smov 104   ;;  %v1695_v9 = vld.sshfl [vmem:[#allocation0] sm:$0xff pattern:$0x99999810]   ;;  %v150_v24 = vld [vmem:[#allocation0 + $0x10] sm:$0x3]  }
  0x1c   :  { %v1697_v11 = vld.sshfl [vmem:[#allocation0 + $0x10] sm:$0xff pattern:$0x98100000]   ;;  %v1712_v13 = vld.sshfl [vmem:[#allocation0 + $0x20] sm:$0xff pattern:$0x99999810]  }
  0x1d   :  { %v383_v46 = vld.sshfl [vmem:[#allocation0 + $0xd0] sm:$0xff pattern:$0x98100000]   ;;  %v1729_v15 = vld.sshfl [vmem:[#allocation0 + $0x40] sm:$0xff pattern:$0x99999810]   ;;  %v1699_v17 = vsel %vm282_vm0, %v1697_v11, %v1695_v9 }
  0x1e   :  { %v1714_v14 = vld.sshfl [vmem:[#allocation0 + $0x30] sm:$0xff pattern:$0x98100000]   ;;  %v1746_v18 = vld.sshfl [vmem:[#allocation0 + $0x60] sm:$0xff pattern:$0x99999810]  }
  0x1f   :  { %369 = vrot.lane.b32.xlu1 %v2398_v45, %s2270_s27  ;;  %v1731_v16 = vld.sshfl [vmem:[#allocation0 + $0x50] sm:$0xff pattern:$0x98100000]   ;;  %v1716_v21 = vsel %vm282_vm0, %v1714_v14, %v1712_v13  ;;  %v141_v22 = vld [vmem:[#allocation0] sm:$0x3]   ;;  %s2282_s29 = smov 102  }
  0x20   :  { %v1748_v19 = vld.sshfl [vmem:[#allocation0 + $0x70] sm:$0xff pattern:$0x98100000]   ;;  %v145_v23 = vld [vmem:[#allocation0 + $0x8] sm:$0x3]   ;;  %v1733_v34 = vsel %vm282_vm0, %v1731_v16, %v1729_v15 }
  0x21   :  { %v381_v47 = vld.sshfl [vmem:[#allocation0 + $0xc0] sm:$0xff pattern:$0x99999810]   ;;  %143 = vst.msk [vmem:[%s4093_s1] ss:$16 sm:$0x3] %vm142_vm1, %v141_v22   ;;  %v1750_v41 = vsel %vm282_vm0, %v1748_v19, %v1746_v18 }
  0x22   :  { %v2402_v48 = vsel %vm282_vm0, %v383_v46, %v381_v47  ;;  %1866 = vst.msk [vmem:[%s4093_s1 + $0x20] ss:$16 sm:$0x3] %vm142_vm1, %v145_v23   ;;  %1867 = vst.msk [vmem:[%s4093_s1 + $0x40] ss:$16 sm:$0x3] %vm142_vm1, %v150_v24  }
  0x23   :  { %386 = vrot.lane.b32.xlu0 %v2402_v48, %s2270_s27  ;;  %402 = vrot.lane.b32.xlu1 %v2369_v27, %s2271_s0  ;;  %s2280_s27 = smov 106   ;;  %v155_v26 = vld [vmem:[#allocation0 + $0x18] sm:$0x3]   ;;  %v165_v28 = vld [vmem:[#allocation0 + $0x28] sm:$0x3]  }
  0x24   :  { %v1763_v29 = vld.sshfl [vmem:[#allocation0 + $0x80] sm:$0xff pattern:$0x99999810]   ;;  %v1765_v30 = vld.sshfl [vmem:[#allocation0 + $0x90] sm:$0xff pattern:$0x98100000]  }
  0x25   :  { %1868 = vst.msk [vmem:[%s4093_s1 + $0x60] ss:$16 sm:$0x3] %vm142_vm1, %v155_v26   ;;  %1870 = vst.msk [vmem:[%s4093_s1 + $0xa0] ss:$16 sm:$0x3] %vm142_vm1, %v165_v28  }
  0x26   :  { %v170_v31 = vld [vmem:[#allocation0 + $0x30] sm:$0x3]   ;;  %v180_v33 = vld [vmem:[#allocation0 + $0x40] sm:$0x3]   ;;  %v185_v37 = vld [vmem:[#allocation0 + $0x48] sm:$0x3]  }
  0x27   :  { %419 = vrot.lane.b32.xlu0 %v2376_v32, %s2271_s0  ;;  %436 = vrot.lane.b32.xlu1 %v2379_v35, %s2271_s0  ;;  %v1782_v36 = vld.sshfl [vmem:[#allocation0 + $0xb0] sm:$0xff pattern:$0x98100000]   ;;  %1871 = vst.msk [vmem:[%s4093_s1 + $0xc0] ss:$16 sm:$0x3] %vm142_vm1, %v170_v31  }
  0x28   :  { %1873 = vst.msk [vmem:[%s4093_s1 + $0x100] ss:$16 sm:$0x3] %vm142_vm1, %v180_v33   ;;  %v190_v38 = vld [vmem:[#allocation0 + $0x50] sm:$0x3]  }
  0x29   :  { %v195_v39 = vld [vmem:[#allocation0 + $0x58] sm:$0x3]   ;;  %1874 = vst.msk [vmem:[%s4093_s1 + $0x120] ss:$16 sm:$0x3] %vm142_vm1, %v185_v37  }
  0x2a   :  { %1875 = vst.msk [vmem:[%s4093_s1 + $0x140] ss:$16 sm:$0x3] %vm142_vm1, %v190_v38   ;;  %1876 = vst.msk [vmem:[%s4093_s1 + $0x160] ss:$16 sm:$0x3] %vm142_vm1, %v195_v39  }
  0x2b   :  { %453 = vrot.lane.b32.xlu0 %v2387_v40, %s2271_s0  ;;  %470 = vrot.lane.b32.xlu1 %v2393_v42, %s2271_s0  ;;  %v205_v43 = vld [vmem:[#allocation0 + $0x68] sm:$0x3]   ;;  %v210_v44 = vld [vmem:[#allocation0 + $0x70] sm:$0x3]   ;;  %v215_v46 = vld [vmem:[#allocation0 + $0x78] sm:$0x3]  }
  0x2c   :  { %1878 = vst.msk [vmem:[%s4093_s1 + $0x1a0] ss:$16 sm:$0x3] %vm142_vm1, %v205_v43   ;;  %1879 = vst.msk [vmem:[%s4093_s1 + $0x1c0] ss:$16 sm:$0x3] %vm142_vm1, %v210_v44  }
  0x2d   :  { %v220_v47 = vld [vmem:[#allocation0 + $0x80] sm:$0x3]   ;;  %1880 = vst.msk [vmem:[%s4093_s1 + $0x1e0] ss:$16 sm:$0x3] %vm142_vm1, %v215_v46  }
  0x2e   :  { %1881 = vst.msk [vmem:[%s4093_s1 + $0x200] ss:$16 sm:$0x3] %vm142_vm1, %v220_v47  }
  0x2f   :  { %487 = vrot.lane.b32.xlu0 %v2398_v45, %s2271_s0  ;;  %504 = vrot.lane.b32.xlu1 %v2402_v48, %s2271_s0 }
  0x33   :  { %520 = vrot.lane.b32.xlu0 %v2369_v27, %s2272_s5  ;;  %537 = vrot.lane.b32.xlu1 %v2376_v32, %s2272_s5 }
  0x37   :  { %554 = vrot.lane.b32.xlu0 %v2379_v35, %s2272_s5  ;;  %571 = vrot.lane.b32.xlu1 %v2387_v40, %s2272_s5 }
  0x3b   :  { %588 = vrot.lane.b32.xlu0 %v2393_v42, %s2272_s5  ;;  %605 = vrot.lane.b32.xlu1 %v2398_v45, %s2272_s5 }
  0x3f   :  { %622 = vrot.lane.b32.xlu0 %v2402_v48, %s2272_s5  ;;  %638 = vrot.lane.b32.xlu1 %v2369_v27, %s2273_s6 }
  0x43   :  { %655 = vrot.lane.b32.xlu0 %v2376_v32, %s2273_s6  ;;  %672 = vrot.lane.b32.xlu1 %v2379_v35, %s2273_s6 }
  0x47   :  { %689 = vrot.lane.b32.xlu0 %v2387_v40, %s2273_s6  ;;  %706 = vrot.lane.b32.xlu1 %v2393_v42, %s2273_s6 }
  0x4b   :  { %723 = vrot.lane.b32.xlu0 %v2398_v45, %s2273_s6  ;;  %740 = vrot.lane.b32.xlu1 %v2402_v48, %s2273_s6 }
  0x4f   :  { %756 = vrot.lane.b32.xlu0 %v2369_v27, %s2274_s7  ;;  %773 = vrot.lane.b32.xlu1 %v2376_v32, %s2274_s7 }
  0x53   :  { %790 = vrot.lane.b32.xlu0 %v2379_v35, %s2274_s7  ;;  %807 = vrot.lane.b32.xlu1 %v2387_v40, %s2274_s7 }
  0x57   :  { %824 = vrot.lane.b32.xlu0 %v2393_v42, %s2274_s7  ;;  %841 = vrot.lane.b32.xlu1 %v2398_v45, %s2274_s7 }
  0x5b   :  { %858 = vrot.lane.b32.xlu0 %v2402_v48, %s2274_s7  ;;  %874 = vrot.lane.b32.xlu1 %v2369_v27, %s2275_s8 }
  0x5f   :  { %891 = vrot.lane.b32.xlu0 %v2376_v32, %s2275_s8  ;;  %908 = vrot.lane.b32.xlu1 %v2379_v35, %s2275_s8 }
  0x63   :  { %925 = vrot.lane.b32.xlu0 %v2387_v40, %s2275_s8  ;;  %942 = vrot.lane.b32.xlu1 %v2393_v42, %s2275_s8 }
  0x67   :  { %959 = vrot.lane.b32.xlu0 %v2398_v45, %s2275_s8  ;;  %976 = vrot.lane.b32.xlu1 %v2402_v48, %s2275_s8 }
  0x6b   :  { %992 = vrot.lane.b32.xlu0 %v2369_v27, %s2276_s9  ;;  %1009 = vrot.lane.b32.xlu1 %v2376_v32, %s2276_s9 }
  0x6f   :  { %1026 = vrot.lane.b32.xlu0 %v2379_v35, %s2276_s9  ;;  %1043 = vrot.lane.b32.xlu1 %v2387_v40, %s2276_s9 }
  0x73   :  { %1060 = vrot.lane.b32.xlu0 %v2393_v42, %s2276_s9  ;;  %1077 = vrot.lane.b32.xlu1 %v2398_v45, %s2276_s9 }
  0x77   :  { %1094 = vrot.lane.b32.xlu0 %v2402_v48, %s2276_s9  ;;  %1110 = vrot.lane.b32.xlu1 %v2369_v27, %s2277_s10 }
  0x7b   :  { %1127 = vrot.lane.b32.xlu0 %v2376_v32, %s2277_s10  ;;  %1144 = vrot.lane.b32.xlu1 %v2379_v35, %s2277_s10 }
  0x7f   :  { %1161 = vrot.lane.b32.xlu0 %v2387_v40, %s2277_s10  ;;  %1178 = vrot.lane.b32.xlu1 %v2393_v42, %s2277_s10 }
  0x83   :  { %1195 = vrot.lane.b32.xlu0 %v2398_v45, %s2277_s10  ;;  %1212 = vrot.lane.b32.xlu1 %v2402_v48, %s2277_s10 }
  0x85   :  { %v285_v49 = vpop.permute.xlu0 %284  }
  0x86   :  { %1893 = vst.msk [vmem:[%s4093_s1 + $0x1] ss:$16 sm:$0x3] %vm142_vm1, %v285_v49   ;;  %1894 = vst.msk [vmem:[%s4093_s1 + $0x1] ss:$16 sm:$0xc] %vm142_vm1, %v285_v49  }
  0x87   :  { %1228 = vrot.lane.b32.xlu0 %v2369_v27, %s2278_s11  ;;  %1895 = vst.msk [vmem:[%s4093_s1 + $0x1] ss:$16 sm:$0x30] %vm142_vm1, %v285_v49   ;;  %1896 = vst.msk [vmem:[%s4093_s1 + $0x1] ss:$16 sm:$0xc0] %vm142_vm1, %v285_v49   ;;  %1245 = vrot.lane.b32.xlu1 %v2376_v32, %s2278_s11 }
  0x88   :  { %v1797_v49 = vld.sshfl [vmem:[#allocation0 + $0xc0] sm:$0xff pattern:$0x99999810]  }
  0x89   :  { %v319_v50 = vpop.permute.xlu1 %318   ;;  %v302_v51 = vpop.permute.xlu0 %301  }
  0x8a   :  { %1901 = vst.msk [vmem:[%s4093_s1 + $0x101] ss:$16 sm:$0x3] %vm142_vm1, %v319_v50   ;;  %1902 = vst.msk [vmem:[%s4093_s1 + $0x101] ss:$16 sm:$0xc] %vm142_vm1, %v319_v50  }
  0x8b   :  { %1262 = vrot.lane.b32.xlu0 %v2379_v35, %s2278_s11  ;;  %1903 = vst.msk [vmem:[%s4093_s1 + $0x101] ss:$16 sm:$0x30] %vm142_vm1, %v319_v50   ;;  %1904 = vst.msk [vmem:[%s4093_s1 + $0x101] ss:$16 sm:$0xc0] %vm142_vm1, %v319_v50   ;;  %1279 = vrot.lane.b32.xlu1 %v2387_v40, %s2278_s11 }
  0x8c   :  { %1897 = vst.msk [vmem:[%s4093_s1 + $0x81] ss:$16 sm:$0x3] %vm142_vm1, %v302_v51   ;;  %1898 = vst.msk [vmem:[%s4093_s1 + $0x81] ss:$16 sm:$0xc] %vm142_vm1, %v302_v51  }
  0x8d   :  { %1899 = vst.msk [vmem:[%s4093_s1 + $0x81] ss:$16 sm:$0x30] %vm142_vm1, %v302_v51   ;;  %1900 = vst.msk [vmem:[%s4093_s1 + $0x81] ss:$16 sm:$0xc0] %vm142_vm1, %v302_v51   ;;  %v336_v52 = vpop.permute.xlu1 %335   ;;  %v353_v53 = vpop.permute.xlu0 %352  }
  0x8e   :  { %1905 = vst.msk [vmem:[%s4093_s1 + $0x181] ss:$16 sm:$0x3] %vm142_vm1, %v336_v52   ;;  %1906 = vst.msk [vmem:[%s4093_s1 + $0x181] ss:$16 sm:$0xc] %vm142_vm1, %v336_v52  }
  0x8f   :  { %1296 = vrot.lane.b32.xlu0 %v2393_v42, %s2278_s11  ;;  %1907 = vst.msk [vmem:[%s4093_s1 + $0x181] ss:$16 sm:$0x30] %vm142_vm1, %v336_v52   ;;  %1908 = vst.msk [vmem:[%s4093_s1 + $0x181] ss:$16 sm:$0xc0] %vm142_vm1, %v336_v52   ;;  %1313 = vrot.lane.b32.xlu1 %v2398_v45, %s2278_s11 }
  0x90   :  { %1909 = vst.msk [vmem:[%s4093_s1 + $0x201] ss:$16 sm:$0x3] %vm142_vm1, %v353_v53   ;;  %1910 = vst.msk [vmem:[%s4093_s1 + $0x201] ss:$16 sm:$0xc] %vm142_vm1, %v353_v53  }
  0x91   :  { %1911 = vst.msk [vmem:[%s4093_s1 + $0x201] ss:$16 sm:$0x30] %vm142_vm1, %v353_v53   ;;  %1912 = vst.msk [vmem:[%s4093_s1 + $0x201] ss:$16 sm:$0xc0] %vm142_vm1, %v353_v53   ;;  %v370_v54 = vpop.permute.xlu1 %369  }
  0x92   :  { %1913 = vst.msk [vmem:[%s4093_s1 + $0x281] ss:$16 sm:$0x3] %vm142_vm1, %v370_v54   ;;  %1914 = vst.msk [vmem:[%s4093_s1 + $0x281] ss:$16 sm:$0xc] %vm142_vm1, %v370_v54  }
  0x93   :  { %1330 = vrot.lane.b32.xlu0 %v2402_v48, %s2278_s11  ;;  %1915 = vst.msk [vmem:[%s4093_s1 + $0x281] ss:$16 sm:$0x30] %vm142_vm1, %v370_v54   ;;  %1916 = vst.msk [vmem:[%s4093_s1 + $0x281] ss:$16 sm:$0xc0] %vm142_vm1, %v370_v54   ;;  %1346 = vrot.lane.b32.xlu1 %v2369_v27, %s2279_s30  ;;  %v1767_v54 = vsel %vm282_vm0, %v1765_v30, %v1763_v29 }
  0x94   :  { %v1799_v50 = vld.sshfl [vmem:[#allocation0 + $0xd0] sm:$0xff pattern:$0x98100000]   ;;  %v240_v53 = vld [vmem:[#allocation0 + $0xa0] sm:$0x3]  }
  0x95   :  { %v387_v55 = vpop.permute.xlu0 %386   ;;  %v403_v56 = vpop.permute.xlu1 %402   ;;  %v230_v51 = vld [vmem:[#allocation0 + $0x90] sm:$0x3]   ;;  %v235_v52 = vld [vmem:[#allocation0 + $0x98] sm:$0x3]  }
  0x96   :  { %1917 = vst.msk [vmem:[%s4093_s1 + $0x301] ss:$16 sm:$0x3] %vm142_vm1, %v387_v55   ;;  %1918 = vst.msk [vmem:[%s4093_s1 + $0x301] ss:$16 sm:$0xc] %vm142_vm1, %v387_v55  }
  0x97   :  { %1919 = vst.msk [vmem:[%s4093_s1 + $0x301] ss:$16 sm:$0x30] %vm142_vm1, %v387_v55   ;;  %1920 = vst.msk [vmem:[%s4093_s1 + $0x301] ss:$16 sm:$0xc0] %vm142_vm1, %v387_v55   ;;  %1363 = vrot.lane.b32.xlu0 %v2376_v32, %s2279_s30  ;;  %1380 = vrot.lane.b32.xlu1 %v2379_v35, %s2279_s30 }
  0x98   :  { %1921 = vst.msk [vmem:[%s4093_s1 + $0x2] ss:$16 sm:$0x3] %vm142_vm1, %v403_v56   ;;  %1922 = vst.msk [vmem:[%s4093_s1 + $0x2] ss:$16 sm:$0xc] %vm142_vm1, %v403_v56  }
  0x99   :  { %1923 = vst.msk [vmem:[%s4093_s1 + $0x2] ss:$16 sm:$0x30] %vm142_vm1, %v403_v56   ;;  %1924 = vst.msk [vmem:[%s4093_s1 + $0x2] ss:$16 sm:$0xc0] %vm142_vm1, %v403_v56   ;;  %v420_v57 = vpop.permute.xlu0 %419   ;;  %v437_v58 = vpop.permute.xlu1 %436  }
  0x9a   :  { %1925 = vst.msk [vmem:[%s4093_s1 + $0x82] ss:$16 sm:$0x3] %vm142_vm1, %v420_v57   ;;  %1926 = vst.msk [vmem:[%s4093_s1 + $0x82] ss:$16 sm:$0xc] %vm142_vm1, %v420_v57  }
  0x9b   :  { %1927 = vst.msk [vmem:[%s4093_s1 + $0x82] ss:$16 sm:$0x30] %vm142_vm1, %v420_v57   ;;  %1928 = vst.msk [vmem:[%s4093_s1 + $0x82] ss:$16 sm:$0xc0] %vm142_vm1, %v420_v57   ;;  %1397 = vrot.lane.b32.xlu0 %v2387_v40, %s2279_s30  ;;  %1414 = vrot.lane.b32.xlu1 %v2393_v42, %s2279_s30 }
  0x9c   :  { %1929 = vst.msk [vmem:[%s4093_s1 + $0x102] ss:$16 sm:$0x3] %vm142_vm1, %v437_v58   ;;  %1930 = vst.msk [vmem:[%s4093_s1 + $0x102] ss:$16 sm:$0xc] %vm142_vm1, %v437_v58  }
  0x9d   :  { %1931 = vst.msk [vmem:[%s4093_s1 + $0x102] ss:$16 sm:$0x30] %vm142_vm1, %v437_v58   ;;  %1932 = vst.msk [vmem:[%s4093_s1 + $0x102] ss:$16 sm:$0xc0] %vm142_vm1, %v437_v58   ;;  %v454_v59 = vpop.permute.xlu0 %453   ;;  %v471_v60 = vpop.permute.xlu1 %470  }
  0x9e   :  { %1933 = vst.msk [vmem:[%s4093_s1 + $0x182] ss:$16 sm:$0x3] %vm142_vm1, %v454_v59   ;;  %1934 = vst.msk [vmem:[%s4093_s1 + $0x182] ss:$16 sm:$0xc] %vm142_vm1, %v454_v59  }
  0x9f   :  { %1935 = vst.msk [vmem:[%s4093_s1 + $0x182] ss:$16 sm:$0x30] %vm142_vm1, %v454_v59   ;;  %1936 = vst.msk [vmem:[%s4093_s1 + $0x182] ss:$16 sm:$0xc0] %vm142_vm1, %v454_v59   ;;  %1431 = vrot.lane.b32.xlu0 %v2398_v45, %s2279_s30  ;;  %1448 = vrot.lane.b32.xlu1 %v2402_v48, %s2279_s30 }
  0xa0   :  { %1937 = vst.msk [vmem:[%s4093_s1 + $0x202] ss:$16 sm:$0x3] %vm142_vm1, %v471_v60   ;;  %1938 = vst.msk [vmem:[%s4093_s1 + $0x202] ss:$16 sm:$0xc] %vm142_vm1, %v471_v60  }
  0xa1   :  { %1939 = vst.msk [vmem:[%s4093_s1 + $0x202] ss:$16 sm:$0x30] %vm142_vm1, %v471_v60   ;;  %1940 = vst.msk [vmem:[%s4093_s1 + $0x202] ss:$16 sm:$0xc0] %vm142_vm1, %v471_v60   ;;  %v488_v61 = vpop.permute.xlu0 %487   ;;  %v505_v62 = vpop.permute.xlu1 %504  }
  0xa2   :  { %1941 = vst.msk [vmem:[%s4093_s1 + $0x282] ss:$16 sm:$0x3] %vm142_vm1, %v488_v61   ;;  %1942 = vst.msk [vmem:[%s4093_s1 + $0x282] ss:$16 sm:$0xc] %vm142_vm1, %v488_v61  }
  0xa3   :  { %1943 = vst.msk [vmem:[%s4093_s1 + $0x282] ss:$16 sm:$0x30] %vm142_vm1, %v488_v61   ;;  %1944 = vst.msk [vmem:[%s4093_s1 + $0x282] ss:$16 sm:$0xc0] %vm142_vm1, %v488_v61   ;;  %1464 = vrot.lane.b32.xlu0 %v2369_v27, %s2280_s27  ;;  %1481 = vrot.lane.b32.xlu1 %v2376_v32, %s2280_s27 }
  0xa4   :  { %1945 = vst.msk [vmem:[%s4093_s1 + $0x302] ss:$16 sm:$0x3] %vm142_vm1, %v505_v62   ;;  %1946 = vst.msk [vmem:[%s4093_s1 + $0x302] ss:$16 sm:$0xc] %vm142_vm1, %v505_v62  }
  0xa5   :  { %1947 = vst.msk [vmem:[%s4093_s1 + $0x302] ss:$16 sm:$0x30] %vm142_vm1, %v505_v62   ;;  %1948 = vst.msk [vmem:[%s4093_s1 + $0x302] ss:$16 sm:$0xc0] %vm142_vm1, %v505_v62   ;;  %v521_v63 = vpop.permute.xlu0 %520   ;;  %v538_v0 = vpop.permute.xlu1 %537  }
  0xa6   :  { %1949 = vst.msk [vmem:[%s4093_s1 + $0x3] ss:$16 sm:$0x3] %vm142_vm1, %v521_v63   ;;  %1950 = vst.msk [vmem:[%s4093_s1 + $0x3] ss:$16 sm:$0xc] %vm142_vm1, %v521_v63  }
  0xa7   :  { %1951 = vst.msk [vmem:[%s4093_s1 + $0x3] ss:$16 sm:$0x30] %vm142_vm1, %v521_v63   ;;  %1952 = vst.msk [vmem:[%s4093_s1 + $0x3] ss:$16 sm:$0xc0] %vm142_vm1, %v521_v63   ;;  %1498 = vrot.lane.b32.xlu0 %v2379_v35, %s2280_s27  ;;  %1515 = vrot.lane.b32.xlu1 %v2387_v40, %s2280_s27 }
  0xa8   :  { %1953 = vst.msk [vmem:[%s4093_s1 + $0x83] ss:$16 sm:$0x3] %vm142_vm1, %v538_v0   ;;  %1954 = vst.msk [vmem:[%s4093_s1 + $0x83] ss:$16 sm:$0xc] %vm142_vm1, %v538_v0  }
  0xa9   :  { %1955 = vst.msk [vmem:[%s4093_s1 + $0x83] ss:$16 sm:$0x30] %vm142_vm1, %v538_v0   ;;  %1956 = vst.msk [vmem:[%s4093_s1 + $0x83] ss:$16 sm:$0xc0] %vm142_vm1, %v538_v0   ;;  %v555_v1 = vpop.permute.xlu0 %554   ;;  %v572_v2 = vpop.permute.xlu1 %571  }
  0xaa   :  { %1957 = vst.msk [vmem:[%s4093_s1 + $0x103] ss:$16 sm:$0x3] %vm142_vm1, %v555_v1   ;;  %1958 = vst.msk [vmem:[%s4093_s1 + $0x103] ss:$16 sm:$0xc] %vm142_vm1, %v555_v1  }
  0xab   :  { %1959 = vst.msk [vmem:[%s4093_s1 + $0x103] ss:$16 sm:$0x30] %vm142_vm1, %v555_v1   ;;  %1960 = vst.msk [vmem:[%s4093_s1 + $0x103] ss:$16 sm:$0xc0] %vm142_vm1, %v555_v1   ;;  %1532 = vrot.lane.b32.xlu0 %v2393_v42, %s2280_s27  ;;  %1549 = vrot.lane.b32.xlu1 %v2398_v45, %s2280_s27  ;;  %v1801_v1 = vsel %vm282_vm0, %v1799_v50, %v1797_v49 }
  0xac   :  { %1961 = vst.msk [vmem:[%s4093_s1 + $0x183] ss:$16 sm:$0x3] %vm142_vm1, %v572_v2   ;;  %1962 = vst.msk [vmem:[%s4093_s1 + $0x183] ss:$16 sm:$0xc] %vm142_vm1, %v572_v2  }
  0xad   :  { %1963 = vst.msk [vmem:[%s4093_s1 + $0x183] ss:$16 sm:$0x30] %vm142_vm1, %v572_v2   ;;  %1964 = vst.msk [vmem:[%s4093_s1 + $0x183] ss:$16 sm:$0xc0] %vm142_vm1, %v572_v2   ;;  %v589_v3 = vpop.permute.xlu0 %588   ;;  %v606_v4 = vpop.permute.xlu1 %605  }
  0xae   :  { %1965 = vst.msk [vmem:[%s4093_s1 + $0x203] ss:$16 sm:$0x3] %vm142_vm1, %v589_v3   ;;  %1966 = vst.msk [vmem:[%s4093_s1 + $0x203] ss:$16 sm:$0xc] %vm142_vm1, %v589_v3  }
  0xaf   :  { %1967 = vst.msk [vmem:[%s4093_s1 + $0x203] ss:$16 sm:$0x30] %vm142_vm1, %v589_v3   ;;  %1968 = vst.msk [vmem:[%s4093_s1 + $0x203] ss:$16 sm:$0xc0] %vm142_vm1, %v589_v3   ;;  %1566 = vrot.lane.b32.xlu0 %v2402_v48, %s2280_s27  ;;  %1582 = vrot.lane.b32.xlu1 %v2369_v27, %s2281_s24 }
  0xb0   :  { %1969 = vst.msk [vmem:[%s4093_s1 + $0x283] ss:$16 sm:$0x3] %vm142_vm1, %v606_v4   ;;  %1970 = vst.msk [vmem:[%s4093_s1 + $0x283] ss:$16 sm:$0xc] %vm142_vm1, %v606_v4  }
  0xb1   :  { %1971 = vst.msk [vmem:[%s4093_s1 + $0x283] ss:$16 sm:$0x30] %vm142_vm1, %v606_v4   ;;  %1972 = vst.msk [vmem:[%s4093_s1 + $0x283] ss:$16 sm:$0xc0] %vm142_vm1, %v606_v4   ;;  %v623_v5 = vpop.permute.xlu0 %622   ;;  %v639_v6 = vpop.permute.xlu1 %638  }
  0xb2   :  { %1973 = vst.msk [vmem:[%s4093_s1 + $0x303] ss:$16 sm:$0x3] %vm142_vm1, %v623_v5   ;;  %1974 = vst.msk [vmem:[%s4093_s1 + $0x303] ss:$16 sm:$0xc] %vm142_vm1, %v623_v5  }
  0xb3   :  { %1975 = vst.msk [vmem:[%s4093_s1 + $0x303] ss:$16 sm:$0x30] %vm142_vm1, %v623_v5   ;;  %1976 = vst.msk [vmem:[%s4093_s1 + $0x303] ss:$16 sm:$0xc0] %vm142_vm1, %v623_v5   ;;  %1599 = vrot.lane.b32.xlu0 %v2376_v32, %s2281_s24  ;;  %1616 = vrot.lane.b32.xlu1 %v2379_v35, %s2281_s24 }
  0xb4   :  { %1977 = vst.msk [vmem:[%s4093_s1 + $0x4] ss:$16 sm:$0x3] %vm142_vm1, %v639_v6   ;;  %1978 = vst.msk [vmem:[%s4093_s1 + $0x4] ss:$16 sm:$0xc] %vm142_vm1, %v639_v6  }
  0xb5   :  { %1979 = vst.msk [vmem:[%s4093_s1 + $0x4] ss:$16 sm:$0x30] %vm142_vm1, %v639_v6   ;;  %1980 = vst.msk [vmem:[%s4093_s1 + $0x4] ss:$16 sm:$0xc0] %vm142_vm1, %v639_v6   ;;  %v656_v7 = vpop.permute.xlu0 %655   ;;  %v673_v8 = vpop.permute.xlu1 %672  }
  0xb6   :  { %1981 = vst.msk [vmem:[%s4093_s1 + $0x84] ss:$16 sm:$0x3] %vm142_vm1, %v656_v7   ;;  %1982 = vst.msk [vmem:[%s4093_s1 + $0x84] ss:$16 sm:$0xc] %vm142_vm1, %v656_v7  }
  0xb7   :  { %1983 = vst.msk [vmem:[%s4093_s1 + $0x84] ss:$16 sm:$0x30] %vm142_vm1, %v656_v7   ;;  %1984 = vst.msk [vmem:[%s4093_s1 + $0x84] ss:$16 sm:$0xc0] %vm142_vm1, %v656_v7   ;;  %1633 = vrot.lane.b32.xlu0 %v2387_v40, %s2281_s24  ;;  %1650 = vrot.lane.b32.xlu1 %v2393_v42, %s2281_s24 }
  0xb8   :  { %1985 = vst.msk [vmem:[%s4093_s1 + $0x104] ss:$16 sm:$0x3] %vm142_vm1, %v673_v8   ;;  %1986 = vst.msk [vmem:[%s4093_s1 + $0x104] ss:$16 sm:$0xc] %vm142_vm1, %v673_v8  }
  0xb9   :  { %1987 = vst.msk [vmem:[%s4093_s1 + $0x104] ss:$16 sm:$0x30] %vm142_vm1, %v673_v8   ;;  %1988 = vst.msk [vmem:[%s4093_s1 + $0x104] ss:$16 sm:$0xc0] %vm142_vm1, %v673_v8   ;;  %v690_v10 = vpop.permute.xlu0 %689   ;;  %v707_v12 = vpop.permute.xlu1 %706  }
  0xba   :  { %1989 = vst.msk [vmem:[%s4093_s1 + $0x184] ss:$16 sm:$0x3] %vm142_vm1, %v690_v10   ;;  %1990 = vst.msk [vmem:[%s4093_s1 + $0x184] ss:$16 sm:$0xc] %vm142_vm1, %v690_v10  }
  0xbb   :  { %1991 = vst.msk [vmem:[%s4093_s1 + $0x184] ss:$16 sm:$0x30] %vm142_vm1, %v690_v10   ;;  %1992 = vst.msk [vmem:[%s4093_s1 + $0x184] ss:$16 sm:$0xc0] %vm142_vm1, %v690_v10   ;;  %1667 = vrot.lane.b32.xlu0 %v2398_v45, %s2281_s24  ;;  %1684 = vrot.lane.b32.xlu1 %v2402_v48, %s2281_s24 }
  0xbc   :  { %1993 = vst.msk [vmem:[%s4093_s1 + $0x204] ss:$16 sm:$0x3] %vm142_vm1, %v707_v12   ;;  %1994 = vst.msk [vmem:[%s4093_s1 + $0x204] ss:$16 sm:$0xc] %vm142_vm1, %v707_v12  }
  0xbd   :  { %1995 = vst.msk [vmem:[%s4093_s1 + $0x204] ss:$16 sm:$0x30] %vm142_vm1, %v707_v12   ;;  %1996 = vst.msk [vmem:[%s4093_s1 + $0x204] ss:$16 sm:$0xc0] %vm142_vm1, %v707_v12   ;;  %v724_v20 = vpop.permute.xlu0 %723   ;;  %v741_v25 = vpop.permute.xlu1 %740  }
  0xbe   :  { %1997 = vst.msk [vmem:[%s4093_s1 + $0x284] ss:$16 sm:$0x3] %vm142_vm1, %v724_v20   ;;  %1998 = vst.msk [vmem:[%s4093_s1 + $0x284] ss:$16 sm:$0xc] %vm142_vm1, %v724_v20  }
  0xbf   :  { %1999 = vst.msk [vmem:[%s4093_s1 + $0x284] ss:$16 sm:$0x30] %vm142_vm1, %v724_v20   ;;  %2000 = vst.msk [vmem:[%s4093_s1 + $0x284] ss:$16 sm:$0xc0] %vm142_vm1, %v724_v20   ;;  %1700 = vrot.lane.b32.xlu0 %v1699_v17, %s2282_s29  ;;  %1717 = vrot.lane.b32.xlu1 %v1716_v21, %s2282_s29 }
  0xc0   :  { %v160_v27 = vld [vmem:[#allocation0 + $0x20] sm:$0x3]   ;;  %2001 = vst.msk [vmem:[%s4093_s1 + $0x304] ss:$16 sm:$0x3] %vm142_vm1, %v741_v25  }
  0xc1   :  { %2002 = vst.msk [vmem:[%s4093_s1 + $0x304] ss:$16 sm:$0xc] %vm142_vm1, %v741_v25   ;;  %2003 = vst.msk [vmem:[%s4093_s1 + $0x304] ss:$16 sm:$0x30] %vm142_vm1, %v741_v25   ;;  %v757_v40 = vpop.permute.xlu0 %756   ;;  %v774_v45 = vpop.permute.xlu1 %773  }
  0xc2   :  { %2004 = vst.msk [vmem:[%s4093_s1 + $0x304] ss:$16 sm:$0xc0] %vm142_vm1, %v741_v25   ;;  %1869 = vst.msk [vmem:[%s4093_s1 + $0x80] ss:$16 sm:$0x3] %vm142_vm1, %v160_v27  }
  0xc3   :  { %v175_v32 = vld [vmem:[#allocation0 + $0x38] sm:$0x3]   ;;  %v1780_v35 = vld.sshfl [vmem:[#allocation0 + $0xa0] sm:$0xff pattern:$0x99999810]   ;;  %1734 = vrot.lane.b32.xlu0 %v1733_v34, %s2282_s29  ;;  %1751 = vrot.lane.b32.xlu1 %v1750_v41, %s2282_s29 }
  0xc4   :  { %1872 = vst.msk [vmem:[%s4093_s1 + $0xe0] ss:$16 sm:$0x3] %vm142_vm1, %v175_v32   ;;  %v200_v42 = vld [vmem:[#allocation0 + $0x60] sm:$0x3]   ;;  %v1784_v59 = vsel %vm282_vm0, %v1782_v36, %v1780_v35 }
  0xc5   :  { %2005 = vst.msk [vmem:[%s4093_s1 + $0x5] ss:$16 sm:$0x3] %vm142_vm1, %v757_v40   ;;  %2006 = vst.msk [vmem:[%s4093_s1 + $0x5] ss:$16 sm:$0xc] %vm142_vm1, %v757_v40   ;;  %v791_v58 = vpop.permute.xlu0 %790   ;;  %v808_v63 = vpop.permute.xlu1 %807  }
  0xc6   :  { %2007 = vst.msk [vmem:[%s4093_s1 + $0x5] ss:$16 sm:$0x30] %vm142_vm1, %v757_v40   ;;  %2008 = vst.msk [vmem:[%s4093_s1 + $0x5] ss:$16 sm:$0xc0] %vm142_vm1, %v757_v40  }
  0xc7   :  { %1877 = vst.msk [vmem:[%s4093_s1 + $0x180] ss:$16 sm:$0x3] %vm142_vm1, %v200_v42   ;;  %v225_v48 = vld [vmem:[#allocation0 + $0x88] sm:$0x3]   ;;  %1768 = vrot.lane.b32.xlu0 %v1767_v54, %s2282_s29  ;;  %1785 = vrot.lane.b32.xlu1 %v1784_v59, %s2282_s29 }
  0xc8   :  { %2009 = vst.msk [vmem:[%s4093_s1 + $0x85] ss:$16 sm:$0x3] %vm142_vm1, %v774_v45   ;;  %2010 = vst.msk [vmem:[%s4093_s1 + $0x85] ss:$16 sm:$0xc] %vm142_vm1, %v774_v45  }
  0xc9   :  { %2011 = vst.msk [vmem:[%s4093_s1 + $0x85] ss:$16 sm:$0x30] %vm142_vm1, %v774_v45   ;;  %2012 = vst.msk [vmem:[%s4093_s1 + $0x85] ss:$16 sm:$0xc0] %vm142_vm1, %v774_v45   ;;  %v825_v2 = vpop.permute.xlu0 %824   ;;  %v842_v3 = vpop.permute.xlu1 %841  }
  0xca   :  { %1882 = vst.msk [vmem:[%s4093_s1 + $0x220] ss:$16 sm:$0x3] %vm142_vm1, %v225_v48   ;;  %1883 = vst.msk [vmem:[%s4093_s1 + $0x240] ss:$16 sm:$0x3] %vm142_vm1, %v230_v51  }
  0xcb   :  { %1884 = vst.msk [vmem:[%s4093_s1 + $0x260] ss:$16 sm:$0x3] %vm142_vm1, %v235_v52   ;;  %1885 = vst.msk [vmem:[%s4093_s1 + $0x280] ss:$16 sm:$0x3] %vm142_vm1, %v240_v53   ;;  %1802 = vrot.lane.b32.xlu0 %v1801_v1, %s2282_s29 }
  0xcc   :  { %v245_v55 = vld [vmem:[#allocation0 + $0xa8] sm:$0x3]   ;;  %v250_v56 = vld [vmem:[#allocation0 + $0xb0] sm:$0x3]   ;;  %v255_v57 = vld [vmem:[#allocation0 + $0xb8] sm:$0x3]  }
  0xcd   :  { %1886 = vst.msk [vmem:[%s4093_s1 + $0x2a0] ss:$16 sm:$0x3] %vm142_vm1, %v245_v55   ;;  %1887 = vst.msk [vmem:[%s4093_s1 + $0x2c0] ss:$16 sm:$0x3] %vm142_vm1, %v250_v56   ;;  %v859_v4 = vpop.permute.xlu0 %858   ;;  %v875_v5 = vpop.permute.xlu1 %874  }
  0xce   :  { %1888 = vst.msk [vmem:[%s4093_s1 + $0x2e0] ss:$16 sm:$0x3] %vm142_vm1, %v255_v57   ;;  %v260_v60 = vld [vmem:[#allocation0 + $0xc0] sm:$0x3]  }
  0xcf   :  { %v265_v61 = vld [vmem:[#allocation0 + $0xc8] sm:$0x3]   ;;  %v270_v62 = vld [vmem:[#allocation0 + $0xd0] sm:$0x3]   ;;  %v275_v0 = vld [vmem:[#allocation0 + $0xd8] sm:$0x3]  }
  0xd0   :  { %2013 = vst.msk [vmem:[%s4093_s1 + $0x105] ss:$16 sm:$0x3] %vm142_vm1, %v791_v58   ;;  %2014 = vst.msk [vmem:[%s4093_s1 + $0x105] ss:$16 sm:$0xc] %vm142_vm1, %v791_v58  }
  0xd1   :  { %2015 = vst.msk [vmem:[%s4093_s1 + $0x105] ss:$16 sm:$0x30] %vm142_vm1, %v791_v58   ;;  %2016 = vst.msk [vmem:[%s4093_s1 + $0x105] ss:$16 sm:$0xc0] %vm142_vm1, %v791_v58   ;;  %v892_v6 = vpop.permute.xlu0 %891   ;;  %v909_v7 = vpop.permute.xlu1 %908  }
  0xd2   :  { %1889 = vst.msk [vmem:[%s4093_s1 + $0x300] ss:$16 sm:$0x3] %vm142_vm1, %v260_v60   ;;  %1890 = vst.msk [vmem:[%s4093_s1 + $0x320] ss:$16 sm:$0x3] %vm142_vm1, %v265_v61  }
  0xd3   :  { %1891 = vst.msk [vmem:[%s4093_s1 + $0x340] ss:$16 sm:$0x3] %vm142_vm1, %v270_v62   ;;  %2017 = vst.msk [vmem:[%s4093_s1 + $0x185] ss:$16 sm:$0x3] %vm142_vm1, %v808_v63  }
  0xd4   :  { %2018 = vst.msk [vmem:[%s4093_s1 + $0x185] ss:$16 sm:$0xc] %vm142_vm1, %v808_v63   ;;  %2019 = vst.msk [vmem:[%s4093_s1 + $0x185] ss:$16 sm:$0x30] %vm142_vm1, %v808_v63  }
  0xd5   :  { %2020 = vst.msk [vmem:[%s4093_s1 + $0x185] ss:$16 sm:$0xc0] %vm142_vm1, %v808_v63   ;;  %1892 = vst.msk [vmem:[%s4093_s1 + $0x360] ss:$16 sm:$0x3] %vm142_vm1, %v275_v0   ;;  %v926_v8 = vpop.permute.xlu0 %925   ;;  %v943_v9 = vpop.permute.xlu1 %942  }
  0xd6   :  { %2021 = vst.msk [vmem:[%s4093_s1 + $0x205] ss:$16 sm:$0x3] %vm142_vm1, %v825_v2   ;;  %2022 = vst.msk [vmem:[%s4093_s1 + $0x205] ss:$16 sm:$0xc] %vm142_vm1, %v825_v2  }
  0xd7   :  { %2023 = vst.msk [vmem:[%s4093_s1 + $0x205] ss:$16 sm:$0x30] %vm142_vm1, %v825_v2   ;;  %2024 = vst.msk [vmem:[%s4093_s1 + $0x205] ss:$16 sm:$0xc0] %vm142_vm1, %v825_v2  }
  0xd8   :  { %2025 = vst.msk [vmem:[%s4093_s1 + $0x285] ss:$16 sm:$0x3] %vm142_vm1, %v842_v3   ;;  %2026 = vst.msk [vmem:[%s4093_s1 + $0x285] ss:$16 sm:$0xc] %vm142_vm1, %v842_v3  }
  0xd9   :  { %2027 = vst.msk [vmem:[%s4093_s1 + $0x285] ss:$16 sm:$0x30] %vm142_vm1, %v842_v3   ;;  %2028 = vst.msk [vmem:[%s4093_s1 + $0x285] ss:$16 sm:$0xc0] %vm142_vm1, %v842_v3   ;;  %v960_v10 = vpop.permute.xlu0 %959   ;;  %v977_v11 = vpop.permute.xlu1 %976  }
  0xda   :  { %2029 = vst.msk [vmem:[%s4093_s1 + $0x305] ss:$16 sm:$0x3] %vm142_vm1, %v859_v4   ;;  %2030 = vst.msk [vmem:[%s4093_s1 + $0x305] ss:$16 sm:$0xc] %vm142_vm1, %v859_v4  }
  0xdb   :  { %2031 = vst.msk [vmem:[%s4093_s1 + $0x305] ss:$16 sm:$0x30] %vm142_vm1, %v859_v4   ;;  %2032 = vst.msk [vmem:[%s4093_s1 + $0x305] ss:$16 sm:$0xc0] %vm142_vm1, %v859_v4  }
  0xdc   :  { %2033 = vst.msk [vmem:[%s4093_s1 + $0x6] ss:$16 sm:$0x3] %vm142_vm1, %v875_v5   ;;  %2034 = vst.msk [vmem:[%s4093_s1 + $0x6] ss:$16 sm:$0xc] %vm142_vm1, %v875_v5  }
  0xdd   :  { %2035 = vst.msk [vmem:[%s4093_s1 + $0x6] ss:$16 sm:$0x30] %vm142_vm1, %v875_v5   ;;  %2036 = vst.msk [vmem:[%s4093_s1 + $0x6] ss:$16 sm:$0xc0] %vm142_vm1, %v875_v5   ;;  %v993_v12 = vpop.permute.xlu0 %992   ;;  %v1010_v13 = vpop.permute.xlu1 %1009  }
  0xde   :  { %2037 = vst.msk [vmem:[%s4093_s1 + $0x86] ss:$16 sm:$0x3] %vm142_vm1, %v892_v6   ;;  %2038 = vst.msk [vmem:[%s4093_s1 + $0x86] ss:$16 sm:$0xc] %vm142_vm1, %v892_v6  }
  0xdf   :  { %2039 = vst.msk [vmem:[%s4093_s1 + $0x86] ss:$16 sm:$0x30] %vm142_vm1, %v892_v6   ;;  %2040 = vst.msk [vmem:[%s4093_s1 + $0x86] ss:$16 sm:$0xc0] %vm142_vm1, %v892_v6  }
  0xe0   :  { %2041 = vst.msk [vmem:[%s4093_s1 + $0x106] ss:$16 sm:$0x3] %vm142_vm1, %v909_v7   ;;  %2042 = vst.msk [vmem:[%s4093_s1 + $0x106] ss:$16 sm:$0xc] %vm142_vm1, %v909_v7  }
  0xe1   :  { %2043 = vst.msk [vmem:[%s4093_s1 + $0x106] ss:$16 sm:$0x30] %vm142_vm1, %v909_v7   ;;  %2044 = vst.msk [vmem:[%s4093_s1 + $0x106] ss:$16 sm:$0xc0] %vm142_vm1, %v909_v7   ;;  %v1027_v14 = vpop.permute.xlu0 %1026   ;;  %v1044_v15 = vpop.permute.xlu1 %1043  }
  0xe2   :  { %2045 = vst.msk [vmem:[%s4093_s1 + $0x186] ss:$16 sm:$0x3] %vm142_vm1, %v926_v8   ;;  %2046 = vst.msk [vmem:[%s4093_s1 + $0x186] ss:$16 sm:$0xc] %vm142_vm1, %v926_v8  }
  0xe3   :  { %2047 = vst.msk [vmem:[%s4093_s1 + $0x186] ss:$16 sm:$0x30] %vm142_vm1, %v926_v8   ;;  %2048 = vst.msk [vmem:[%s4093_s1 + $0x186] ss:$16 sm:$0xc0] %vm142_vm1, %v926_v8  }
  0xe4   :  { %2049 = vst.msk [vmem:[%s4093_s1 + $0x206] ss:$16 sm:$0x3] %vm142_vm1, %v943_v9   ;;  %2050 = vst.msk [vmem:[%s4093_s1 + $0x206] ss:$16 sm:$0xc] %vm142_vm1, %v943_v9  }
  0xe5   :  { %2051 = vst.msk [vmem:[%s4093_s1 + $0x206] ss:$16 sm:$0x30] %vm142_vm1, %v943_v9   ;;  %2052 = vst.msk [vmem:[%s4093_s1 + $0x206] ss:$16 sm:$0xc0] %vm142_vm1, %v943_v9   ;;  %v1061_v16 = vpop.permute.xlu0 %1060   ;;  %v1078_v17 = vpop.permute.xlu1 %1077  }
  0xe6   :  { %2053 = vst.msk [vmem:[%s4093_s1 + $0x286] ss:$16 sm:$0x3] %vm142_vm1, %v960_v10   ;;  %2054 = vst.msk [vmem:[%s4093_s1 + $0x286] ss:$16 sm:$0xc] %vm142_vm1, %v960_v10  }
  0xe7   :  { %2055 = vst.msk [vmem:[%s4093_s1 + $0x286] ss:$16 sm:$0x30] %vm142_vm1, %v960_v10   ;;  %2056 = vst.msk [vmem:[%s4093_s1 + $0x286] ss:$16 sm:$0xc0] %vm142_vm1, %v960_v10  }
  0xe8   :  { %2057 = vst.msk [vmem:[%s4093_s1 + $0x306] ss:$16 sm:$0x3] %vm142_vm1, %v977_v11   ;;  %2058 = vst.msk [vmem:[%s4093_s1 + $0x306] ss:$16 sm:$0xc] %vm142_vm1, %v977_v11  }
  0xe9   :  { %2059 = vst.msk [vmem:[%s4093_s1 + $0x306] ss:$16 sm:$0x30] %vm142_vm1, %v977_v11   ;;  %2060 = vst.msk [vmem:[%s4093_s1 + $0x306] ss:$16 sm:$0xc0] %vm142_vm1, %v977_v11   ;;  %v1095_v18 = vpop.permute.xlu0 %1094   ;;  %v1111_v19 = vpop.permute.xlu1 %1110  }
  0xea   :  { %2061 = vst.msk [vmem:[%s4093_s1 + $0x7] ss:$16 sm:$0x3] %vm142_vm1, %v993_v12   ;;  %2062 = vst.msk [vmem:[%s4093_s1 + $0x7] ss:$16 sm:$0xc] %vm142_vm1, %v993_v12  }
  0xeb   :  { %2063 = vst.msk [vmem:[%s4093_s1 + $0x7] ss:$16 sm:$0x30] %vm142_vm1, %v993_v12   ;;  %2064 = vst.msk [vmem:[%s4093_s1 + $0x7] ss:$16 sm:$0xc0] %vm142_vm1, %v993_v12  }
  0xec   :  { %2065 = vst.msk [vmem:[%s4093_s1 + $0x87] ss:$16 sm:$0x3] %vm142_vm1, %v1010_v13   ;;  %2066 = vst.msk [vmem:[%s4093_s1 + $0x87] ss:$16 sm:$0xc] %vm142_vm1, %v1010_v13  }
  0xed   :  { %2067 = vst.msk [vmem:[%s4093_s1 + $0x87] ss:$16 sm:$0x30] %vm142_vm1, %v1010_v13   ;;  %2068 = vst.msk [vmem:[%s4093_s1 + $0x87] ss:$16 sm:$0xc0] %vm142_vm1, %v1010_v13   ;;  %v1128_v20 = vpop.permute.xlu0 %1127   ;;  %v1145_v21 = vpop.permute.xlu1 %1144  }
  0xee   :  { %2069 = vst.msk [vmem:[%s4093_s1 + $0x107] ss:$16 sm:$0x3] %vm142_vm1, %v1027_v14   ;;  %2070 = vst.msk [vmem:[%s4093_s1 + $0x107] ss:$16 sm:$0xc] %vm142_vm1, %v1027_v14  }
  0xef   :  { %2071 = vst.msk [vmem:[%s4093_s1 + $0x107] ss:$16 sm:$0x30] %vm142_vm1, %v1027_v14   ;;  %2072 = vst.msk [vmem:[%s4093_s1 + $0x107] ss:$16 sm:$0xc0] %vm142_vm1, %v1027_v14  }
  0xf0   :  { %2073 = vst.msk [vmem:[%s4093_s1 + $0x187] ss:$16 sm:$0x3] %vm142_vm1, %v1044_v15   ;;  %2074 = vst.msk [vmem:[%s4093_s1 + $0x187] ss:$16 sm:$0xc] %vm142_vm1, %v1044_v15  }
  0xf1   :  { %2075 = vst.msk [vmem:[%s4093_s1 + $0x187] ss:$16 sm:$0x30] %vm142_vm1, %v1044_v15   ;;  %2076 = vst.msk [vmem:[%s4093_s1 + $0x187] ss:$16 sm:$0xc0] %vm142_vm1, %v1044_v15   ;;  %v1162_v22 = vpop.permute.xlu0 %1161   ;;  %v1179_v23 = vpop.permute.xlu1 %1178  }
  0xf2   :  { %2077 = vst.msk [vmem:[%s4093_s1 + $0x207] ss:$16 sm:$0x3] %vm142_vm1, %v1061_v16   ;;  %2078 = vst.msk [vmem:[%s4093_s1 + $0x207] ss:$16 sm:$0xc] %vm142_vm1, %v1061_v16  }
  0xf3   :  { %2079 = vst.msk [vmem:[%s4093_s1 + $0x207] ss:$16 sm:$0x30] %vm142_vm1, %v1061_v16   ;;  %2080 = vst.msk [vmem:[%s4093_s1 + $0x207] ss:$16 sm:$0xc0] %vm142_vm1, %v1061_v16  }
  0xf4   :  { %2081 = vst.msk [vmem:[%s4093_s1 + $0x287] ss:$16 sm:$0x3] %vm142_vm1, %v1078_v17   ;;  %2082 = vst.msk [vmem:[%s4093_s1 + $0x287] ss:$16 sm:$0xc] %vm142_vm1, %v1078_v17  }
  0xf5   :  { %2083 = vst.msk [vmem:[%s4093_s1 + $0x287] ss:$16 sm:$0x30] %vm142_vm1, %v1078_v17   ;;  %2084 = vst.msk [vmem:[%s4093_s1 + $0x287] ss:$16 sm:$0xc0] %vm142_vm1, %v1078_v17   ;;  %v1196_v24 = vpop.permute.xlu0 %1195   ;;  %v1213_v25 = vpop.permute.xlu1 %1212  }
  0xf6   :  { %2085 = vst.msk [vmem:[%s4093_s1 + $0x307] ss:$16 sm:$0x3] %vm142_vm1, %v1095_v18   ;;  %2086 = vst.msk [vmem:[%s4093_s1 + $0x307] ss:$16 sm:$0xc] %vm142_vm1, %v1095_v18  }
  0xf7   :  { %2087 = vst.msk [vmem:[%s4093_s1 + $0x307] ss:$16 sm:$0x30] %vm142_vm1, %v1095_v18   ;;  %2088 = vst.msk [vmem:[%s4093_s1 + $0x307] ss:$16 sm:$0xc0] %vm142_vm1, %v1095_v18  }
  0xf8   :  { %2089 = vst.msk [vmem:[%s4093_s1 + $0x8] ss:$16 sm:$0x3] %vm142_vm1, %v1111_v19   ;;  %2090 = vst.msk [vmem:[%s4093_s1 + $0x8] ss:$16 sm:$0xc] %vm142_vm1, %v1111_v19  }
  0xf9   :  { %2091 = vst.msk [vmem:[%s4093_s1 + $0x8] ss:$16 sm:$0x30] %vm142_vm1, %v1111_v19   ;;  %2092 = vst.msk [vmem:[%s4093_s1 + $0x8] ss:$16 sm:$0xc0] %vm142_vm1, %v1111_v19   ;;  %v1229_v26 = vpop.permute.xlu0 %1228   ;;  %v1246_v27 = vpop.permute.xlu1 %1245  }
  0xfa   :  { %2093 = vst.msk [vmem:[%s4093_s1 + $0x88] ss:$16 sm:$0x3] %vm142_vm1, %v1128_v20   ;;  %2094 = vst.msk [vmem:[%s4093_s1 + $0x88] ss:$16 sm:$0xc] %vm142_vm1, %v1128_v20  }
  0xfb   :  { %2095 = vst.msk [vmem:[%s4093_s1 + $0x88] ss:$16 sm:$0x30] %vm142_vm1, %v1128_v20   ;;  %2096 = vst.msk [vmem:[%s4093_s1 + $0x88] ss:$16 sm:$0xc0] %vm142_vm1, %v1128_v20  }
  0xfc   :  { %2097 = vst.msk [vmem:[%s4093_s1 + $0x108] ss:$16 sm:$0x3] %vm142_vm1, %v1145_v21   ;;  %2098 = vst.msk [vmem:[%s4093_s1 + $0x108] ss:$16 sm:$0xc] %vm142_vm1, %v1145_v21  }
  0xfd   :  { %2099 = vst.msk [vmem:[%s4093_s1 + $0x108] ss:$16 sm:$0x30] %vm142_vm1, %v1145_v21   ;;  %2100 = vst.msk [vmem:[%s4093_s1 + $0x108] ss:$16 sm:$0xc0] %vm142_vm1, %v1145_v21   ;;  %v1263_v28 = vpop.permute.xlu0 %1262   ;;  %v1280_v29 = vpop.permute.xlu1 %1279  }
  0xfe   :  { %2101 = vst.msk [vmem:[%s4093_s1 + $0x188] ss:$16 sm:$0x3] %vm142_vm1, %v1162_v22   ;;  %2102 = vst.msk [vmem:[%s4093_s1 + $0x188] ss:$16 sm:$0xc] %vm142_vm1, %v1162_v22  }
  0xff   :  { %2103 = vst.msk [vmem:[%s4093_s1 + $0x188] ss:$16 sm:$0x30] %vm142_vm1, %v1162_v22   ;;  %2104 = vst.msk [vmem:[%s4093_s1 + $0x188] ss:$16 sm:$0xc0] %vm142_vm1, %v1162_v22  }
 0x100   :  { %2105 = vst.msk [vmem:[%s4093_s1 + $0x208] ss:$16 sm:$0x3] %vm142_vm1, %v1179_v23   ;;  %2106 = vst.msk [vmem:[%s4093_s1 + $0x208] ss:$16 sm:$0xc] %vm142_vm1, %v1179_v23  }
 0x101   :  { %2107 = vst.msk [vmem:[%s4093_s1 + $0x208] ss:$16 sm:$0x30] %vm142_vm1, %v1179_v23   ;;  %2108 = vst.msk [vmem:[%s4093_s1 + $0x208] ss:$16 sm:$0xc0] %vm142_vm1, %v1179_v23   ;;  %v1297_v30 = vpop.permute.xlu0 %1296   ;;  %v1314_v31 = vpop.permute.xlu1 %1313  }
 0x102   :  { %2109 = vst.msk [vmem:[%s4093_s1 + $0x288] ss:$16 sm:$0x3] %vm142_vm1, %v1196_v24   ;;  %2110 = vst.msk [vmem:[%s4093_s1 + $0x288] ss:$16 sm:$0xc] %vm142_vm1, %v1196_v24  }
 0x103   :  { %2111 = vst.msk [vmem:[%s4093_s1 + $0x288] ss:$16 sm:$0x30] %vm142_vm1, %v1196_v24   ;;  %2112 = vst.msk [vmem:[%s4093_s1 + $0x288] ss:$16 sm:$0xc0] %vm142_vm1, %v1196_v24  }
 0x104   :  { %2113 = vst.msk [vmem:[%s4093_s1 + $0x308] ss:$16 sm:$0x3] %vm142_vm1, %v1213_v25   ;;  %2114 = vst.msk [vmem:[%s4093_s1 + $0x308] ss:$16 sm:$0xc] %vm142_vm1, %v1213_v25  }
 0x105   :  { %2115 = vst.msk [vmem:[%s4093_s1 + $0x308] ss:$16 sm:$0x30] %vm142_vm1, %v1213_v25   ;;  %2116 = vst.msk [vmem:[%s4093_s1 + $0x308] ss:$16 sm:$0xc0] %vm142_vm1, %v1213_v25   ;;  %v1331_v32 = vpop.permute.xlu0 %1330   ;;  %v1347_v33 = vpop.permute.xlu1 %1346  }
 0x106   :  { %2117 = vst.msk [vmem:[%s4093_s1 + $0x9] ss:$16 sm:$0x3] %vm142_vm1, %v1229_v26   ;;  %2118 = vst.msk [vmem:[%s4093_s1 + $0x9] ss:$16 sm:$0xc] %vm142_vm1, %v1229_v26  }
 0x107   :  { %2119 = vst.msk [vmem:[%s4093_s1 + $0x9] ss:$16 sm:$0x30] %vm142_vm1, %v1229_v26   ;;  %2120 = vst.msk [vmem:[%s4093_s1 + $0x9] ss:$16 sm:$0xc0] %vm142_vm1, %v1229_v26  }
 0x108   :  { %2121 = vst.msk [vmem:[%s4093_s1 + $0x89] ss:$16 sm:$0x3] %vm142_vm1, %v1246_v27   ;;  %2122 = vst.msk [vmem:[%s4093_s1 + $0x89] ss:$16 sm:$0xc] %vm142_vm1, %v1246_v27  }
 0x109   :  { %2123 = vst.msk [vmem:[%s4093_s1 + $0x89] ss:$16 sm:$0x30] %vm142_vm1, %v1246_v27   ;;  %2124 = vst.msk [vmem:[%s4093_s1 + $0x89] ss:$16 sm:$0xc0] %vm142_vm1, %v1246_v27   ;;  %v1364_v34 = vpop.permute.xlu0 %1363   ;;  %v1381_v35 = vpop.permute.xlu1 %1380  }
 0x10a   :  { %2125 = vst.msk [vmem:[%s4093_s1 + $0x109] ss:$16 sm:$0x3] %vm142_vm1, %v1263_v28   ;;  %2126 = vst.msk [vmem:[%s4093_s1 + $0x109] ss:$16 sm:$0xc] %vm142_vm1, %v1263_v28  }
 0x10b   :  { %2127 = vst.msk [vmem:[%s4093_s1 + $0x109] ss:$16 sm:$0x30] %vm142_vm1, %v1263_v28   ;;  %2128 = vst.msk [vmem:[%s4093_s1 + $0x109] ss:$16 sm:$0xc0] %vm142_vm1, %v1263_v28  }
 0x10c   :  { %2129 = vst.msk [vmem:[%s4093_s1 + $0x189] ss:$16 sm:$0x3] %vm142_vm1, %v1280_v29   ;;  %2130 = vst.msk [vmem:[%s4093_s1 + $0x189] ss:$16 sm:$0xc] %vm142_vm1, %v1280_v29  }
 0x10d   :  { %2131 = vst.msk [vmem:[%s4093_s1 + $0x189] ss:$16 sm:$0x30] %vm142_vm1, %v1280_v29   ;;  %2132 = vst.msk [vmem:[%s4093_s1 + $0x189] ss:$16 sm:$0xc0] %vm142_vm1, %v1280_v29   ;;  %v1398_v36 = vpop.permute.xlu0 %1397   ;;  %v1415_v37 = vpop.permute.xlu1 %1414  }
 0x10e   :  { %2133 = vst.msk [vmem:[%s4093_s1 + $0x209] ss:$16 sm:$0x3] %vm142_vm1, %v1297_v30   ;;  %2134 = vst.msk [vmem:[%s4093_s1 + $0x209] ss:$16 sm:$0xc] %vm142_vm1, %v1297_v30  }
 0x10f   :  { %2135 = vst.msk [vmem:[%s4093_s1 + $0x209] ss:$16 sm:$0x30] %vm142_vm1, %v1297_v30   ;;  %2136 = vst.msk [vmem:[%s4093_s1 + $0x209] ss:$16 sm:$0xc0] %vm142_vm1, %v1297_v30  }
 0x110   :  { %2137 = vst.msk [vmem:[%s4093_s1 + $0x289] ss:$16 sm:$0x3] %vm142_vm1, %v1314_v31   ;;  %2138 = vst.msk [vmem:[%s4093_s1 + $0x289] ss:$16 sm:$0xc] %vm142_vm1, %v1314_v31  }
 0x111   :  { %2139 = vst.msk [vmem:[%s4093_s1 + $0x289] ss:$16 sm:$0x30] %vm142_vm1, %v1314_v31   ;;  %2140 = vst.msk [vmem:[%s4093_s1 + $0x289] ss:$16 sm:$0xc0] %vm142_vm1, %v1314_v31   ;;  %v1432_v38 = vpop.permute.xlu0 %1431   ;;  %v1449_v39 = vpop.permute.xlu1 %1448  }
 0x112   :  { %2141 = vst.msk [vmem:[%s4093_s1 + $0x309] ss:$16 sm:$0x3] %vm142_vm1, %v1331_v32   ;;  %2142 = vst.msk [vmem:[%s4093_s1 + $0x309] ss:$16 sm:$0xc] %vm142_vm1, %v1331_v32  }
 0x113   :  { %2143 = vst.msk [vmem:[%s4093_s1 + $0x309] ss:$16 sm:$0x30] %vm142_vm1, %v1331_v32   ;;  %2144 = vst.msk [vmem:[%s4093_s1 + $0x309] ss:$16 sm:$0xc0] %vm142_vm1, %v1331_v32  }
 0x114   :  { %2145 = vst.msk [vmem:[%s4093_s1 + $0xa] ss:$16 sm:$0x3] %vm142_vm1, %v1347_v33   ;;  %2146 = vst.msk [vmem:[%s4093_s1 + $0xa] ss:$16 sm:$0xc] %vm142_vm1, %v1347_v33  }
 0x115   :  { %2147 = vst.msk [vmem:[%s4093_s1 + $0xa] ss:$16 sm:$0x30] %vm142_vm1, %v1347_v33   ;;  %2148 = vst.msk [vmem:[%s4093_s1 + $0xa] ss:$16 sm:$0xc0] %vm142_vm1, %v1347_v33   ;;  %v1465_v40 = vpop.permute.xlu0 %1464   ;;  %v1482_v41 = vpop.permute.xlu1 %1481  }
 0x116   :  { %2149 = vst.msk [vmem:[%s4093_s1 + $0x8a] ss:$16 sm:$0x3] %vm142_vm1, %v1364_v34   ;;  %2150 = vst.msk [vmem:[%s4093_s1 + $0x8a] ss:$16 sm:$0xc] %vm142_vm1, %v1364_v34  }
 0x117   :  { %2151 = vst.msk [vmem:[%s4093_s1 + $0x8a] ss:$16 sm:$0x30] %vm142_vm1, %v1364_v34   ;;  %2152 = vst.msk [vmem:[%s4093_s1 + $0x8a] ss:$16 sm:$0xc0] %vm142_vm1, %v1364_v34  }
 0x118   :  { %2153 = vst.msk [vmem:[%s4093_s1 + $0x10a] ss:$16 sm:$0x3] %vm142_vm1, %v1381_v35   ;;  %2154 = vst.msk [vmem:[%s4093_s1 + $0x10a] ss:$16 sm:$0xc] %vm142_vm1, %v1381_v35  }
 0x119   :  { %2155 = vst.msk [vmem:[%s4093_s1 + $0x10a] ss:$16 sm:$0x30] %vm142_vm1, %v1381_v35   ;;  %2156 = vst.msk [vmem:[%s4093_s1 + $0x10a] ss:$16 sm:$0xc0] %vm142_vm1, %v1381_v35   ;;  %v1499_v42 = vpop.permute.xlu0 %1498   ;;  %v1516_v43 = vpop.permute.xlu1 %1515  }
 0x11a   :  { %2157 = vst.msk [vmem:[%s4093_s1 + $0x18a] ss:$16 sm:$0x3] %vm142_vm1, %v1398_v36   ;;  %2158 = vst.msk [vmem:[%s4093_s1 + $0x18a] ss:$16 sm:$0xc] %vm142_vm1, %v1398_v36  }
 0x11b   :  { %2159 = vst.msk [vmem:[%s4093_s1 + $0x18a] ss:$16 sm:$0x30] %vm142_vm1, %v1398_v36   ;;  %2160 = vst.msk [vmem:[%s4093_s1 + $0x18a] ss:$16 sm:$0xc0] %vm142_vm1, %v1398_v36  }
 0x11c   :  { %2161 = vst.msk [vmem:[%s4093_s1 + $0x20a] ss:$16 sm:$0x3] %vm142_vm1, %v1415_v37   ;;  %2162 = vst.msk [vmem:[%s4093_s1 + $0x20a] ss:$16 sm:$0xc] %vm142_vm1, %v1415_v37  }
 0x11d   :  { %2163 = vst.msk [vmem:[%s4093_s1 + $0x20a] ss:$16 sm:$0x30] %vm142_vm1, %v1415_v37   ;;  %2164 = vst.msk [vmem:[%s4093_s1 + $0x20a] ss:$16 sm:$0xc0] %vm142_vm1, %v1415_v37   ;;  %v1533_v44 = vpop.permute.xlu0 %1532   ;;  %v1550_v45 = vpop.permute.xlu1 %1549  }
 0x11e   :  { %2165 = vst.msk [vmem:[%s4093_s1 + $0x28a] ss:$16 sm:$0x3] %vm142_vm1, %v1432_v38   ;;  %2166 = vst.msk [vmem:[%s4093_s1 + $0x28a] ss:$16 sm:$0xc] %vm142_vm1, %v1432_v38  }
 0x11f   :  { %2167 = vst.msk [vmem:[%s4093_s1 + $0x28a] ss:$16 sm:$0x30] %vm142_vm1, %v1432_v38   ;;  %2168 = vst.msk [vmem:[%s4093_s1 + $0x28a] ss:$16 sm:$0xc0] %vm142_vm1, %v1432_v38  }
 0x120   :  { %2169 = vst.msk [vmem:[%s4093_s1 + $0x30a] ss:$16 sm:$0x3] %vm142_vm1, %v1449_v39   ;;  %2170 = vst.msk [vmem:[%s4093_s1 + $0x30a] ss:$16 sm:$0xc] %vm142_vm1, %v1449_v39  }
 0x121   :  { %2171 = vst.msk [vmem:[%s4093_s1 + $0x30a] ss:$16 sm:$0x30] %vm142_vm1, %v1449_v39   ;;  %2172 = vst.msk [vmem:[%s4093_s1 + $0x30a] ss:$16 sm:$0xc0] %vm142_vm1, %v1449_v39   ;;  %v1567_v46 = vpop.permute.xlu0 %1566   ;;  %v1583_v47 = vpop.permute.xlu1 %1582  }
 0x122   :  { %2173 = vst.msk [vmem:[%s4093_s1 + $0xb] ss:$16 sm:$0x3] %vm142_vm1, %v1465_v40   ;;  %2174 = vst.msk [vmem:[%s4093_s1 + $0xb] ss:$16 sm:$0xc] %vm142_vm1, %v1465_v40  }
 0x123   :  { %2175 = vst.msk [vmem:[%s4093_s1 + $0xb] ss:$16 sm:$0x30] %vm142_vm1, %v1465_v40   ;;  %2176 = vst.msk [vmem:[%s4093_s1 + $0xb] ss:$16 sm:$0xc0] %vm142_vm1, %v1465_v40  }
 0x124   :  { %2177 = vst.msk [vmem:[%s4093_s1 + $0x8b] ss:$16 sm:$0x3] %vm142_vm1, %v1482_v41   ;;  %2178 = vst.msk [vmem:[%s4093_s1 + $0x8b] ss:$16 sm:$0xc] %vm142_vm1, %v1482_v41  }
 0x125   :  { %2179 = vst.msk [vmem:[%s4093_s1 + $0x8b] ss:$16 sm:$0x30] %vm142_vm1, %v1482_v41   ;;  %2180 = vst.msk [vmem:[%s4093_s1 + $0x8b] ss:$16 sm:$0xc0] %vm142_vm1, %v1482_v41   ;;  %v1600_v48 = vpop.permute.xlu0 %1599   ;;  %v1617_v49 = vpop.permute.xlu1 %1616  }
 0x126   :  { %2181 = vst.msk [vmem:[%s4093_s1 + $0x10b] ss:$16 sm:$0x3] %vm142_vm1, %v1499_v42   ;;  %2182 = vst.msk [vmem:[%s4093_s1 + $0x10b] ss:$16 sm:$0xc] %vm142_vm1, %v1499_v42  }
 0x127   :  { %2183 = vst.msk [vmem:[%s4093_s1 + $0x10b] ss:$16 sm:$0x30] %vm142_vm1, %v1499_v42   ;;  %2184 = vst.msk [vmem:[%s4093_s1 + $0x10b] ss:$16 sm:$0xc0] %vm142_vm1, %v1499_v42  }
 0x128   :  { %2185 = vst.msk [vmem:[%s4093_s1 + $0x18b] ss:$16 sm:$0x3] %vm142_vm1, %v1516_v43   ;;  %2186 = vst.msk [vmem:[%s4093_s1 + $0x18b] ss:$16 sm:$0xc] %vm142_vm1, %v1516_v43  }
 0x129   :  { %2187 = vst.msk [vmem:[%s4093_s1 + $0x18b] ss:$16 sm:$0x30] %vm142_vm1, %v1516_v43   ;;  %2188 = vst.msk [vmem:[%s4093_s1 + $0x18b] ss:$16 sm:$0xc0] %vm142_vm1, %v1516_v43   ;;  %v1634_v50 = vpop.permute.xlu0 %1633   ;;  %v1651_v51 = vpop.permute.xlu1 %1650  }
 0x12a   :  { %2189 = vst.msk [vmem:[%s4093_s1 + $0x20b] ss:$16 sm:$0x3] %vm142_vm1, %v1533_v44   ;;  %2190 = vst.msk [vmem:[%s4093_s1 + $0x20b] ss:$16 sm:$0xc] %vm142_vm1, %v1533_v44  }
 0x12b   :  { %2191 = vst.msk [vmem:[%s4093_s1 + $0x20b] ss:$16 sm:$0x30] %vm142_vm1, %v1533_v44   ;;  %2192 = vst.msk [vmem:[%s4093_s1 + $0x20b] ss:$16 sm:$0xc0] %vm142_vm1, %v1533_v44  }
 0x12c   :  { %2193 = vst.msk [vmem:[%s4093_s1 + $0x28b] ss:$16 sm:$0x3] %vm142_vm1, %v1550_v45   ;;  %2194 = vst.msk [vmem:[%s4093_s1 + $0x28b] ss:$16 sm:$0xc] %vm142_vm1, %v1550_v45  }
 0x12d   :  { %2195 = vst.msk [vmem:[%s4093_s1 + $0x28b] ss:$16 sm:$0x30] %vm142_vm1, %v1550_v45   ;;  %2196 = vst.msk [vmem:[%s4093_s1 + $0x28b] ss:$16 sm:$0xc0] %vm142_vm1, %v1550_v45   ;;  %v1668_v52 = vpop.permute.xlu0 %1667   ;;  %v1685_v53 = vpop.permute.xlu1 %1684  }
 0x12e   :  { %2197 = vst.msk [vmem:[%s4093_s1 + $0x30b] ss:$16 sm:$0x3] %vm142_vm1, %v1567_v46   ;;  %2198 = vst.msk [vmem:[%s4093_s1 + $0x30b] ss:$16 sm:$0xc] %vm142_vm1, %v1567_v46  }
 0x12f   :  { %2199 = vst.msk [vmem:[%s4093_s1 + $0x30b] ss:$16 sm:$0x30] %vm142_vm1, %v1567_v46   ;;  %2200 = vst.msk [vmem:[%s4093_s1 + $0x30b] ss:$16 sm:$0xc0] %vm142_vm1, %v1567_v46  }
 0x130   :  { %2201 = vst.msk [vmem:[%s4093_s1 + $0xc] ss:$16 sm:$0x3] %vm142_vm1, %v1583_v47   ;;  %2202 = vst.msk [vmem:[%s4093_s1 + $0xc] ss:$16 sm:$0xc] %vm142_vm1, %v1583_v47  }
 0x131   :  { %2203 = vst.msk [vmem:[%s4093_s1 + $0xc] ss:$16 sm:$0x30] %vm142_vm1, %v1583_v47   ;;  %2204 = vst.msk [vmem:[%s4093_s1 + $0xc] ss:$16 sm:$0xc0] %vm142_vm1, %v1583_v47   ;;  %v1701_v54 = vpop.permute.xlu0 %1700   ;;  %v1718_v55 = vpop.permute.xlu1 %1717  }
 0x132   :  { %2205 = vst.msk [vmem:[%s4093_s1 + $0x8c] ss:$16 sm:$0x3] %vm142_vm1, %v1600_v48   ;;  %2206 = vst.msk [vmem:[%s4093_s1 + $0x8c] ss:$16 sm:$0xc] %vm142_vm1, %v1600_v48  }
 0x133   :  { %2207 = vst.msk [vmem:[%s4093_s1 + $0x8c] ss:$16 sm:$0x30] %vm142_vm1, %v1600_v48   ;;  %2208 = vst.msk [vmem:[%s4093_s1 + $0x8c] ss:$16 sm:$0xc0] %vm142_vm1, %v1600_v48  }
 0x134   :  { %2209 = vst.msk [vmem:[%s4093_s1 + $0x10c] ss:$16 sm:$0x3] %vm142_vm1, %v1617_v49   ;;  %2210 = vst.msk [vmem:[%s4093_s1 + $0x10c] ss:$16 sm:$0xc] %vm142_vm1, %v1617_v49  }
 0x135   :  { %2211 = vst.msk [vmem:[%s4093_s1 + $0x10c] ss:$16 sm:$0x30] %vm142_vm1, %v1617_v49   ;;  %2212 = vst.msk [vmem:[%s4093_s1 + $0x10c] ss:$16 sm:$0xc0] %vm142_vm1, %v1617_v49   ;;  %v1735_v56 = vpop.permute.xlu0 %1734   ;;  %v1752_v57 = vpop.permute.xlu1 %1751  }
 0x136   :  { %2213 = vst.msk [vmem:[%s4093_s1 + $0x18c] ss:$16 sm:$0x3] %vm142_vm1, %v1634_v50   ;;  %2214 = vst.msk [vmem:[%s4093_s1 + $0x18c] ss:$16 sm:$0xc] %vm142_vm1, %v1634_v50  }
 0x137   :  { %2215 = vst.msk [vmem:[%s4093_s1 + $0x18c] ss:$16 sm:$0x30] %vm142_vm1, %v1634_v50   ;;  %2216 = vst.msk [vmem:[%s4093_s1 + $0x18c] ss:$16 sm:$0xc0] %vm142_vm1, %v1634_v50  }
 0x138   :  { %2217 = vst.msk [vmem:[%s4093_s1 + $0x20c] ss:$16 sm:$0x3] %vm142_vm1, %v1651_v51   ;;  %2218 = vst.msk [vmem:[%s4093_s1 + $0x20c] ss:$16 sm:$0xc] %vm142_vm1, %v1651_v51  }
 0x139   :  { %2219 = vst.msk [vmem:[%s4093_s1 + $0x20c] ss:$16 sm:$0x30] %vm142_vm1, %v1651_v51   ;;  %2220 = vst.msk [vmem:[%s4093_s1 + $0x20c] ss:$16 sm:$0xc0] %vm142_vm1, %v1651_v51   ;;  %v1769_v58 = vpop.permute.xlu0 %1768   ;;  %v1786_v59 = vpop.permute.xlu1 %1785  }
 0x13a   :  { %2221 = vst.msk [vmem:[%s4093_s1 + $0x28c] ss:$16 sm:$0x3] %vm142_vm1, %v1668_v52   ;;  %2222 = vst.msk [vmem:[%s4093_s1 + $0x28c] ss:$16 sm:$0xc] %vm142_vm1, %v1668_v52  }
 0x13b   :  { %2223 = vst.msk [vmem:[%s4093_s1 + $0x28c] ss:$16 sm:$0x30] %vm142_vm1, %v1668_v52   ;;  %2224 = vst.msk [vmem:[%s4093_s1 + $0x28c] ss:$16 sm:$0xc0] %vm142_vm1, %v1668_v52  }
 0x13c   :  { %2225 = vst.msk [vmem:[%s4093_s1 + $0x30c] ss:$16 sm:$0x3] %vm142_vm1, %v1685_v53   ;;  %2226 = vst.msk [vmem:[%s4093_s1 + $0x30c] ss:$16 sm:$0xc] %vm142_vm1, %v1685_v53  }
 0x13d   :  { %2227 = vst.msk [vmem:[%s4093_s1 + $0x30c] ss:$16 sm:$0x30] %vm142_vm1, %v1685_v53   ;;  %2228 = vst.msk [vmem:[%s4093_s1 + $0x30c] ss:$16 sm:$0xc0] %vm142_vm1, %v1685_v53   ;;  %v1803_v60 = vpop.permute.xlu0 %1802  }
 0x13e   :  { %2229 = vst.msk [vmem:[%s4093_s1 + $0xd] ss:$16 sm:$0x3] %vm142_vm1, %v1701_v54   ;;  %2230 = vst.msk [vmem:[%s4093_s1 + $0xd] ss:$16 sm:$0xc] %vm142_vm1, %v1701_v54  }
 0x13f   :  { %2231 = vst.msk [vmem:[%s4093_s1 + $0xd] ss:$16 sm:$0x30] %vm142_vm1, %v1701_v54   ;;  %2232 = vst.msk [vmem:[%s4093_s1 + $0xd] ss:$16 sm:$0xc0] %vm142_vm1, %v1701_v54  }
 0x140   :  { %2233 = vst.msk [vmem:[%s4093_s1 + $0x8d] ss:$16 sm:$0x3] %vm142_vm1, %v1718_v55   ;;  %2234 = vst.msk [vmem:[%s4093_s1 + $0x8d] ss:$16 sm:$0xc] %vm142_vm1, %v1718_v55  }
 0x141   :  { %2235 = vst.msk [vmem:[%s4093_s1 + $0x8d] ss:$16 sm:$0x30] %vm142_vm1, %v1718_v55   ;;  %2236 = vst.msk [vmem:[%s4093_s1 + $0x8d] ss:$16 sm:$0xc0] %vm142_vm1, %v1718_v55  }
 0x142   :  { %2237 = vst.msk [vmem:[%s4093_s1 + $0x10d] ss:$16 sm:$0x3] %vm142_vm1, %v1735_v56   ;;  %2238 = vst.msk [vmem:[%s4093_s1 + $0x10d] ss:$16 sm:$0xc] %vm142_vm1, %v1735_v56  }
 0x143   :  { %2239 = vst.msk [vmem:[%s4093_s1 + $0x10d] ss:$16 sm:$0x30] %vm142_vm1, %v1735_v56   ;;  %2240 = vst.msk [vmem:[%s4093_s1 + $0x10d] ss:$16 sm:$0xc0] %vm142_vm1, %v1735_v56  }
 0x144   :  { %2241 = vst.msk [vmem:[%s4093_s1 + $0x18d] ss:$16 sm:$0x3] %vm142_vm1, %v1752_v57   ;;  %2242 = vst.msk [vmem:[%s4093_s1 + $0x18d] ss:$16 sm:$0xc] %vm142_vm1, %v1752_v57  }
 0x145   :  { %2243 = vst.msk [vmem:[%s4093_s1 + $0x18d] ss:$16 sm:$0x30] %vm142_vm1, %v1752_v57   ;;  %2244 = vst.msk [vmem:[%s4093_s1 + $0x18d] ss:$16 sm:$0xc0] %vm142_vm1, %v1752_v57  }
 0x146   :  { %2245 = vst.msk [vmem:[%s4093_s1 + $0x20d] ss:$16 sm:$0x3] %vm142_vm1, %v1769_v58   ;;  %2246 = vst.msk [vmem:[%s4093_s1 + $0x20d] ss:$16 sm:$0xc] %vm142_vm1, %v1769_v58  }
 0x147   :  { %2247 = vst.msk [vmem:[%s4093_s1 + $0x20d] ss:$16 sm:$0x30] %vm142_vm1, %v1769_v58   ;;  %2248 = vst.msk [vmem:[%s4093_s1 + $0x20d] ss:$16 sm:$0xc0] %vm142_vm1, %v1769_v58  }
 0x148   :  { %2249 = vst.msk [vmem:[%s4093_s1 + $0x28d] ss:$16 sm:$0x3] %vm142_vm1, %v1786_v59   ;;  %2250 = vst.msk [vmem:[%s4093_s1 + $0x28d] ss:$16 sm:$0xc] %vm142_vm1, %v1786_v59  }
 0x149   :  { %2251 = vst.msk [vmem:[%s4093_s1 + $0x28d] ss:$16 sm:$0x30] %vm142_vm1, %v1786_v59   ;;  %2252 = vst.msk [vmem:[%s4093_s1 + $0x28d] ss:$16 sm:$0xc0] %vm142_vm1, %v1786_v59  }
 0x14a   :  { %2253 = vst.msk [vmem:[%s4093_s1 + $0x30d] ss:$16 sm:$0x3] %vm142_vm1, %v1803_v60   ;;  %2254 = vst.msk [vmem:[%s4093_s1 + $0x30d] ss:$16 sm:$0xc] %vm142_vm1, %v1803_v60  }
 0x14b   :  { %2255 = vst.msk [vmem:[%s4093_s1 + $0x30d] ss:$16 sm:$0x30] %vm142_vm1, %v1803_v60   ;;  %2256 = vst.msk [vmem:[%s4093_s1 + $0x30d] ss:$16 sm:$0xc0] %vm142_vm1, %v1803_v60  }

// kernel: cnn_forward.1
= control target key start
LH: loop header
LB: loop body
LE: loop exit
PB: predicated region body
PF: predicated region fallthrough
CT: control target
= control target key end

     0   :  { %10 = vsyncpa [#allocation5], 0  ;;  %s2594_s9 = smov 0   ;;  %s3458_s0 = inlined_call_operand.vmem [shape: f32[2,4,256], index: 0, kind: input, shape index: {}]   ;;  %s3459_s1 = inlined_call_operand.vmem [shape: f32[4,64,16], index: 1, kind: input, shape index: {}]   ;;  %s3460_s2 = inlined_call_operand.vmem [shape: f32[64,1], index: 2, kind: input, shape index: {}]   ;;  %s3461_s3 = inlined_call_operand.vmem [shape: bf16[10,64,256], index: 3, kind: input, shape index: {}]   ;;  %s3462_s4 = inlined_call_operand.vmem [shape: f32[1,128], index: 4, kind: input, shape index: {}]   ;;  %s3463_s5 = inlined_call_operand.hbm [shape: f32[1,2,128], index: 5, kind: output, shape index: {}]  }
   0x1   :  { %v2557_v0 = vld [vmem:[%s3460_s2] sm:$0xff]  ;;  %v2562_v1 = vld [vmem:[%s3460_s2 + $0x8] sm:$0xff]  ;;  %v2567_v2 = vld [vmem:[%s3460_s2 + $0x10] sm:$0xff] }
   0x2   :  { %v2572_v3 = vld [vmem:[%s3460_s2 + $0x18] sm:$0xff]  ;;  %v2577_v4 = vld [vmem:[%s3460_s2 + $0x20] sm:$0xff]  ;;  %v2582_v5 = vld [vmem:[%s3460_s2 + $0x28] sm:$0xff] }
   0x3   :  { %v2587_v6 = vld [vmem:[%s3460_s2 + $0x30] sm:$0xff]  ;;  %v2592_v7 = vld [vmem:[%s3460_s2 + $0x38] sm:$0xff] }
   0x4 LB: > { %s2445_s10 = sshll.u32 %s2516_s9, 3  ;;  %s2518_s14 = smov 127   ;;  %v2520_v10 = vmov 0.0   ;;  %v2522_v11 = vmov 0   ;;  %vm48_vm0 = vcmask 1039360   ;;  %vm76_vm1 = vcmask 924672   ;;  %s2516_s9 = sphi %s2594_s9, %s34_s9  }
   0x5   : > { %s37_s13 = scalar_lea.vmem %s3458_s0, %s2445_s10  ;;  %s2519_s15 = smov 113   ;;  %189 = vmatprep.mubr.f32.mxu0 %v2520_v10  ;;  %335 = vmatprep.mubr.f32.mxu1 %v2520_v10  ;;  %vm64_vm2 = vcmask 932864   ;;  %v92_v31 = vld [vmem:[%s3459_s1] sm:$0xff]  ;;  %vm100_vm3 = vcmask 130048   ;;  %v93_v34 = vld [vmem:[%s3459_s1 + $0x8] sm:$0xff]  ;;  %v94_v36 = vld [vmem:[%s3459_s1 + $0x10] sm:$0xff] }
   0x6   : > { %v38_v8 = vld [vmem:[%s37_s13] sm:$0xff]  ;;  %s2521_s2 = smov 114   ;;  %2469 = vset.pattern.permute.xlu0 %v2522_v11  ;;  %2470 = vset.pattern.permute.xlu1 %v2522_v11  ;;  %v2315_v35 = vld [vmem:[%s3459_s1 + $0x48] sm:$0xff]  ;;  %v2316_v37 = vld [vmem:[%s3459_s1 + $0x50] sm:$0xff]  ;;  %s2454_s30 = sshll.u32 %s2516_s9, 6 }
   0x7   : > { %44 = vrot.lane.b32.xlu1 %v38_v8, %s2518_s14  ;;  %42 = vst [vmem:[#allocation3 + $0x10] sm:$0xf] %v38_v8  ;;  %72 = vrot.lane.b32.xlu0 %v38_v8, %s2519_s15  ;;  %v40_v9 = vcombine.high %v38_v8, %v38_v8  ;;  %v2314_v32 = vld [vmem:[%s3459_s1 + $0x40] sm:$0xff]  ;;  %v95_v38 = vld [vmem:[%s3459_s1 + $0x18] sm:$0xff]  ;;  %s2821_s6 = scalar_lea.vmem [#allocation2], %s2454_s30  ;;  %s34_s9 = sadd.s32 1, %s2516_s9  }
   0x8   : > { %v2317_v39 = vld [vmem:[%s3459_s1 + $0x58] sm:$0xff]  ;;  %v96_v40 = vld [vmem:[%s3459_s1 + $0x20] sm:$0xff]  ;;  %v97_v42 = vld [vmem:[%s3459_s1 + $0x28] sm:$0xff]  ;;  %p31_p0 = scmp.ge.s32.totalorder %s34_s9, 2  }
   0x9   : > { %43 = vst [vmem:[#allocation3] sm:$0xf] %v40_v9  ;;  %v2318_v41 = vld [vmem:[%s3459_s1 + $0x60] sm:$0xff]  ;;  %v2319_v43 = vld [vmem:[%s3459_s1 + $0x68] sm:$0xff]  ;;  %v98_v44 = vld [vmem:[%s3459_s1 + $0x30] sm:$0xff]  ;;  %vm1015_vm4 = vcmask (%p31_p0), 1041409  }
   0xa   : > { %v2320_v45 = vld [vmem:[%s3459_s1 + $0x70] sm:$0xff]  ;;  %v99_v46 = vld [vmem:[%s3459_s1 + $0x38] sm:$0xff]  ;;  %v2330_v48 = vld [vmem:[%s3459_s1 + $0x80] sm:$0xff] }
   0xb   : > { %46 = vrot.lane.b32.xlu1 %v40_v9, %s2518_s14  ;;  %74 = vrot.lane.b32.xlu0 %v40_v9, %s2519_s15  ;;  %v2321_v47 = vld [vmem:[%s3459_s1 + $0x78] sm:$0xff]  ;;  %v2346_v49 = vld [vmem:[%s3459_s1 + $0xc0] sm:$0xff] }
   0xc   : > { %v2331_v50 = vld [vmem:[%s3459_s1 + $0x88] sm:$0xff]  ;;  %v2332_v52 = vld [vmem:[%s3459_s1 + $0x90] sm:$0xff]  ;;  %v2333_v54 = vld [vmem:[%s3459_s1 + $0x98] sm:$0xff] }
   0xd   : > { %v2347_v51 = vld [vmem:[%s3459_s1 + $0xc8] sm:$0xff]  ;;  %v2348_v53 = vld [vmem:[%s3459_s1 + $0xd0] sm:$0xff]  ;;  %v2349_v55 = vld [vmem:[%s3459_s1 + $0xd8] sm:$0xff] }
   0xe   : > { %v2334_v56 = vld [vmem:[%s3459_s1 + $0xa0] sm:$0xff]  ;;  %v2335_v58 = vld [vmem:[%s3459_s1 + $0xa8] sm:$0xff]  ;;  %v2336_v60 = vld [vmem:[%s3459_s1 + $0xb0] sm:$0xff] }
   0xf   : > { %62 = vrot.lane.b32.xlu1 %v40_v9, %s2521_s2  ;;  %60 = vrot.lane.b32.xlu0 %v38_v8, %s2521_s2  ;;  %v2350_v57 = vld [vmem:[%s3459_s1 + $0xe0] sm:$0xff]  ;;  %v2351_v59 = vld [vmem:[%s3459_s1 + $0xe8] sm:$0xff] }
  0x10   : > { %v2352_v61 = vld [vmem:[%s3459_s1 + $0xf0] sm:$0xff]  ;;  %v2337_v62 = vld [vmem:[%s3459_s1 + $0xb8] sm:$0xff] }
  0x11   : > { %v2353_v63 = vld [vmem:[%s3459_s1 + $0xf8] sm:$0xff] }
  0x13   : > { %726 = vperm.xlu0 %2469, %v2557_v0   ;;  %731 = vperm.xlu1 %2470, %v2562_v1   ;;  %v883_v0 = vld [vmem:[%s3461_s3 + $0x18] sm:$0xff] (%p31_p0) }
  0x17   : > { %736 = vperm.xlu1 %2470, %v2567_v2   ;;  %741 = vperm.xlu0 %2469, %v2572_v3  }
  0x1b   : > { %746 = vperm.xlu1 %2470, %v2577_v4   ;;  %751 = vperm.xlu0 %2469, %v2582_v5   ;;  %v881_v4 = vld [vmem:[%s3461_s3 + $0x8] sm:$0xff] (%p31_p0) }
  0x1f   : > { %756 = vperm.xlu1 %2470, %v2587_v6   ;;  %761 = vperm.xlu0 %2469, %v2592_v7  }
  0x79   : > { %v45_v12 = vpop.permute.xlu1 %44  ;;  %v73_v13 = vpop.permute.xlu0 %72 }
  0x7d   : > { %v47_v14 = vpop.permute.xlu1 %46  ;;  %v75_v15 = vpop.permute.xlu0 %74 }
  0x7e   : > { %v49_v16 = vsel %vm48_vm0, %v45_v12, %v47_v14  ;;  %v52_v17 = vsel %vm48_vm0, %v47_v14, %v45_v12  ;;  %v77_v18 = vsel %vm76_vm1, %v73_v13, %v75_v15  ;;  %v80_v19 = vsel %vm76_vm1, %v75_v15, %v73_v13 }
  0x7f   : > { %v54_v20 = vrot.slane %v49_v16, 4  ;;  %v55_v21 = vrot.slane %v52_v17, 4  ;;  %v82_v22 = vrot.slane %v77_v18, 4  ;;  %v83_v23 = vrot.slane %v80_v19, 4 }
  0x81   : > { %58 = vst [vmem:[#allocation3 + $0x10] sm:$0xf0] %v54_v20  ;;  %59 = vst [vmem:[#allocation3] sm:$0xf0] %v55_v21  ;;  %v63_v24 = vpop.permute.xlu1 %62  ;;  %v61_v25 = vpop.permute.xlu0 %60 }
  0x82   : > { %86 = vst [vmem:[#allocation3 + $0x18] sm:$0xf0] %v82_v22  ;;  %87 = vst [vmem:[#allocation3 + $0x8] sm:$0xf0] %v83_v23  ;;  %v65_v26 = vsel %vm64_vm2, %v61_v25, %v63_v24  ;;  %v69_v27 = vsel %vm64_vm2, %v63_v24, %v61_v25 }
  0x83   : > { %70 = vst [vmem:[#allocation3 + $0x18] sm:$0xf] %v65_v26  ;;  %71 = vst [vmem:[#allocation3 + $0x8] sm:$0xf] %v69_v27 }
  0x88   : > { %v89_v30 = vld [vmem:[#allocation3] sm:$0xff]  ;;  %v88_v33 = vld [vmem:[#allocation3 + $0x10] sm:$0xff] }
  0x8a   : > { %v91_v28 = vld [vmem:[#allocation3 + $0x8] sm:$0xff]  ;;  %v90_v29 = vld [vmem:[#allocation3 + $0x18] sm:$0xff] }
  0x8b   : > { %153 = vmatprep.subr.mxu0 %v91_v28  ;;  %299 = vmatprep.subr.mxu1 %v91_v28 }
  0x8c   : > { %154 = vmatpush1.msra.mxu0 %v90_v29  ;;  %300 = vmatpush1.msra.mxu1 %v90_v29 }
  0x8d   : > { %155 = vmatprep.subr.mxu0 %v89_v30  ;;  %301 = vmatprep.subr.mxu1 %v89_v30 }
  0x8e   : > { %156 = vmatpush1.msra.mxu0 %v88_v33  ;;  %302 = vmatpush1.msra.mxu1 %v88_v33 }
  0x8f   : > { %2306 = vmatmul.mubr.msk.f32.vlgmr.msra.gmra.mxu0 %vm100_vm3, %v92_v31  ;;  %2322 = vmatmul.mubr.msk.f32.vlgmr.msra.gmra.mxu1 %vm100_vm3, %v2314_v32 }
  0x90   : > { %461 = vmatprep.subr.mxu0 %v91_v28  ;;  %623 = vmatprep.subr.mxu1 %v91_v28 }
  0x91   : > { %462 = vmatpush1.msra.mxu0 %v90_v29  ;;  %624 = vmatpush1.msra.mxu1 %v90_v29 }
  0x92   : > { %463 = vmatprep.subr.mxu0 %v89_v30  ;;  %625 = vmatprep.subr.mxu1 %v89_v30 }
  0x93   : > { %195 = vmatprep.mubr.f32.mxu0 %v2520_v10  ;;  %341 = vmatprep.mubr.f32.mxu1 %v2520_v10 }
  0x94   : > { %464 = vmatpush1.msra.mxu0 %v88_v33  ;;  %626 = vmatpush1.msra.mxu1 %v88_v33 }
  0x95   : > { %2307 = vmatmul.mubr.msk.f32.gmra.mxu0 %vm100_vm3, %v93_v34  ;;  %2323 = vmatmul.mubr.msk.f32.gmra.mxu1 %vm100_vm3, %v2315_v35 }
  0x96   : > { %201 = vmatprep.mubr.f32.mxu0 %v2520_v10  ;;  %347 = vmatprep.mubr.f32.mxu1 %v2520_v10 }
  0x99   : > { %2308 = vmatmul.mubr.msk.f32.gmra.mxu0 %vm100_vm3, %v94_v36  ;;  %2324 = vmatmul.mubr.msk.f32.gmra.mxu1 %vm100_vm3, %v2316_v37 }
  0x9a   : > { %207 = vmatprep.mubr.f32.mxu0 %v2520_v10  ;;  %353 = vmatprep.mubr.f32.mxu1 %v2520_v10 }
  0x9d   : > { %2309 = vmatmul.mubr.msk.f32.gmra.mxu0 %vm100_vm3, %v95_v38  ;;  %2325 = vmatmul.mubr.msk.f32.gmra.mxu1 %vm100_vm3, %v2317_v39 }
  0x9e   : > { %213 = vmatprep.mubr.f32.mxu0 %v2520_v10  ;;  %359 = vmatprep.mubr.f32.mxu1 %v2520_v10 }
  0xa1   : > { %2310 = vmatmul.mubr.msk.f32.gmra.mxu0 %vm100_vm3, %v96_v40  ;;  %2326 = vmatmul.mubr.msk.f32.gmra.mxu1 %vm100_vm3, %v2318_v41 }
  0xa2   : > { %219 = vmatprep.mubr.f32.mxu0 %v2520_v10  ;;  %365 = vmatprep.mubr.f32.mxu1 %v2520_v10 }
  0xa5   : > { %2311 = vmatmul.mubr.msk.f32.gmra.mxu0 %vm100_vm3, %v97_v42  ;;  %2327 = vmatmul.mubr.msk.f32.gmra.mxu1 %vm100_vm3, %v2319_v43 }
  0xa6   : > { %225 = vmatprep.mubr.f32.mxu0 %v2520_v10  ;;  %371 = vmatprep.mubr.f32.mxu1 %v2520_v10 }
  0xa9   : > { %2312 = vmatmul.mubr.msk.f32.gmra.mxu0 %vm100_vm3, %v98_v44  ;;  %2328 = vmatmul.mubr.msk.f32.gmra.mxu1 %vm100_vm3, %v2320_v45  ;;  %v727_v45 = vpop.permute.xlu0 %726 }
  0xaa   : > { %231 = vmatprep.mubr.f32.mxu0 %v2520_v10  ;;  %377 = vmatprep.mubr.f32.mxu1 %v2520_v10 }
  0xad   : > { %2313 = vmatmul.mubr.msk.f32.gmra.mxu0 %vm100_vm3, %v99_v46  ;;  %2329 = vmatmul.mubr.msk.f32.gmra.mxu1 %vm100_vm3, %v2321_v47 }
  0xae   : > { %497 = vmatprep.mubr.f32.mxu0 %v2520_v10  ;;  %659 = vmatprep.mubr.f32.mxu1 %v2520_v10 }
  0xb1   : > { %2338 = vmatmul.mubr.msk.f32.vlgmr.msra.gmra.mxu0 %vm100_vm3, %v2330_v48  ;;  %2354 = vmatmul.mubr.msk.f32.vlgmr.msra.gmra.mxu1 %vm100_vm3, %v2346_v49 }
  0xb2   : > { %503 = vmatprep.mubr.f32.mxu0 %v2520_v10  ;;  %665 = vmatprep.mubr.f32.mxu1 %v2520_v10 }
  0xb5   : > { %2339 = vmatmul.mubr.msk.f32.gmra.mxu0 %vm100_vm3, %v2331_v50  ;;  %2355 = vmatmul.mubr.msk.f32.gmra.mxu1 %vm100_vm3, %v2347_v51 }
  0xb6   : > { %509 = vmatprep.mubr.f32.mxu0 %v2520_v10  ;;  %671 = vmatprep.mubr.f32.mxu1 %v2520_v10 }
  0xb9   : > { %2340 = vmatmul.mubr.msk.f32.gmra.mxu0 %vm100_vm3, %v2332_v52  ;;  %2356 = vmatmul.mubr.msk.f32.gmra.mxu1 %vm100_vm3, %v2348_v53 }
  0xba   : > { %515 = vmatprep.mubr.f32.mxu0 %v2520_v10  ;;  %677 = vmatprep.mubr.f32.mxu1 %v2520_v10 }
  0xbd   : > { %2341 = vmatmul.mubr.msk.f32.gmra.mxu0 %vm100_vm3, %v2333_v54  ;;  %2357 = vmatmul.mubr.msk.f32.gmra.mxu1 %vm100_vm3, %v2349_v55 }
  0xbe   : > { %521 = vmatprep.mubr.f32.mxu0 %v2520_v10  ;;  %683 = vmatprep.mubr.f32.mxu1 %v2520_v10 }
  0xc1   : > { %2342 = vmatmul.mubr.msk.f32.gmra.mxu0 %vm100_vm3, %v2334_v56  ;;  %2358 = vmatmul.mubr.msk.f32.gmra.mxu1 %vm100_vm3, %v2350_v57  ;;  %v732_v57 = vpop.permute.xlu1 %731 }
  0xc2   : > { %527 = vmatprep.mubr.f32.mxu0 %v2520_v10  ;;  %689 = vmatprep.mubr.f32.mxu1 %v2520_v10 }
  0xc5   : > { %2343 = vmatmul.mubr.msk.f32.gmra.mxu0 %vm100_vm3, %v2335_v58  ;;  %2359 = vmatmul.mubr.msk.f32.gmra.mxu1 %vm100_vm3, %v2351_v59 }
  0xc6   : > { %533 = vmatprep.mubr.f32.mxu0 %v2520_v10  ;;  %695 = vmatprep.mubr.f32.mxu1 %v2520_v10 }
  0xc9   : > { %2344 = vmatmul.mubr.msk.f32.gmra.mxu0 %vm100_vm3, %v2336_v60  ;;  %2360 = vmatmul.mubr.msk.f32.gmra.mxu1 %vm100_vm3, %v2352_v61 }
  0xca   : > { %539 = vmatprep.mubr.f32.mxu0 %v2520_v10  ;;  %701 = vmatprep.mubr.f32.mxu1 %v2520_v10 }
  0xcd   : > { %2345 = vmatmul.mubr.msk.f32.gmra.mxu0 %vm100_vm3, %v2337_v62  ;;  %2361 = vmatmul.mubr.msk.f32.gmra.mxu1 %vm100_vm3, %v2353_v63 }
 0x14f   : > { %v191_v8 = vpop.f32.mrf.mxu0  ;;  %v337_v9 = vpop.f32.mrf.mxu1 }
 0x150   : > { %v384_v40 = vmax.f32 %v191_v8, %v337_v9 }
 0x151   : > { %v193_v11 = vpop.f32.mrf.mxu0  ;;  %v339_v12 = vpop.f32.mrf.mxu1 }
 0x152   : > { %v385_v43 = vmax.f32 %v193_v11, %v339_v12 }
 0x155   : > { %v197_v13 = vpop.f32.mrf.mxu0  ;;  %v343_v14 = vpop.f32.mrf.mxu1 }
 0x156   : > { %v386_v48 = vmax.f32 %v197_v13, %v343_v14 }
 0x157   : > { %v199_v15 = vpop.f32.mrf.mxu0  ;;  %v345_v16 = vpop.f32.mrf.mxu1 }
 0x158   : > { %v387_v53 = vmax.f32 %v199_v15, %v345_v16 }
 0x159   : > { %v203_v17 = vpop.f32.mrf.mxu0  ;;  %v349_v18 = vpop.f32.mrf.mxu1 }
 0x15a   : > { %v388_v60 = vmax.f32 %v203_v17, %v349_v18  ;;  %v737_v18 = vpop.permute.xlu1 %736 }
 0x15b   : > { %v2773_v19 = vpop.f32.mrf.mxu0  ;;  %v351_v10 = vpop.f32.mrf.mxu1 }
 0x15c   : > { %v389_v15 = vmax.f32 %v2773_v19, %v351_v10 }
 0x15d   : > { %v2775_v20 = vpop.f32.mrf.mxu0  ;;  %v2777_v21 = vpop.f32.mrf.mxu1 }
 0x15f   : > { %v2779_v22 = vpop.f32.mrf.mxu0  ;;  %v2781_v23 = vpop.f32.mrf.mxu1 }
 0x161   : > { %v2783_v24 = vpop.f32.mrf.mxu0  ;;  %v2785_v25 = vpop.f32.mrf.mxu1 }
 0x163   : > { %v2787_v26 = vpop.f32.mrf.mxu0  ;;  %v2789_v27 = vpop.f32.mrf.mxu1 }
 0x165   : > { %v2791_v28 = vpop.f32.mrf.mxu0  ;;  %v2793_v29 = vpop.f32.mrf.mxu1 }
 0x167   : > { %v2795_v30 = vpop.f32.mrf.mxu0  ;;  %v2797_v31 = vpop.f32.mrf.mxu1 }
 0x169   : > { %v2799_v32 = vpop.f32.mrf.mxu0  ;;  %v2801_v33 = vpop.f32.mrf.mxu1 }
 0x16b   : > { %v2803_v34 = vpop.f32.mrf.mxu0  ;;  %v2805_v35 = vpop.f32.mrf.mxu1 }
 0x16d   : > { %v2807_v36 = vpop.f32.mrf.mxu0  ;;  %v2809_v37 = vpop.f32.mrf.mxu1 }
 0x16f   : > { %v2811_v38 = vpop.f32.mrf.mxu0  ;;  %v2813_v39 = vpop.f32.mrf.mxu1 }
 0x171   : > { %v499_v41 = vpop.f32.mrf.mxu0  ;;  %v661_v42 = vpop.f32.mrf.mxu1 }
 0x172   : > { %v546_v44 = vmax.f32 %v384_v40, %v499_v41 }
 0x173   : > { %v501_v46 = vpop.f32.mrf.mxu0  ;;  %v663_v47 = vpop.f32.mrf.mxu1 }
 0x174   : > { %v708_v49 = vmax.f32 %v546_v44, %v661_v42  ;;  %v547_v50 = vmax.f32 %v385_v43, %v501_v46  ;;  %v390_v42 = vmax.f32 %v2775_v20, %v2777_v21 }
 0x175   : > { %v505_v51 = vpop.f32.mrf.mxu0  ;;  %v667_v52 = vpop.f32.mrf.mxu1 }
 0x176   : > { %v709_v54 = vmax.f32 %v547_v50, %v663_v47  ;;  %v764_v55 = vadd.f32 %v727_v45, %v708_v49  ;;  %v548_v56 = vmax.f32 %v386_v48, %v505_v51  ;;  %v391_v48 = vmax.f32 %v2779_v22, %v2781_v23 }
 0x177   : > { %v507_v58 = vpop.f32.mrf.mxu0  ;;  %v669_v59 = vpop.f32.mrf.mxu1 }
 0x178   : > { %v765_v61 = vadd.f32 %v727_v45, %v709_v54  ;;  %v710_v62 = vmax.f32 %v548_v56, %v667_v52  ;;  %v549_v63 = vmax.f32 %v387_v53, %v507_v58  ;;  %v780_v8 = vmax.f32 %v764_v55, 0.0  ;;  %v742_v56 = vpop.permute.xlu0 %741 }
 0x179   : > { %v511_v9 = vpop.f32.mrf.mxu0  ;;  %v673_v11 = vpop.f32.mrf.mxu1  ;;  %v392_v52 = vmax.f32 %v2783_v24, %v2785_v25  ;;  %v393_v58 = vmax.f32 %v2787_v26, %v2789_v27  ;;  %v394_v24 = vmax.f32 %v2791_v28, %v2793_v29  ;;  %v396_v28 = vmax.f32 %v2799_v32, %v2801_v33 }
 0x17a   : > { %v781_v12 = vmax.f32 %v765_v61, 0.0  ;;  %v711_v13 = vmax.f32 %v549_v63, %v669_v59  ;;  %v766_v14 = vadd.f32 %v732_v57, %v710_v62  ;;  %v550_v40 = vmax.f32 %v388_v60, %v511_v9 }
 0x17b   : > { %v513_v16 = vpop.f32.mrf.mxu0  ;;  %v675_v41 = vpop.f32.mrf.mxu1  ;;  %v398_v32 = vmax.f32 %v2807_v36, %v2809_v37 }
 0x17c   : > { %v2446_v43 = vpack.c.bf16 %v781_v12, %v780_v8  ;;  %v767_v44 = vadd.f32 %v732_v57, %v711_v13  ;;  %v712_v17 = vmax.f32 %v550_v40, %v673_v11  ;;  %v551_v45 = vmax.f32 %v389_v15, %v513_v16  ;;  %v747_v13 = vpop.permute.xlu1 %746 }
 0x17d   : > { %v517_v46 = vpop.f32.mrf.mxu0  ;;  %v679_v47 = vpop.f32.mrf.mxu1  ;;  %v782_v19 = vmax.f32 %v766_v14, 0.0 }
 0x17e   : > { %847 = vst [vmem:[%s2821_s6] sm:$0xff] %v2446_v43  ;;  %v783_v10 = vmax.f32 %v767_v44, 0.0  ;;  %v552_v49 = vmax.f32 %v390_v42, %v517_v46  ;;  %v713_v50 = vmax.f32 %v551_v45, %v675_v41  ;;  %v768_v20 = vadd.f32 %v737_v18, %v712_v17 }
 0x17f   : > { %v519_v21 = vpop.f32.mrf.mxu0  ;;  %v681_v51 = vpop.f32.mrf.mxu1  ;;  %v395_v43 = vmax.f32 %v2795_v30, %v2797_v31 }
 0x180   : > { %v2447_v53 = vpack.c.bf16 %v783_v10, %v782_v19  ;;  %v714_v54 = vmax.f32 %v552_v49, %v679_v47  ;;  %v553_v55 = vmax.f32 %v391_v48, %v519_v21  ;;  %v769_v22 = vadd.f32 %v737_v18, %v713_v50  ;;  %v752_v49 = vpop.permute.xlu0 %751 }
 0x181   : > { %v523_v23 = vpop.f32.mrf.mxu0  ;;  %v685_v57 = vpop.f32.mrf.mxu1  ;;  %v784_v62 = vmax.f32 %v768_v20, 0.0  ;;  %v397_v19 = vmax.f32 %v2803_v34, %v2805_v35  ;;  %v399_v35 = vmax.f32 %v2811_v38, %v2813_v39 }
 0x182   : > { %848 = vst [vmem:[%s2821_s6 + $0x8] sm:$0xff] %v2447_v53  ;;  %v770_v59 = vadd.f32 %v742_v56, %v714_v54  ;;  %v715_v60 = vmax.f32 %v553_v55, %v681_v51  ;;  %v554_v61 = vmax.f32 %v392_v52, %v523_v23  ;;  %v785_v63 = vmax.f32 %v769_v22, 0.0  ;;  %v757_v52 = vpop.permute.xlu1 %756 }
 0x183   : > { %v525_v8 = vpop.f32.mrf.mxu0  ;;  %v687_v9 = vpop.f32.mrf.mxu1 }
 0x184   : > { %v771_v25 = vadd.f32 %v742_v56, %v715_v60  ;;  %v716_v11 = vmax.f32 %v554_v61, %v685_v57  ;;  %v555_v12 = vmax.f32 %v393_v58, %v525_v8  ;;  %v2448_v14 = vpack.c.bf16 %v785_v63, %v784_v62  ;;  %v762_v62 = vpop.permute.xlu0 %761 }
 0x185   : > { %v786_v40 = vmax.f32 %v770_v59, 0.0  ;;  %v529_v15 = vpop.f32.mrf.mxu0  ;;  %v691_v26 = vpop.f32.mrf.mxu1 }
 0x186   : > { %v787_v27 = vmax.f32 %v771_v25, 0.0  ;;  %v772_v16 = vadd.f32 %v747_v13, %v716_v11  ;;  %v717_v41 = vmax.f32 %v555_v12, %v687_v9  ;;  %v556_v42 = vmax.f32 %v394_v24, %v529_v15  ;;  %849 = vst [vmem:[%s2821_s6 + $0x10] sm:$0xff] %v2448_v14  ;;  %v2855_v15 = vld [vmem:[%s3461_s3 + $0x10] sm:$0xff] (%p31_p0) }
 0x187   : > { %v531_v44 = vpop.f32.mrf.mxu0  ;;  %v693_v17 = vpop.f32.mrf.mxu1 }
 0x188   : > { %v2449_v29 = vpack.c.bf16 %v787_v27, %v786_v40  ;;  %v773_v18 = vadd.f32 %v747_v13, %v717_v41  ;;  %v718_v45 = vmax.f32 %v556_v42, %v691_v26  ;;  %v557_v46 = vmax.f32 %v395_v43, %v531_v44  ;;  %v885_v43 = vld [vmem:[%s3461_s3 + $0x28] sm:$0xff] (%p31_p0) }
 0x189   : > { %v535_v47 = vpop.f32.mrf.mxu0  ;;  %v697_v48 = vpop.f32.mrf.mxu1  ;;  %v788_v10 = vmax.f32 %v772_v16, 0.0  ;;  %v880_v16 = vld [vmem:[%s3461_s3] sm:$0xff] (%p31_p0) }
 0x18a   : > { %850 = vst [vmem:[%s2821_s6 + $0x18] sm:$0xff] %v2449_v29  ;;  %v789_v30 = vmax.f32 %v773_v18, 0.0  ;;  %v558_v31 = vmax.f32 %v396_v28, %v535_v47  ;;  %v774_v50 = vadd.f32 %v752_v49, %v718_v45  ;;  %v719_v20 = vmax.f32 %v557_v46, %v693_v17  ;;  %v884_v17 = vld [vmem:[%s3461_s3 + $0x20] sm:$0xff] (%p31_p0)  ;;  %v887_v47 = vld [vmem:[%s3461_s3 + $0x38] sm:$0xff] (%p31_p0) }
 0x18b   : > { %v537_v21 = vpop.f32.mrf.mxu0  ;;  %v699_v51 = vpop.f32.mrf.mxu1 }
 0x18c   : > { %v2450_v33 = vpack.c.bf16 %v789_v30, %v788_v10  ;;  %v720_v53 = vmax.f32 %v558_v31, %v697_v48  ;;  %v559_v54 = vmax.f32 %v397_v19, %v537_v21  ;;  %v775_v55 = vadd.f32 %v752_v49, %v719_v20  ;;  %v886_v31 = vld [vmem:[%s3461_s3 + $0x30] sm:$0xff] (%p31_p0) }
 0x18d   : > { %v541_v56 = vpop.f32.mrf.mxu0  ;;  %v703_v34 = vpop.f32.mrf.mxu1  ;;  %v790_v58 = vmax.f32 %v774_v50, 0.0 }
 0x18e   : > { %851 = vst [vmem:[%s2821_s6 + $0x20] sm:$0xff] %v2450_v33  ;;  %v776_v22 = vadd.f32 %v757_v52, %v720_v53  ;;  %v721_v23 = vmax.f32 %v559_v54, %v699_v51  ;;  %v560_v57 = vmax.f32 %v398_v32, %v541_v56  ;;  %v791_v59 = vmax.f32 %v775_v55, 0.0 }
 0x18f   : > { %v543_v60 = vpop.f32.mrf.mxu0  ;;  %v705_v8 = vpop.f32.mrf.mxu1 }
 0x190   : > { %v777_v36 = vadd.f32 %v757_v52, %v721_v23  ;;  %v722_v37 = vmax.f32 %v560_v57, %v703_v34  ;;  %v561_v61 = vmax.f32 %v399_v35, %v543_v60  ;;  %v2451_v63 = vpack.c.bf16 %v791_v59, %v790_v58 }
 0x191   : > { %v792_v9 = vmax.f32 %v776_v22, 0.0 }
 0x192   : > { %v793_v24 = vmax.f32 %v777_v36, 0.0  ;;  %v778_v25 = vadd.f32 %v762_v62, %v722_v37  ;;  %v723_v38 = vmax.f32 %v561_v61, %v705_v8  ;;  %852 = vst [vmem:[%s2821_s6 + $0x28] sm:$0xff] %v2451_v63 }
 0x194   : > { %v2452_v39 = vpack.c.bf16 %v793_v24, %v792_v9  ;;  %v779_v11 = vadd.f32 %v762_v62, %v723_v38  ;;  %v794_v12 = vmax.f32 %v778_v25, 0.0 }
 0x196   : > { %853 = vst [vmem:[%s2821_s6 + $0x30] sm:$0xff] %v2452_v39  ;;  %v795_v13 = vmax.f32 %v779_v11, 0.0  ;;  %33 = sbr.rel (!%p31_p0) target bundleno = 4 (0x4), region = 61 }
 0x198   : > { %v2453_v14 = vpack.c.bf16 %v795_v13, %v794_v12 }
 0x19a   : > { %854 = vst [vmem:[%s2821_s6 + $0x38] sm:$0xff] %v2453_v14 }
 0x1a1   :  { %v2850_v40 = vld [vmem:[#allocation2 + $0x10] sm:$0xff]  ;;  %v2857_v26 = vld [vmem:[#allocation2] sm:$0xff]  ;;  %v2864_v41 = vld [vmem:[#allocation2 + $0x18] sm:$0xff] }
 0x1a2   :  { %v890_v27 = vmul.bf16 %v2855_v15, %v2850_v40  ;;  %v888_v1 = vmul.bf16 %v880_v16, %v2857_v26  ;;  %v891_v2 = vmul.bf16 %v883_v0, %v2864_v41  ;;  %v2871_v3 = vld [vmem:[#allocation2 + $0x8] sm:$0xff]  ;;  %v2882_v44 = vld [vmem:[#allocation2 + $0x20] sm:$0xff]  ;;  %v2887_v46 = vld [vmem:[#allocation2 + $0x38] sm:$0xff] }
 0x1a3   :  { %v2876_v5 = vld [vmem:[#allocation2 + $0x28] sm:$0xff]  ;;  %v889_v42 = vmul.bf16 %v881_v4, %v2871_v3  ;;  %v2893_v30 = vld [vmem:[#allocation2 + $0x30] sm:$0xff]  ;;  %v892_v20 = vmul.bf16 %v884_v17, %v2882_v44  ;;  %v895_v33 = vmul.bf16 %v887_v47, %v2887_v46  ;;  %v2903_v34 = vld [vmem:[#allocation2 + $0x40] sm:$0xff] }
 0x1a4   :  { %v908_v6 = vunpack.c.l.bf16 %v890_v27  ;;  %v909_v7 = vunpack.c.h.bf16 %v890_v27  ;;  %v904_v28 = vunpack.c.l.bf16 %v888_v1  ;;  %v905_v29 = vunpack.c.h.bf16 %v888_v1  ;;  %v2901_v56 = vld [vmem:[#allocation2 + $0x48] sm:$0xff]  ;;  %v2907_v37 = vld [vmem:[#allocation2 + $0x58] sm:$0xff]  ;;  %v2909_v61 = vld [vmem:[#allocation2 + $0x50] sm:$0xff] }
 0x1a5   :  { %v910_v18 = vunpack.c.l.bf16 %v891_v2  ;;  %v911_v45 = vunpack.c.h.bf16 %v891_v2  ;;  %v906_v19 = vunpack.c.l.bf16 %v889_v42  ;;  %v907_v10 = vunpack.c.h.bf16 %v889_v42  ;;  %v2914_v11 = vld [vmem:[#allocation2 + $0x68] sm:$0xff]  ;;  %v2916_v12 = vld [vmem:[#allocation2 + $0x60] sm:$0xff] }
 0x1a6   :  { %v942_v48 = vadd.f32 %v909_v7, %v908_v6  ;;  %v893_v49 = vmul.bf16 %v885_v43, %v2876_v5  ;;  %v936_v50 = vadd.f32 %v905_v29, %v904_v28  ;;  %v912_v53 = vunpack.c.l.bf16 %v892_v20  ;;  %v2920_v6 = vld [vmem:[#allocation2 + $0x78] sm:$0xff]  ;;  %v2922_v7 = vld [vmem:[#allocation2 + $0x70] sm:$0xff] }
 0x1a7   :  { %v945_v21 = vadd.f32 %v911_v45, %v910_v18  ;;  %v939_v52 = vadd.f32 %v907_v10, %v906_v19  ;;  %v913_v54 = vunpack.c.h.bf16 %v892_v20  ;;  %v894_v55 = vmul.bf16 %v886_v31, %v2893_v30  ;;  %v2373_v19 = vld [vmem:[%s3461_s3 + $0x40] sm:$0xff] }
 0x1a8   :  { %943 = vadd.xlane.f32.xlu1 %v942_v48  ;;  %v914_v51 = vunpack.c.l.bf16 %v893_v49  ;;  %v915_v32 = vunpack.c.h.bf16 %v893_v49  ;;  %937 = vadd.xlane.f32.xlu0 %v936_v50  ;;  %v918_v22 = vunpack.c.l.bf16 %v895_v33  ;;  %v919_v23 = vunpack.c.h.bf16 %v895_v33  ;;  %v2375_v33 = vld [vmem:[%s3461_s3 + $0x50] sm:$0xff] }
 0x1a9   :  { %v897_v57 = vmul.bf16 %v881_v4, %v2901_v56  ;;  %v948_v58 = vadd.f32 %v913_v54, %v912_v53  ;;  %v916_v59 = vunpack.c.l.bf16 %v894_v55  ;;  %v917_v60 = vunpack.c.h.bf16 %v894_v55 }
 0x1aa   :  { %v951_v35 = vadd.f32 %v915_v32, %v914_v51  ;;  %v896_v36 = vmul.bf16 %v880_v16, %v2903_v34  ;;  %v957_v62 = vadd.f32 %v919_v23, %v918_v22  ;;  %v899_v9 = vmul.bf16 %v883_v0, %v2907_v37  ;;  %v2376_v32 = vld [vmem:[%s3461_s3 + $0x58] sm:$0xff] }
 0x1ab   :  { %v922_v63 = vunpack.c.l.bf16 %v897_v57  ;;  %v923_v8 = vunpack.c.h.bf16 %v897_v57  ;;  %v954_v24 = vadd.f32 %v917_v60, %v916_v59  ;;  %v898_v39 = vmul.bf16 %v2855_v15, %v2909_v61  ;;  %v2377_v59 = vld [vmem:[%s3461_s3 + $0x60] sm:$0xff] }
 0x1ac   :  { %946 = vadd.xlane.f32.xlu1 %v945_v21  ;;  %940 = vadd.xlane.f32.xlu0 %v939_v52  ;;  %v920_v25 = vunpack.c.l.bf16 %v896_v36  ;;  %v921_v38 = vunpack.c.h.bf16 %v896_v36  ;;  %v926_v14 = vunpack.c.l.bf16 %v899_v9  ;;  %v927_v27 = vunpack.c.h.bf16 %v899_v9 }
 0x1ad   :  { %v963_v13 = vadd.f32 %v923_v8, %v922_v63  ;;  %v901_v16 = vmul.bf16 %v885_v43, %v2914_v11  ;;  %v924_v0 = vunpack.c.l.bf16 %v898_v39  ;;  %v925_v2 = vunpack.c.h.bf16 %v898_v39  ;;  %v2379_v39 = vld [vmem:[%s3461_s3 + $0x70] sm:$0xff] }
 0x1ae   :  { %v960_v1 = vadd.f32 %v921_v38, %v920_v25  ;;  %v900_v4 = vmul.bf16 %v884_v17, %v2916_v12  ;;  %v969_v15 = vadd.f32 %v927_v27, %v926_v14  ;;  %v903_v29 = vmul.bf16 %v887_v47, %v2920_v6  ;;  %v2374_v17 = vld [vmem:[%s3461_s3 + $0x48] sm:$0xff]  ;;  %v2380_v38 = vld [vmem:[%s3461_s3 + $0x78] sm:$0xff] }
 0x1af   :  { %v930_v42 = vunpack.c.l.bf16 %v901_v16  ;;  %v931_v28 = vunpack.c.h.bf16 %v901_v16  ;;  %v966_v18 = vadd.f32 %v925_v2, %v924_v0  ;;  %v902_v48 = vmul.bf16 %v886_v31, %v2922_v7 }
 0x1b0   :  { %952 = vadd.xlane.f32.xlu1 %v951_v35  ;;  %949 = vadd.xlane.f32.xlu0 %v948_v58  ;;  %v928_v45 = vunpack.c.l.bf16 %v900_v4  ;;  %v929_v43 = vunpack.c.h.bf16 %v900_v4  ;;  %v934_v49 = vunpack.c.l.bf16 %v903_v29  ;;  %v935_v50 = vunpack.c.h.bf16 %v903_v29  ;;  %v2378_v58 = vld [vmem:[%s3461_s3 + $0x68] sm:$0xff] }
 0x1b1   :  { %v975_v10 = vadd.f32 %v931_v28, %v930_v42  ;;  %v1030_v47 = vmul.bf16 %v2374_v17, %v2871_v3  ;;  %v932_v21 = vunpack.c.l.bf16 %v902_v48  ;;  %v933_v51 = vunpack.c.h.bf16 %v902_v48 }
 0x1b2   :  { %v972_v20 = vadd.f32 %v929_v43, %v928_v45  ;;  %v1029_v31 = vmul.bf16 %v2373_v19, %v2857_v26  ;;  %v981_v52 = vadd.f32 %v935_v50, %v934_v49  ;;  %v1032_v55 = vmul.bf16 %v2376_v32, %v2864_v41 }
 0x1b3   :  { %v1047_v53 = vunpack.c.l.bf16 %v1030_v47  ;;  %v1048_v54 = vunpack.c.h.bf16 %v1030_v47  ;;  %v978_v35 = vadd.f32 %v933_v51, %v932_v21  ;;  %v1031_v57 = vmul.bf16 %v2375_v33, %v2850_v40 }
 0x1b4   :  { %958 = vadd.xlane.f32.xlu1 %v957_v62  ;;  %955 = vadd.xlane.f32.xlu0 %v954_v24  ;;  %v1045_v22 = vunpack.c.l.bf16 %v1029_v31  ;;  %v1046_v23 = vunpack.c.h.bf16 %v1029_v31  ;;  %v1051_v36 = vunpack.c.l.bf16 %v1032_v55  ;;  %v1052_v62 = vunpack.c.h.bf16 %v1032_v55 }
 0x1b5   :  { %v1080_v60 = vadd.f32 %v1048_v54, %v1047_v53  ;;  %v1034_v63 = vmul.bf16 %v2378_v58, %v2876_v5  ;;  %v1049_v9 = vunpack.c.l.bf16 %v1031_v57  ;;  %v1050_v24 = vunpack.c.h.bf16 %v1031_v57 }
 0x1b6   :  { %v1077_v8 = vadd.f32 %v1046_v23, %v1045_v22  ;;  %v1033_v25 = vmul.bf16 %v2377_v59, %v2882_v44  ;;  %v1036_v16 = vmul.bf16 %v2380_v38, %v2887_v46  ;;  %v1035_v4 = vmul.bf16 %v2379_v39, %v2893_v30 }
 0x1b7   :  { %v1055_v14 = vunpack.c.l.bf16 %v1034_v63  ;;  %v1056_v27 = vunpack.c.h.bf16 %v1034_v63  ;;  %v1038_v29 = vmul.bf16 %v2374_v17, %v2901_v56  ;;  %v1037_v48 = vmul.bf16 %v2373_v19, %v2903_v34 }
 0x1b8   :  { %964 = vadd.xlane.f32.xlu1 %v963_v13  ;;  %961 = vadd.xlane.f32.xlu0 %v960_v1  ;;  %v1086_v13 = vadd.f32 %v1052_v62, %v1051_v36  ;;  %v1083_v1 = vadd.f32 %v1050_v24, %v1049_v9  ;;  %v1053_v0 = vunpack.c.l.bf16 %v1033_v25  ;;  %v1054_v2 = vunpack.c.h.bf16 %v1033_v25 }
 0x1b9   :  { %v1059_v42 = vunpack.c.l.bf16 %v1036_v16  ;;  %v1060_v28 = vunpack.c.h.bf16 %v1036_v16  ;;  %v1057_v45 = vunpack.c.l.bf16 %v1035_v4  ;;  %v1058_v43 = vunpack.c.h.bf16 %v1035_v4  ;;  %v2383_v16 = vld [vmem:[%s3461_s3 + $0x90] sm:$0xff] }
 0x1ba   :  { %v1063_v49 = vunpack.c.l.bf16 %v1038_v29  ;;  %v1064_v50 = vunpack.c.h.bf16 %v1038_v29  ;;  %v1040_v47 = vmul.bf16 %v2376_v32, %v2907_v37  ;;  %v1061_v21 = vunpack.c.l.bf16 %v1037_v48 }
 0x1bb   :  { %v1062_v51 = vunpack.c.h.bf16 %v1037_v48  ;;  %v1039_v31 = vmul.bf16 %v2375_v33, %v2909_v61  ;;  %v1042_v54 = vmul.bf16 %v2378_v58, %v2914_v11  ;;  %v1041_v22 = vmul.bf16 %v2377_v59, %v2916_v12  ;;  %v2382_v58 = vld [vmem:[%s3461_s3 + $0x88] sm:$0xff]  ;;  %v2381_v59 = vld [vmem:[%s3461_s3 + $0x80] sm:$0xff] }
 0x1bc   :  { %970 = vadd.xlane.f32.xlu1 %v969_v15  ;;  %967 = vadd.xlane.f32.xlu0 %v966_v18  ;;  %v1092_v15 = vadd.f32 %v1056_v27, %v1055_v14  ;;  %v1089_v18 = vadd.f32 %v1054_v2, %v1053_v0  ;;  %v1104_v17 = vadd.f32 %v1064_v50, %v1063_v49  ;;  %v1068_v53 = vunpack.c.h.bf16 %v1040_v47  ;;  %v2384_v27 = vld [vmem:[%s3461_s3 + $0x98] sm:$0xff] }
 0x1bd   :  { %v1101_v19 = vadd.f32 %v1062_v51, %v1061_v21  ;;  %v1065_v55 = vunpack.c.l.bf16 %v1039_v31  ;;  %v1071_v23 = vunpack.c.l.bf16 %v1042_v54  ;;  %v1072_v57 = vunpack.c.h.bf16 %v1042_v54  ;;  %v2388_v51 = vld [vmem:[%s3461_s3 + $0xb8] sm:$0xff] }
 0x1be   :  { %v1069_v36 = vunpack.c.l.bf16 %v1041_v22  ;;  %v1070_v62 = vunpack.c.h.bf16 %v1041_v22  ;;  %v1043_v63 = vmul.bf16 %v2379_v39, %v2922_v7  ;;  %v1170_v25 = vmul.bf16 %v2382_v58, %v2871_v3 }
 0x1bf   :  { %v1169_v39 = vmul.bf16 %v2381_v59, %v2857_v26  ;;  %v1172_v4 = vmul.bf16 %v2384_v27, %v2864_v41  ;;  %v1171_v29 = vmul.bf16 %v2383_v16, %v2850_v40  ;;  %v1176_v54 = vmul.bf16 %v2388_v51, %v2887_v46 }
 0x1c0   :  { %976 = vadd.xlane.f32.xlu1 %v975_v10  ;;  %973 = vadd.xlane.f32.xlu0 %v972_v20  ;;  %v1098_v10 = vadd.f32 %v1060_v28, %v1059_v42  ;;  %v1095_v20 = vadd.f32 %v1058_v43, %v1057_v45  ;;  %v1074_v14 = vunpack.c.h.bf16 %v1043_v63  ;;  %v1187_v0 = vunpack.c.l.bf16 %v1170_v25  ;;  %v2385_v45 = vld [vmem:[%s3461_s3 + $0xa0] sm:$0xff] }
 0x1c1   :  { %v1188_v2 = vunpack.c.h.bf16 %v1170_v25  ;;  %v1185_v42 = vunpack.c.l.bf16 %v1169_v39  ;;  %v1186_v28 = vunpack.c.h.bf16 %v1169_v39  ;;  %v1191_v48 = vunpack.c.l.bf16 %v1172_v4 }
 0x1c2   :  { %v1173_v21 = vmul.bf16 %v2385_v45, %v2882_v44  ;;  %v1180_v25 = vmul.bf16 %v2384_v27, %v2907_v37  ;;  %v1179_v39 = vmul.bf16 %v2383_v16, %v2909_v61 }
 0x1c3   :  { %v1220_v43 = vadd.f32 %v1188_v2, %v1187_v0  ;;  %v1217_v50 = vadd.f32 %v1186_v28, %v1185_v42  ;;  %v1181_v42 = vmul.bf16 %v2385_v45, %v2916_v12  ;;  %v2389_v45 = vld [vmem:[%s3461_s3 + $0xc0] sm:$0xff] }
 0x1c4   :  { %982 = vadd.xlane.f32.xlu1 %v981_v52  ;;  %979 = vadd.xlane.f32.xlu0 %v978_v35  ;;  %v1067_v52 = vunpack.c.l.bf16 %v1040_v47  ;;  %v1066_v35 = vunpack.c.h.bf16 %v1039_v31  ;;  %v1189_v47 = vunpack.c.l.bf16 %v1171_v29  ;;  %v2387_v31 = vld [vmem:[%s3461_s3 + $0xb0] sm:$0xff]  ;;  %v1208_v0 = vunpack.c.h.bf16 %v1180_v25 }
 0x1c5   :  { %v1175_v22 = vmul.bf16 %v2387_v31, %v2893_v30 }
 0x1c6   :  { %v1110_v32 = vadd.f32 %v1068_v53, %v1067_v52  ;;  %v1107_v33 = vadd.f32 %v1066_v35, %v1065_v55  ;;  %v1193_v55 = vunpack.c.l.bf16 %v1173_v21  ;;  %v1194_v35 = vunpack.c.h.bf16 %v1173_v21 }
 0x1c8   :  { %1081 = vadd.xlane.f32.xlu1 %v1080_v60  ;;  %1078 = vadd.xlane.f32.xlu0 %v1077_v8  ;;  %v1044_v60 = vmul.bf16 %v2380_v38, %v2920_v6  ;;  %v1116_v8 = vadd.f32 %v1072_v57, %v1071_v23  ;;  %v1113_v38 = vadd.f32 %v1070_v62, %v1069_v36  ;;  %v1199_v23 = vunpack.c.l.bf16 %v1176_v54 }
 0x1c9   :  { %v1200_v57 = vunpack.c.h.bf16 %v1176_v54  ;;  %v1197_v36 = vunpack.c.l.bf16 %v1175_v22  ;;  %v1198_v62 = vunpack.c.h.bf16 %v1175_v22  ;;  %v2391_v54 = vld [vmem:[%s3461_s3 + $0xd0] sm:$0xff] }
 0x1ca   :  { %v1075_v9 = vunpack.c.l.bf16 %v1044_v60  ;;  %v1076_v24 = vunpack.c.h.bf16 %v1044_v60  ;;  %v1178_v60 = vmul.bf16 %v2382_v58, %v2901_v56 }
 0x1cc   :  { %1087 = vadd.xlane.f32.xlu1 %v1086_v13  ;;  %1084 = vadd.xlane.f32.xlu0 %v1083_v1  ;;  %v1073_v13 = vunpack.c.l.bf16 %v1043_v63  ;;  %v1122_v1 = vadd.f32 %v1076_v24, %v1075_v9  ;;  %v1177_v63 = vmul.bf16 %v2381_v59, %v2903_v34  ;;  %v1203_v9 = vunpack.c.l.bf16 %v1178_v60 }
 0x1cd   :  { %v1204_v24 = vunpack.c.h.bf16 %v1178_v60  ;;  %v1311_v60 = vmul.bf16 %v2391_v54, %v2850_v40 }
 0x1cf   :  { %v1244_v58 = vadd.f32 %v1204_v24, %v1203_v9 }
 0x1d0   :  { %1093 = vadd.xlane.f32.xlu1 %v1092_v15  ;;  %1090 = vadd.xlane.f32.xlu0 %v1089_v18  ;;  %v1119_v15 = vadd.f32 %v1074_v14, %v1073_v13  ;;  %v2386_v18 = vld [vmem:[%s3461_s3 + $0xa8] sm:$0xff]  ;;  %v1201_v13 = vunpack.c.l.bf16 %v1177_v63  ;;  %v1202_v14 = vunpack.c.h.bf16 %v1177_v63 }
 0x1d1   :  { %v1174_v49 = vmul.bf16 %v2386_v18, %v2876_v5  ;;  %v1182_v2 = vmul.bf16 %v2386_v18, %v2914_v11  ;;  %v2390_v18 = vld [vmem:[%s3461_s3 + $0xc8] sm:$0xff] }
 0x1d2   :  { %v1241_v59 = vadd.f32 %v1202_v14, %v1201_v13  ;;  %v1310_v21 = vmul.bf16 %v2390_v18, %v2871_v3  ;;  %v2396_v14 = vld [vmem:[%s3461_s3 + $0xf8] sm:$0xff] }
 0x1d3   :  { %v1195_v52 = vunpack.c.l.bf16 %v1174_v49  ;;  %v1196_v53 = vunpack.c.h.bf16 %v1174_v49  ;;  %v1211_v28 = vunpack.c.l.bf16 %v1182_v2  ;;  %v1183_v49 = vmul.bf16 %v2387_v31, %v2922_v7 }
 0x1d4   :  { %1099 = vadd.xlane.f32.xlu1 %v1098_v10  ;;  %1096 = vadd.xlane.f32.xlu0 %v1095_v20  ;;  %v1192_v10 = vunpack.c.h.bf16 %v1172_v4  ;;  %v1190_v20 = vunpack.c.h.bf16 %v1171_v29  ;;  %v1205_v4 = vunpack.c.l.bf16 %v1179_v39  ;;  %v1212_v29 = vunpack.c.h.bf16 %v1182_v2 }
 0x1d5   :  { %v1309_v31 = vmul.bf16 %v2389_v45, %v2857_v26  ;;  %v1316_v2 = vmul.bf16 %v2396_v14, %v2887_v46 }
 0x1d8   :  { %1105 = vadd.xlane.f32.xlu1 %v1104_v17  ;;  %1102 = vadd.xlane.f32.xlu0 %v1101_v19  ;;  %v1226_v17 = vadd.f32 %v1192_v10, %v1191_v48  ;;  %v1223_v19 = vadd.f32 %v1190_v20, %v1189_v47  ;;  %v1209_v48 = vunpack.c.l.bf16 %v1181_v42  ;;  %v1210_v10 = vunpack.c.h.bf16 %v1181_v42 }
 0x1dc   :  { %1111 = vadd.xlane.f32.xlu1 %v1110_v32  ;;  %1108 = vadd.xlane.f32.xlu0 %v1107_v33  ;;  %v1232_v32 = vadd.f32 %v1196_v53, %v1195_v52  ;;  %v1229_v33 = vadd.f32 %v1194_v35, %v1193_v55  ;;  %v1214_v52 = vunpack.c.h.bf16 %v1183_v49  ;;  %v2392_v53 = vld [vmem:[%s3461_s3 + $0xd8] sm:$0xff]  ;;  %v1327_v55 = vunpack.c.l.bf16 %v1310_v21 }
 0x1dd   :  { %v1328_v35 = vunpack.c.h.bf16 %v1310_v21  ;;  %v1312_v22 = vmul.bf16 %v2392_v53, %v2864_v41  ;;  %v1320_v21 = vmul.bf16 %v2392_v53, %v2907_v37 }
 0x1df   :  { %v1331_v63 = vunpack.c.l.bf16 %v1312_v22 }
 0x1e0   :  { %1117 = vadd.xlane.f32.xlu1 %v1116_v8  ;;  %1114 = vadd.xlane.f32.xlu0 %v1113_v38  ;;  %v1238_v8 = vadd.f32 %v1200_v57, %v1199_v23  ;;  %v1235_v38 = vadd.f32 %v1198_v62, %v1197_v36  ;;  %v1325_v23 = vunpack.c.l.bf16 %v1309_v31  ;;  %v1326_v57 = vunpack.c.h.bf16 %v1309_v31  ;;  %v2393_v36 = vld [vmem:[%s3461_s3 + $0xe0] sm:$0xff] }
 0x1e1   :  { %v1360_v62 = vadd.f32 %v1328_v35, %v1327_v55  ;;  %v1313_v13 = vmul.bf16 %v2393_v36, %v2882_v44  ;;  %v1319_v31 = vmul.bf16 %v2391_v54, %v2909_v61  ;;  %v1348_v55 = vunpack.c.h.bf16 %v1320_v21 }
 0x1e2   :  { %v1357_v24 = vadd.f32 %v1326_v57, %v1325_v23  ;;  %v1321_v23 = vmul.bf16 %v2393_v36, %v2916_v12  ;;  %v2397_v36 = vld [vmem:[%s3461_s3 + $0x100] sm:$0xff] }
 0x1e4   :  { %1123 = vadd.xlane.f32.xlu1 %v1122_v1  ;;  %1120 = vadd.xlane.f32.xlu0 %v1119_v15  ;;  %v1207_v1 = vunpack.c.l.bf16 %v1180_v25  ;;  %v1206_v15 = vunpack.c.h.bf16 %v1179_v39  ;;  %v1329_v25 = vunpack.c.l.bf16 %v1311_v60  ;;  %v2395_v39 = vld [vmem:[%s3461_s3 + $0xf0] sm:$0xff] }
 0x1e5   :  { %v1315_v42 = vmul.bf16 %v2395_v39, %v2893_v30 }
 0x1e6   :  { %v1250_v27 = vadd.f32 %v1208_v0, %v1207_v1  ;;  %v1247_v16 = vadd.f32 %v1206_v15, %v1205_v4  ;;  %v1333_v4 = vunpack.c.l.bf16 %v1313_v13  ;;  %v1334_v15 = vunpack.c.h.bf16 %v1313_v13 }
 0x1e8   :  { %1221 = vadd.xlane.f32.xlu1 %v1220_v43  ;;  %1218 = vadd.xlane.f32.xlu0 %v1217_v50  ;;  %v1184_v43 = vmul.bf16 %v2388_v51, %v2920_v6  ;;  %v1256_v50 = vadd.f32 %v1212_v29, %v1211_v28  ;;  %v1253_v51 = vadd.f32 %v1210_v10, %v1209_v48  ;;  %v1339_v28 = vunpack.c.l.bf16 %v1316_v2 }
 0x1e9   :  { %v1340_v29 = vunpack.c.h.bf16 %v1316_v2  ;;  %v1337_v48 = vunpack.c.l.bf16 %v1315_v42  ;;  %v1338_v10 = vunpack.c.h.bf16 %v1315_v42  ;;  %v2399_v2 = vld [vmem:[%s3461_s3 + $0x110] sm:$0xff] }
 0x1ea   :  { %v1215_v47 = vunpack.c.l.bf16 %v1184_v43  ;;  %v1216_v20 = vunpack.c.h.bf16 %v1184_v43  ;;  %v1318_v43 = vmul.bf16 %v2390_v18, %v2901_v56 }
 0x1ec   :  { %1227 = vadd.xlane.f32.xlu1 %v1226_v17  ;;  %1224 = vadd.xlane.f32.xlu0 %v1223_v19  ;;  %v1213_v17 = vunpack.c.l.bf16 %v1183_v49  ;;  %v1262_v19 = vadd.f32 %v1216_v20, %v1215_v47  ;;  %v1317_v49 = vmul.bf16 %v2389_v45, %v2903_v34  ;;  %v1343_v47 = vunpack.c.l.bf16 %v1318_v43 }
 0x1ed   :  { %v1344_v20 = vunpack.c.h.bf16 %v1318_v43  ;;  %v1451_v43 = vmul.bf16 %v2399_v2, %v2850_v40 }
 0x1ef   :  { %v1384_v18 = vadd.f32 %v1344_v20, %v1343_v47 }
 0x1f0   :  { %1233 = vadd.xlane.f32.xlu1 %v1232_v32  ;;  %1230 = vadd.xlane.f32.xlu0 %v1229_v33  ;;  %v1259_v32 = vadd.f32 %v1214_v52, %v1213_v17  ;;  %v2394_v33 = vld [vmem:[%s3461_s3 + $0xe8] sm:$0xff]  ;;  %v1341_v17 = vunpack.c.l.bf16 %v1317_v49  ;;  %v1342_v52 = vunpack.c.h.bf16 %v1317_v49 }
 0x1f1   :  { %v1314_v9 = vmul.bf16 %v2394_v33, %v2876_v5  ;;  %v1322_v35 = vmul.bf16 %v2394_v33, %v2914_v11  ;;  %v2398_v33 = vld [vmem:[%s3461_s3 + $0x108] sm:$0xff] }
 0x1f2   :  { %v1381_v45 = vadd.f32 %v1342_v52, %v1341_v17  ;;  %v1450_v13 = vmul.bf16 %v2398_v33, %v2871_v3  ;;  %v2404_v52 = vld [vmem:[%s3461_s3 + $0x138] sm:$0xff] }
 0x1f3   :  { %v1335_v1 = vunpack.c.l.bf16 %v1314_v9  ;;  %v1336_v0 = vunpack.c.h.bf16 %v1314_v9  ;;  %v1351_v57 = vunpack.c.l.bf16 %v1322_v35  ;;  %v1323_v9 = vmul.bf16 %v2395_v39, %v2922_v7 }
 0x1f4   :  { %1239 = vadd.xlane.f32.xlu1 %v1238_v8  ;;  %1236 = vadd.xlane.f32.xlu0 %v1235_v38  ;;  %v1332_v8 = vunpack.c.h.bf16 %v1312_v22  ;;  %v1330_v38 = vunpack.c.h.bf16 %v1311_v60  ;;  %v1345_v22 = vunpack.c.l.bf16 %v1319_v31  ;;  %v1352_v60 = vunpack.c.h.bf16 %v1322_v35 }
 0x1f5   :  { %v1449_v39 = vmul.bf16 %v2397_v36, %v2857_v26  ;;  %v1456_v35 = vmul.bf16 %v2404_v52, %v2887_v46 }
 0x1f8   :  { %1245 = vadd.xlane.f32.xlu1 %v1244_v58  ;;  %1242 = vadd.xlane.f32.xlu0 %v1241_v59  ;;  %v1366_v58 = vadd.f32 %v1332_v8, %v1331_v63  ;;  %v1363_v59 = vadd.f32 %v1330_v38, %v1329_v25  ;;  %v1349_v63 = vunpack.c.l.bf16 %v1321_v23  ;;  %v1350_v8 = vunpack.c.h.bf16 %v1321_v23 }
 0x1fc   :  { %1251 = vadd.xlane.f32.xlu1 %v1250_v27  ;;  %1248 = vadd.xlane.f32.xlu0 %v1247_v16  ;;  %v1372_v27 = vadd.f32 %v1336_v0, %v1335_v1  ;;  %v1369_v16 = vadd.f32 %v1334_v15, %v1333_v4  ;;  %v1354_v1 = vunpack.c.h.bf16 %v1323_v9  ;;  %v2400_v0 = vld [vmem:[%s3461_s3 + $0x118] sm:$0xff]  ;;  %v1467_v4 = vunpack.c.l.bf16 %v1450_v13 }
 0x1fd   :  { %v1468_v15 = vunpack.c.h.bf16 %v1450_v13  ;;  %v1452_v42 = vmul.bf16 %v2400_v0, %v2864_v41  ;;  %v1460_v13 = vmul.bf16 %v2400_v0, %v2907_v37 }
 0x1ff   :  { %v1471_v49 = vunpack.c.l.bf16 %v1452_v42 }
 0x200   :  { %1257 = vadd.xlane.f32.xlu1 %v1256_v50  ;;  %1254 = vadd.xlane.f32.xlu0 %v1253_v51  ;;  %v1378_v50 = vadd.f32 %v1340_v29, %v1339_v28  ;;  %v1375_v51 = vadd.f32 %v1338_v10, %v1337_v48  ;;  %v1465_v28 = vunpack.c.l.bf16 %v1449_v39  ;;  %v1466_v29 = vunpack.c.h.bf16 %v1449_v39  ;;  %v2401_v48 = vld [vmem:[%s3461_s3 + $0x120] sm:$0xff] }
 0x201   :  { %v1500_v10 = vadd.f32 %v1468_v15, %v1467_v4  ;;  %v1453_v17 = vmul.bf16 %v2401_v48, %v2882_v44  ;;  %v1487_v15 = vunpack.c.l.bf16 %v1460_v13  ;;  %v1461_v0 = vmul.bf16 %v2401_v48, %v2916_v12  ;;  %v3089_v48 = vld [vmem:[%s3461_s3 + $0x148] sm:$0xff] }
 0x202   :  { %v1497_v20 = vadd.f32 %v1466_v29, %v1465_v28 }
 0x204   :  { %1263 = vadd.xlane.f32.xlu1 %v1262_v19  ;;  %1260 = vadd.xlane.f32.xlu0 %v1259_v32  ;;  %v1347_v19 = vunpack.c.l.bf16 %v1320_v21  ;;  %v1346_v32 = vunpack.c.h.bf16 %v1319_v31  ;;  %v1469_v21 = vunpack.c.l.bf16 %v1451_v43  ;;  %v2403_v31 = vld [vmem:[%s3461_s3 + $0x130] sm:$0xff] }
 0x205   :  { %v1455_v23 = vmul.bf16 %v2403_v31, %v2893_v30 }
 0x206   :  { %v1390_v53 = vadd.f32 %v1348_v55, %v1347_v19  ;;  %v1387_v54 = vadd.f32 %v1346_v32, %v1345_v22  ;;  %v1473_v22 = vunpack.c.l.bf16 %v1453_v17  ;;  %v1474_v32 = vunpack.c.h.bf16 %v1453_v17 }
 0x208   :  { %1361 = vadd.xlane.f32.xlu1 %v1360_v62  ;;  %1358 = vadd.xlane.f32.xlu0 %v1357_v24  ;;  %v1324_v62 = vmul.bf16 %v2396_v14, %v2920_v6  ;;  %v1396_v24 = vadd.f32 %v1352_v60, %v1351_v57  ;;  %v1393_v14 = vadd.f32 %v1350_v8, %v1349_v63  ;;  %v1479_v57 = vunpack.c.l.bf16 %v1456_v35 }
 0x209   :  { %v1480_v60 = vunpack.c.h.bf16 %v1456_v35  ;;  %v1477_v63 = vunpack.c.l.bf16 %v1455_v23  ;;  %v1478_v8 = vunpack.c.h.bf16 %v1455_v23  ;;  %v1590_v23 = vmul.bf16 %v3089_v48, %v2871_v3 }
 0x20a   :  { %v1355_v25 = vunpack.c.l.bf16 %v1324_v62  ;;  %v1356_v38 = vunpack.c.h.bf16 %v1324_v62  ;;  %v1458_v62 = vmul.bf16 %v2398_v33, %v2901_v56 }
 0x20c   :  { %1367 = vadd.xlane.f32.xlu1 %v1366_v58  ;;  %1364 = vadd.xlane.f32.xlu0 %v1363_v59  ;;  %v1353_v58 = vunpack.c.l.bf16 %v1323_v9  ;;  %v1402_v59 = vadd.f32 %v1356_v38, %v1355_v25  ;;  %v1457_v9 = vmul.bf16 %v2397_v36, %v2903_v34  ;;  %v1483_v25 = vunpack.c.l.bf16 %v1458_v62 }
 0x20d   :  { %v1484_v38 = vunpack.c.h.bf16 %v1458_v62 }
 0x20e   :  { %v1482_v39 = vunpack.c.h.bf16 %v1457_v9 }
 0x20f   :  { %v1524_v4 = vadd.f32 %v1484_v38, %v1483_v25  ;;  %v1607_v38 = vunpack.c.l.bf16 %v1590_v23 }
 0x210   :  { %1373 = vadd.xlane.f32.xlu1 %v1372_v27  ;;  %1370 = vadd.xlane.f32.xlu0 %v1369_v16  ;;  %v1399_v27 = vadd.f32 %v1354_v1, %v1353_v58  ;;  %v2402_v16 = vld [vmem:[%s3461_s3 + $0x128] sm:$0xff]  ;;  %v1515_v58 = vadd.f32 %v1478_v8, %v1477_v63  ;;  %v1481_v1 = vunpack.c.l.bf16 %v1457_v9  ;;  %v3108_v8 = vld [vmem:[%s3461_s3 + $0x150] sm:$0xff] }
 0x211   :  { %v1454_v47 = vmul.bf16 %v2402_v16, %v2876_v5  ;;  %v1462_v36 = vmul.bf16 %v2402_v16, %v2914_v11 }
 0x212   :  { %v1521_v28 = vadd.f32 %v1482_v39, %v1481_v1 }
 0x213   :  { %v1475_v19 = vunpack.c.l.bf16 %v1454_v47  ;;  %v1476_v55 = vunpack.c.h.bf16 %v1454_v47  ;;  %v1491_v47 = vunpack.c.l.bf16 %v1462_v36 }
 0x214   :  { %1379 = vadd.xlane.f32.xlu1 %v1378_v50  ;;  %1376 = vadd.xlane.f32.xlu0 %v1375_v51  ;;  %v1472_v50 = vunpack.c.h.bf16 %v1452_v42  ;;  %v1470_v51 = vunpack.c.h.bf16 %v1451_v43  ;;  %v1488_v42 = vunpack.c.h.bf16 %v1460_v13  ;;  %v1608_v13 = vunpack.c.h.bf16 %v1590_v23 }
 0x215   :  { %v1598_v23 = vmul.bf16 %v3089_v48, %v2901_v56 }
 0x218   :  { %1385 = vadd.xlane.f32.xlu1 %v1384_v18  ;;  %1382 = vadd.xlane.f32.xlu0 %v1381_v45  ;;  %v1506_v18 = vadd.f32 %v1472_v50, %v1471_v49  ;;  %v1503_v45 = vadd.f32 %v1470_v51, %v1469_v21  ;;  %v1464_v50 = vmul.bf16 %v2404_v52, %v2920_v6  ;;  %v3094_v52 = vld [vmem:[%s3461_s3 + $0x140] sm:$0xff] }
 0x219   :  { %v1463_v21 = vmul.bf16 %v2403_v31, %v2922_v7  ;;  %v1589_v63 = vmul.bf16 %v3094_v52, %v2857_v26 }
 0x21b   :  { %v1605_v39 = vunpack.c.l.bf16 %v1589_v63 }
 0x21c   :  { %1391 = vadd.xlane.f32.xlu1 %v1390_v53  ;;  %1388 = vadd.xlane.f32.xlu0 %v1387_v54  ;;  %v1512_v53 = vadd.f32 %v1476_v55, %v1475_v19  ;;  %v1509_v54 = vadd.f32 %v1474_v32, %v1473_v22  ;;  %v1490_v19 = vunpack.c.h.bf16 %v1461_v0  ;;  %v1496_v22 = vunpack.c.h.bf16 %v1464_v50 }
 0x21d   :  { %v1493_v32 = vunpack.c.l.bf16 %v1463_v21 }
 0x220   :  { %1397 = vadd.xlane.f32.xlu1 %v1396_v24  ;;  %1394 = vadd.xlane.f32.xlu0 %v1393_v14  ;;  %v1518_v24 = vadd.f32 %v1480_v60, %v1479_v57 }
 0x224   :  { %1403 = vadd.xlane.f32.xlu1 %v1402_v59  ;;  %1400 = vadd.xlane.f32.xlu0 %v1399_v27  ;;  %v1459_v59 = vmul.bf16 %v2399_v2, %v2909_v61  ;;  %v1530_v2 = vadd.f32 %v1488_v42, %v1487_v15 }
 0x226   :  { %v1485_v29 = vunpack.c.l.bf16 %v1459_v59  ;;  %v1486_v43 = vunpack.c.h.bf16 %v1459_v59  ;;  %v1606_v59 = vunpack.c.h.bf16 %v1589_v63 }
 0x228   :  { %1501 = vadd.xlane.f32.xlu1 %v1500_v10  ;;  %1498 = vadd.xlane.f32.xlu0 %v1497_v20  ;;  %v1492_v20 = vunpack.c.h.bf16 %v1462_v36  ;;  %v1527_v17 = vadd.f32 %v1486_v43, %v1485_v29 }
 0x22a   :  { %v1536_v31 = vadd.f32 %v1492_v20, %v1491_v47 }
 0x22c   :  { %1507 = vadd.xlane.f32.xlu1 %v1506_v18  ;;  %1504 = vadd.xlane.f32.xlu0 %v1503_v45  ;;  %v1489_v18 = vunpack.c.l.bf16 %v1461_v0  ;;  %v1495_v45 = vunpack.c.l.bf16 %v1464_v50  ;;  %v3129_v0 = vld [vmem:[%s3461_s3 + $0x178] sm:$0xff] }
 0x22e   :  { %v1533_v62 = vadd.f32 %v1490_v19, %v1489_v18  ;;  %v1542_v25 = vadd.f32 %v1496_v22, %v1495_v45 }
 0x230   :  { %1513 = vadd.xlane.f32.xlu1 %v1512_v53  ;;  %1510 = vadd.xlane.f32.xlu0 %v1509_v54  ;;  %v3101_v53 = vld [vmem:[%s3461_s3 + $0x158] sm:$0xff]  ;;  %v1494_v54 = vunpack.c.h.bf16 %v1463_v21 }
 0x231   :  { %v944_v14 = vpop.xlane.xlu1 %943  ;;  %v938_v33 = vpop.xlane.xlu0 %937  ;;  %v1600_v48 = vmul.bf16 %v3101_v53, %v2907_v37 }
 0x232   :  { %v1539_v1 = vadd.f32 %v1494_v54, %v1493_v32 }
 0x234   :  { %1519 = vadd.xlane.f32.xlu1 %v1518_v24  ;;  %1516 = vadd.xlane.f32.xlu0 %v1515_v58  ;;  %v1592_v24 = vmul.bf16 %v3101_v53, %v2864_v41  ;;  %v3122_v41 = vld [vmem:[%s3461_s3 + $0x160] sm:$0xff] }
 0x235   :  { %v947_v27 = vpop.xlane.xlu1 %946  ;;  %v941_v10 = vpop.xlane.xlu0 %940  ;;  %v1593_v50 = vmul.bf16 %v3122_v41, %v2882_v44 }
 0x236   :  { %v984_v49 = vadd.f32 %v941_v10, %v938_v33  ;;  %v3117_v33 = vld [vmem:[%s3461_s3 + $0x168] sm:$0xff]  ;;  %v1612_v36 = vunpack.c.h.bf16 %v1592_v24 }
 0x237   :  { %v1594_v43 = vmul.bf16 %v3117_v33, %v2876_v5  ;;  %v1596_v5 = vmul.bf16 %v3129_v0, %v2887_v46  ;;  %v1614_v45 = vunpack.c.h.bf16 %v1593_v50 }
 0x238   :  { %1525 = vadd.xlane.f32.xlu1 %v1524_v4  ;;  %v985_v51 = vadd.f32 %v984_v49, %v944_v14  ;;  %1522 = vadd.xlane.f32.xlu0 %v1521_v28  ;;  %v1591_v14 = vmul.bf16 %v3108_v8, %v2850_v40  ;;  %v1611_v40 = vunpack.c.l.bf16 %v1592_v24  ;;  %v1637_v49 = vadd.f32 %v1606_v59, %v1605_v39 }
 0x239   :  { %v953_v16 = vpop.xlane.xlu1 %952  ;;  %v950_v55 = vpop.xlane.xlu0 %949  ;;  %v1619_v32 = vunpack.c.l.bf16 %v1596_v5 }
 0x23a   :  { %v986_v35 = vadd.f32 %v985_v51, %v947_v27  ;;  %v1640_v27 = vadd.f32 %v1608_v13, %v1607_v38  ;;  %v1609_v28 = vunpack.c.l.bf16 %v1591_v14  ;;  %v1610_v29 = vunpack.c.h.bf16 %v1591_v14 }
 0x23b   :  { %v1646_v21 = vadd.f32 %v1612_v36, %v1611_v40  ;;  %v1623_v38 = vunpack.c.l.bf16 %v1598_v23  ;;  %v1624_v13 = vunpack.c.h.bf16 %v1598_v23  ;;  %v1627_v36 = vunpack.c.l.bf16 %v1600_v48  ;;  %v3172_v23 = vld [vmem:[#allocation2] sm:$0xff] }
 0x23c   :  { %1531 = vadd.xlane.f32.xlu1 %v1530_v2  ;;  %v987_v57 = vadd.f32 %v986_v35, %v950_v55  ;;  %1528 = vadd.xlane.f32.xlu0 %v1527_v17  ;;  %v3136_v2 = vld [vmem:[%s3461_s3 + $0x170] sm:$0xff]  ;;  %v1643_v51 = vadd.f32 %v1610_v29, %v1609_v28  ;;  %v1616_v17 = vunpack.c.h.bf16 %v1594_v43  ;;  %v1613_v35 = vunpack.c.l.bf16 %v1593_v50 }
 0x23d   :  { %v959_v60 = vpop.xlane.xlu1 %958  ;;  %v956_v9 = vpop.xlane.xlu0 %955  ;;  %v1595_v18 = vmul.bf16 %v3136_v2, %v2893_v30  ;;  %v1664_v40 = vadd.f32 %v1624_v13, %v1623_v38  ;;  %v3189_v38 = vld [vmem:[#allocation2 + $0x18] sm:$0xff] }
 0x23e   :  { %v988_v3 = vadd.f32 %v987_v57, %v953_v16  ;;  %v1615_v16 = vunpack.c.l.bf16 %v1594_v43  ;;  %v1620_v57 = vunpack.c.h.bf16 %v1596_v5 }
 0x240   :  { %1537 = vadd.xlane.f32.xlu1 %v1536_v31  ;;  %v989_v58 = vadd.f32 %v988_v3, %v956_v9  ;;  %1534 = vadd.xlane.f32.xlu0 %v1533_v62  ;;  %v1652_v46 = vadd.f32 %v1616_v17, %v1615_v16  ;;  %v1618_v62 = vunpack.c.h.bf16 %v1595_v18  ;;  %v1649_v9 = vadd.f32 %v1614_v45, %v1613_v35 }
 0x241   :  { %v965_v26 = vpop.xlane.xlu1 %964  ;;  %v962_v4 = vpop.xlane.xlu0 %961  ;;  %v1597_v3 = vmul.bf16 %v3094_v52, %v2903_v34  ;;  %v1658_v14 = vadd.f32 %v1620_v57, %v1619_v32  ;;  %v1602_v52 = vmul.bf16 %v3117_v33, %v2914_v11  ;;  %v3179_v57 = vld [vmem:[%s3461_s3 + $0x198] sm:$0xff] }
 0x242   :  { %v990_v15 = vadd.f32 %v989_v58, %v959_v60  ;;  %v997_v42 = vadd.f32 %v965_v26, %v962_v4  ;;  %v1617_v60 = vunpack.c.l.bf16 %v1595_v18  ;;  %v1599_v58 = vmul.bf16 %v3108_v8, %v2909_v61 }
 0x243   :  { %v1621_v59 = vunpack.c.l.bf16 %v1597_v3  ;;  %v1622_v4 = vunpack.c.h.bf16 %v1597_v3  ;;  %v1601_v61 = vmul.bf16 %v3122_v41, %v2916_v12  ;;  %v1632_v50 = vunpack.c.h.bf16 %v1602_v52  ;;  %v3184_v3 = vld [vmem:[%s3461_s3 + $0x190] sm:$0xff] }
 0x244   :  { %1543 = vadd.xlane.f32.xlu1 %v1542_v25  ;;  %1540 = vadd.xlane.f32.xlu0 %v1539_v1  ;;  %v991_v19 = vrot.slane %v990_v15, 4  ;;  %v1655_v56 = vadd.f32 %v1618_v62, %v1617_v60  ;;  %v1625_v37 = vunpack.c.l.bf16 %v1599_v58  ;;  %v1626_v43 = vunpack.c.h.bf16 %v1599_v58 }
 0x245   :  { %v971_v10 = vpop.xlane.xlu1 %970  ;;  %v968_v47 = vpop.xlane.xlu0 %967  ;;  %v1661_v29 = vadd.f32 %v1622_v4, %v1621_v59  ;;  %v1630_v5 = vunpack.c.h.bf16 %v1601_v61  ;;  %v1603_v12 = vmul.bf16 %v3136_v2, %v2922_v7  ;;  %v1732_v13 = vmul.bf16 %v3189_v38, %v3179_v57  ;;  %v3193_v4 = vld [vmem:[#allocation2 + $0x10] sm:$0xff] }
 0x246   :  { %v998_v20 = vadd.f32 %v997_v42, %v968_v47  ;;  %v992_v54 = vadd.f32 %v991_v19, %v990_v15  ;;  %v1604_v47 = vmul.bf16 %v3129_v0, %v2920_v6  ;;  %v1667_v18 = vadd.f32 %v1626_v43, %v1625_v37  ;;  %v3161_v19 = vld [vmem:[%s3461_s3 + $0x188] sm:$0xff]  ;;  %v3166_v6 = vld [vmem:[%s3461_s3 + $0x180] sm:$0xff] }
 0x248   :  { %1641 = vadd.xlane.f32.xlu1 %v1640_v27  ;;  %1638 = vadd.xlane.f32.xlu0 %v1637_v49  ;;  %v999_v55 = vadd.f32 %v998_v20, %v971_v10  ;;  %v993_v26 = vrot.slane %v992_v54, 2  ;;  %v1628_v27 = vunpack.c.h.bf16 %v1600_v48  ;;  %v1631_v49 = vunpack.c.l.bf16 %v1602_v52  ;;  %v3200_v52 = vld [vmem:[%s3461_s3 + $0x1a8] sm:$0xff] }
 0x249   :  { %v977_v44 = vpop.xlane.xlu1 %976  ;;  %v974_v31 = vpop.xlane.xlu0 %973  ;;  %v1636_v35 = vunpack.c.h.bf16 %v1604_v47 }
 0x24a   :  { %v1000_v22 = vadd.f32 %v999_v55, %v974_v31  ;;  %v994_v53 = vadd.f32 %v993_v26, %v992_v54  ;;  %v1670_v20 = vadd.f32 %v1628_v27, %v1627_v36  ;;  %v1635_v55 = vunpack.c.l.bf16 %v1604_v47 }
 0x24b   :  { %v1633_v31 = vunpack.c.l.bf16 %v1603_v12  ;;  %v1751_v36 = vunpack.c.l.bf16 %v1732_v13  ;;  %v1752_v27 = vunpack.c.h.bf16 %v1732_v13 }
 0x24c   :  { %1647 = vadd.xlane.f32.xlu1 %v1646_v21  ;;  %1644 = vadd.xlane.f32.xlu0 %v1643_v51  ;;  %v1001_v63 = vadd.f32 %v1000_v22, %v977_v44  ;;  %v1629_v21 = vunpack.c.l.bf16 %v1601_v61  ;;  %v995_v41 = vrot.slane %v994_v53, 1  ;;  %v1676_v44 = vadd.f32 %v1632_v50, %v1631_v49  ;;  %v3168_v22 = vld [vmem:[#allocation2 + $0x8] sm:$0xff] }
 0x24d   :  { %v983_v30 = vpop.xlane.xlu1 %982  ;;  %v980_v24 = vpop.xlane.xlu0 %979  ;;  %v1730_v32 = vmul.bf16 %v3168_v22, %v3161_v19  ;;  %v3207_v61 = vld [vmem:[#allocation2 + $0x28] sm:$0xff] }
 0x24e   :  { %v1002_v25 = vadd.f32 %v1001_v63, %v980_v24  ;;  %v1673_v45 = vadd.f32 %v1630_v5, %v1629_v21  ;;  %v996_v60 = vadd.f32 %v995_v41, %v994_v53  ;;  %v1634_v63 = vunpack.c.h.bf16 %v1603_v12  ;;  %v3225_v21 = vld [vmem:[#allocation2 + $0x38] sm:$0xff] }
 0x24f   :  { %v1748_v48 = vunpack.c.h.bf16 %v1730_v32  ;;  %v1734_v53 = vmul.bf16 %v3207_v61, %v3200_v52 }
 0x250   :  { %1653 = vadd.xlane.f32.xlu1 %v1652_v46  ;;  %v1003_v1 = vadd.f32 %v1002_v25, %v983_v30  ;;  %1650 = vadd.xlane.f32.xlu0 %v1649_v9  ;;  %v1729_v46 = vmul.bf16 %v3172_v23, %v3166_v6 }
 0x251   :  { %v1082_v39 = vpop.xlane.xlu1 %1081  ;;  %v1079_v34 = vpop.xlane.xlu0 %1078  ;;  %v1755_v12 = vunpack.c.l.bf16 %v1734_v53  ;;  %v1756_v41 = vunpack.c.h.bf16 %v1734_v53 }
 0x252   :  { %v1004_v15 = vrot.slane %v1003_v1, 4  ;;  %v1125_v42 = vadd.f32 %v1082_v39, %v1079_v34  ;;  %v1745_v58 = vunpack.c.l.bf16 %v1729_v46  ;;  %v1679_v39 = vadd.f32 %v1634_v63, %v1633_v31 }
 0x253   :  { %v1746_v59 = vunpack.c.h.bf16 %v1729_v46  ;;  %v1731_v34 = vmul.bf16 %v3193_v4, %v3184_v3 }
 0x254   :  { %1659 = vadd.xlane.f32.xlu1 %v1658_v14  ;;  %v1005_v8 = vadd.f32 %v1004_v15, %v1003_v1  ;;  %1656 = vadd.xlane.f32.xlu0 %v1655_v56  ;;  %v1682_v14 = vadd.f32 %v1636_v35, %v1635_v55  ;;  %v1747_v56 = vunpack.c.l.bf16 %v1730_v32  ;;  %v3205_v15 = vld [vmem:[%s3461_s3 + $0x1a0] sm:$0xff]  ;;  %v3233_v35 = vld [vmem:[#allocation2 + $0x48] sm:$0xff] }
 0x255   :  { %v1088_v28 = vpop.xlane.xlu1 %1087  ;;  %v1085_v10 = vpop.xlane.xlu0 %1084  ;;  %v1749_v49 = vunpack.c.l.bf16 %v1731_v34  ;;  %v1750_v50 = vunpack.c.h.bf16 %v1731_v34 }
 0x256   :  { %v1006_v11 = vrot.slane %v1005_v8, 2  ;;  %v1126_v33 = vadd.f32 %v1125_v42, %v1085_v10  ;;  %v1780_v37 = vadd.f32 %v1748_v48, %v1747_v56  ;;  %v1777_v10 = vadd.f32 %v1746_v59, %v1745_v58 }
 0x257   :  { %v855_v48 = vlaneseq }
 0x258   :  { %1665 = vadd.xlane.f32.xlu1 %v1664_v40  ;;  %v1007_v51 = vadd.f32 %v1006_v11, %v1005_v8  ;;  %1662 = vadd.xlane.f32.xlu0 %v1661_v29  ;;  %v1127_v17 = vadd.f32 %v1126_v33, %v1088_v28  ;;  %v3211_v8 = vld [vmem:[#allocation2 + $0x20] sm:$0xff]  ;;  %v3218_v29 = vld [vmem:[%s3461_s3 + $0x1b8] sm:$0xff]  ;;  %v3223_v11 = vld [vmem:[%s3461_s3 + $0x1b0] sm:$0xff] }
 0x259   :  { %v1094_v16 = vpop.xlane.xlu1 %1093  ;;  %v1091_v0 = vpop.xlane.xlu0 %1090  ;;  %v1733_v28 = vmul.bf16 %v3211_v8, %v3205_v15  ;;  %v1736_v5 = vmul.bf16 %v3225_v21, %v3218_v29 }
 0x25a   :  { %v1008_v7 = vrot.slane %v1007_v51, 1  ;;  %v1128_v2 = vadd.f32 %v1127_v17, %v1091_v0 }
 0x25b   :  { %v1759_v32 = vunpack.c.l.bf16 %v1736_v5  ;;  %v1760_v46 = vunpack.c.h.bf16 %v1736_v5 }
 0x25c   :  { %1671 = vadd.xlane.f32.xlu1 %v1670_v20  ;;  %v1009_v62 = vadd.f32 %v1008_v7, %v1007_v51  ;;  %1668 = vadd.xlane.f32.xlu0 %v1667_v18  ;;  %v1129_v30 = vadd.f32 %v1128_v2, %v1094_v16  ;;  %v1786_v20 = vadd.f32 %v1752_v27, %v1751_v36  ;;  %v1753_v51 = vunpack.c.l.bf16 %v1733_v28  ;;  %v3229_v16 = vld [vmem:[#allocation2 + $0x30] sm:$0xff] }
 0x25d   :  { %v1100_v54 = vpop.xlane.xlu1 %1099  ;;  %v1097_v9 = vpop.xlane.xlu0 %1096  ;;  %v1735_v17 = vmul.bf16 %v3229_v16, %v3223_v11  ;;  %v1783_v7 = vadd.f32 %v1750_v50, %v1749_v49  ;;  %v1754_v2 = vunpack.c.h.bf16 %v1733_v28  ;;  %v1798_v58 = vadd.f32 %v1760_v46, %v1759_v32  ;;  %v3251_v28 = vld [vmem:[#allocation2 + $0x50] sm:$0xff] }
 0x25e   :  { %v3187_v24 = vsel %vm1015_vm4, %v1009_v62, %v996_v60  ;;  %v1130_v25 = vadd.f32 %v1129_v30, %v1097_v9  ;;  %v3237_v60 = vld [vmem:[#allocation2 + $0x40] sm:$0xff]  ;;  %v3256_v50 = vand.u32 127, %v855_v48 }
 0x25f   :  { %v1737_v62 = vmul.bf16 %v3237_v60, %v3166_v6  ;;  %v1757_v30 = vunpack.c.l.bf16 %v1735_v17  ;;  %v1789_v13 = vadd.f32 %v1754_v2, %v1753_v51 }
 0x260   :  { %1677 = vadd.xlane.f32.xlu1 %v1676_v44  ;;  %v1131_v26 = vadd.f32 %v1130_v25, %v1100_v54  ;;  %1674 = vadd.xlane.f32.xlu0 %v1673_v45  ;;  %v1738_v45 = vmul.bf16 %v3233_v35, %v3161_v19  ;;  %v1792_v54 = vadd.f32 %v1756_v41, %v1755_v12  ;;  %vm1010_vm5 = vcmp.eq.s32.totalorder %v3256_v50, 0 }
 0x261   :  { %v1106_v1 = vpop.xlane.xlu1 %1105  ;;  %v1103_v42 = vpop.xlane.xlu0 %1102  ;;  %v1761_v59 = vunpack.c.l.bf16 %v1737_v62  ;;  %v1762_v34 = vunpack.c.h.bf16 %v1737_v62  ;;  %vm1151_vm6 = vcmp.eq.s32.totalorder %v3256_v50, 1  ;;  %vm1291_vm7 = vcmp.eq.s32.totalorder %v3256_v50, 2 }
 0x262   :  { %v1138_v40 = vadd.f32 %v1106_v1, %v1103_v42  ;;  %v1132_v18 = vrot.slane %v1131_v26, 4  ;;  %v1763_v1 = vunpack.c.l.bf16 %v1738_v45  ;;  %v1764_v6 = vunpack.c.h.bf16 %v1738_v45  ;;  %v3244_v42 = vld [vmem:[#allocation2 + $0x58] sm:$0xff] }
 0x263   :  { %v1801_v5 = vadd.f32 %v1762_v34, %v1761_v59  ;;  %v2430_v59 = vld [vmem:[%s3461_s3 + $0x208] sm:$0xff]  ;;  %v2372_v34 = vld [vmem:[%s3462_s4] ss:$0 sm:$0xff]  ;;  %vm1431_vm8 = vcmp.eq.s32.totalorder %v3256_v50, 3  ;;  %vm1571_vm9 = vcmp.eq.s32.totalorder %v3256_v50, 4  ;;  %vm1711_vm10 = vcmp.eq.s32.totalorder %v3256_v50, 5 }
 0x264   :  { %1683 = vadd.xlane.f32.xlu1 %v1682_v14  ;;  %1680 = vadd.xlane.f32.xlu0 %v1679_v39  ;;  %v1133_v63 = vadd.f32 %v1132_v18, %v1131_v26  ;;  %v1758_v14 = vunpack.c.h.bf16 %v1735_v17  ;;  %v2422_v39 = vld [vmem:[%s3461_s3 + $0x1c8] sm:$0xff]  ;;  %v1740_v26 = vmul.bf16 %v3244_v42, %v3179_v57  ;;  %vm1851_vm11 = vcmp.eq.s32.totalorder %v3256_v50, 6 }
 0x265   :  { %v1112_v43 = vpop.xlane.xlu1 %1111  ;;  %v1109_v33 = vpop.xlane.xlu0 %1108  ;;  %v1870_v49 = vmul.bf16 %v3168_v22, %v2422_v39  ;;  %vm1991_vm12 = vcmp.eq.s32.totalorder %v3256_v50, 7  ;;  %vm2131_vm13 = vcmp.eq.s32.totalorder %v3256_v50, 8  ;;  %vm2271_vm14 = vcmp.eq.s32.totalorder %v3256_v50, 9 }
 0x266   :  { %v1139_v47 = vadd.f32 %v1138_v40, %v1109_v33  ;;  %v2421_v40 = vld [vmem:[%s3461_s3 + $0x1c0] sm:$0xff]  ;;  %v1134_v36 = vrot.slane %v1133_v63, 2  ;;  %v1795_v53 = vadd.f32 %v1758_v14, %v1757_v30  ;;  %v1767_v12 = vunpack.c.l.bf16 %v1740_v26  ;;  %v2423_v14 = vld [vmem:[%s3461_s3 + $0x1d0] sm:$0xff] }
 0x267   :  { %v1768_v41 = vunpack.c.h.bf16 %v1740_v26  ;;  %v1888_v2 = vunpack.c.h.bf16 %v1870_v49  ;;  %v1018_v26 = vsel %vm1010_vm5, %v3187_v24, 0.0  ;;  %v2010_v24 = vmul.bf16 %v3168_v22, %v2430_v59 }
 0x268   :  { %1781 = vadd.xlane.f32.xlu1 %v1780_v37  ;;  %1778 = vadd.xlane.f32.xlu0 %v1777_v10  ;;  %v1140_v44 = vadd.f32 %v1139_v47, %v1112_v43  ;;  %v1739_v43 = vmul.bf16 %v3251_v28, %v3184_v3  ;;  %v1869_v47 = vmul.bf16 %v3172_v23, %v2421_v40 }
 0x269   :  { %v1118_v0 = vpop.xlane.xlu1 %1117  ;;  %v1115_v55 = vpop.xlane.xlu0 %1114  ;;  %v1135_v51 = vadd.f32 %v1134_v36, %v1133_v63  ;;  %v1810_v62 = vadd.f32 %v1768_v41, %v1767_v12  ;;  %v1879_v36 = vmul.bf16 %v3251_v28, %v2423_v14 }
 0x26a   :  { %v1141_v31 = vadd.f32 %v1140_v44, %v1115_v55  ;;  %v1766_v3 = vunpack.c.h.bf16 %v1739_v43  ;;  %v1878_v55 = vmul.bf16 %v3233_v35, %v2422_v39  ;;  %v1885_v32 = vunpack.c.l.bf16 %v1869_v47 }
 0x26b   :  { %v1886_v46 = vunpack.c.h.bf16 %v1869_v47  ;;  %v1136_v30 = vrot.slane %v1135_v51, 1 }
 0x26c   :  { %1787 = vadd.xlane.f32.xlu1 %v1786_v20  ;;  %1784 = vadd.xlane.f32.xlu0 %v1783_v7  ;;  %v1142_v25 = vadd.f32 %v1141_v31, %v1118_v0  ;;  %v1804_v20 = vadd.f32 %v1764_v6, %v1763_v1  ;;  %v1765_v0 = vunpack.c.l.bf16 %v1739_v43  ;;  %v1887_v7 = vunpack.c.l.bf16 %v1870_v49 }
 0x26d   :  { %v1124_v9 = vpop.xlane.xlu1 %1123  ;;  %v1121_v56 = vpop.xlane.xlu0 %1120  ;;  %v1903_v48 = vunpack.c.l.bf16 %v1878_v55  ;;  %v1917_v6 = vadd.f32 %v1886_v46, %v1885_v32  ;;  %v2027_v32 = vunpack.c.l.bf16 %v2010_v24  ;;  %v2028_v46 = vunpack.c.h.bf16 %v2010_v24 }
 0x26e   :  { %v1143_v19 = vadd.f32 %v1142_v25, %v1121_v56  ;;  %v1920_v39 = vadd.f32 %v1888_v2, %v1887_v7 }
 0x270   :  { %1793 = vadd.xlane.f32.xlu1 %v1792_v54  ;;  %v1144_v27 = vadd.f32 %v1143_v19, %v1124_v9  ;;  %1790 = vadd.xlane.f32.xlu0 %v1789_v13  ;;  %v1877_v54 = vmul.bf16 %v3237_v60, %v2421_v40  ;;  %v1807_v13 = vadd.f32 %v1766_v3, %v1765_v0  ;;  %v1904_v19 = vunpack.c.h.bf16 %v1878_v55 }
 0x271   :  { %v1222_v37 = vpop.xlane.xlu1 %1221  ;;  %v1219_v10 = vpop.xlane.xlu0 %1218 }
 0x272   :  { %v1145_v57 = vrot.slane %v1144_v27, 4  ;;  %v1265_v33 = vadd.f32 %v1222_v37, %v1219_v10  ;;  %v1901_v40 = vunpack.c.l.bf16 %v1877_v54  ;;  %v2429_v37 = vld [vmem:[%s3461_s3 + $0x200] sm:$0xff]  ;;  %v1944_v47 = vadd.f32 %v1904_v19, %v1903_v48 }
 0x273   :  { %v2009_v41 = vmul.bf16 %v3172_v23, %v2429_v37  ;;  %v2060_v19 = vadd.f32 %v2028_v46, %v2027_v32 }
 0x274   :  { %1799 = vadd.xlane.f32.xlu1 %v1798_v58  ;;  %v1146_v17 = vadd.f32 %v1145_v57, %v1144_v27  ;;  %1796 = vadd.xlane.f32.xlu0 %v1795_v53  ;;  %v1871_v27 = vmul.bf16 %v3193_v4, %v2423_v14  ;;  %v1137_v53 = vadd.f32 %v1136_v30, %v1135_v51  ;;  %v1902_v57 = vunpack.c.h.bf16 %v1877_v54 }
 0x275   :  { %v1228_v18 = vpop.xlane.xlu1 %1227  ;;  %v1225_v44 = vpop.xlane.xlu0 %1224  ;;  %v1905_v51 = vunpack.c.l.bf16 %v1879_v36  ;;  %v2025_v54 = vunpack.c.l.bf16 %v2009_v41  ;;  %v2026_v30 = vunpack.c.h.bf16 %v2009_v41  ;;  %v2017_v14 = vmul.bf16 %v3237_v60, %v2429_v37 }
 0x276   :  { %v1147_v45 = vrot.slane %v1146_v17, 2  ;;  %v1266_v31 = vadd.f32 %v1265_v33, %v1225_v44  ;;  %v1889_v0 = vunpack.c.l.bf16 %v1871_v27  ;;  %v1941_v2 = vadd.f32 %v1902_v57, %v1901_v40 }
 0x277   :  { %v1890_v55 = vunpack.c.h.bf16 %v1871_v27  ;;  %v2041_v37 = vunpack.c.l.bf16 %v2017_v14 }
 0x278   :  { %1805 = vadd.xlane.f32.xlu1 %v1804_v20  ;;  %v1148_v63 = vadd.f32 %v1147_v45, %v1146_v17  ;;  %1802 = vadd.xlane.f32.xlu0 %v1801_v5  ;;  %v1267_v25 = vadd.f32 %v1266_v31, %v1228_v18  ;;  %v1019_v20 = vadd.f32 %v2372_v34, %v1018_v26  ;;  %v1906_v18 = vunpack.c.h.bf16 %v1879_v36  ;;  %v3293_v34 = vld [vmem:[#allocation2 + $0x60] sm:$0xff]  ;;  %v2431_v26 = vld [vmem:[%s3461_s3 + $0x210] sm:$0xff] }
 0x279   :  { %v1234_v9 = vpop.xlane.xlu1 %1233  ;;  %v1231_v56 = vpop.xlane.xlu0 %1230  ;;  %v2011_v57 = vmul.bf16 %v3193_v4, %v2431_v26 }
 0x27a   :  { %v1149_v58 = vrot.slane %v1148_v63, 1  ;;  %v1268_v1 = vadd.f32 %v1267_v25, %v1231_v56 }
 0x27c   :  { %1811 = vadd.xlane.f32.xlu1 %v1810_v62  ;;  %v1150_v43 = vadd.f32 %v1149_v58, %v1148_v63  ;;  %1808 = vadd.xlane.f32.xlu0 %v1807_v13  ;;  %v1269_v49 = vadd.f32 %v1268_v1, %v1234_v9  ;;  %v1947_v62 = vadd.f32 %v1906_v18, %v1905_v51  ;;  %v2424_v9 = vld [vmem:[%s3461_s3 + $0x1d8] sm:$0xff]  ;;  %v2437_v51 = vld [vmem:[%s3461_s3 + $0x240] sm:$0xff] }
 0x27d   :  { %v1240_v10 = vpop.xlane.xlu1 %1239  ;;  %v1237_v33 = vpop.xlane.xlu0 %1236  ;;  %v2018_v63 = vmul.bf16 %v3233_v35, %v2430_v59  ;;  %v1923_v13 = vadd.f32 %v1890_v55, %v1889_v0  ;;  %v1872_v58 = vmul.bf16 %v3189_v38, %v2424_v9  ;;  %v2057_v1 = vadd.f32 %v2026_v30, %v2025_v54 }
 0x27e   :  { %v1156_v5 = vsel %vm1015_vm4, %v1150_v43, %v1137_v53  ;;  %v1270_v12 = vadd.f32 %v1269_v49, %v1237_v33  ;;  %v1741_v59 = vmul.bf16 %v3293_v34, %v3205_v15  ;;  %v2042_v53 = vunpack.c.h.bf16 %v2017_v14 }
 0x27f   :  { %v1158_v17 = vsel %vm1151_vm6, %v1156_v5, 0.0  ;;  %v1891_v49 = vunpack.c.l.bf16 %v1872_v58 }
 0x280   :  { %1921 = vadd.xlane.f32.xlu1 %v1920_v39  ;;  %v3285_v3 = vadd.f32 %v1158_v17, %v1019_v20  ;;  %v1271_v44 = vadd.f32 %v1270_v12, %v1240_v10  ;;  %1918 = vadd.xlane.f32.xlu0 %v1917_v6  ;;  %v2043_v39 = vunpack.c.l.bf16 %v2018_v63  ;;  %v2044_v6 = vunpack.c.h.bf16 %v2018_v63  ;;  %v2438_v63 = vld [vmem:[%s3461_s3 + $0x248] sm:$0xff] }
 0x281   :  { %v1246_v7 = vpop.xlane.xlu1 %1245  ;;  %v1243_v45 = vpop.xlane.xlu0 %1242  ;;  %v1769_v24 = vunpack.c.l.bf16 %v1741_v59  ;;  %v1770_v15 = vunpack.c.h.bf16 %v1741_v59  ;;  %v2081_v41 = vadd.f32 %v2042_v53, %v2041_v37  ;;  %v1880_v17 = vmul.bf16 %v3244_v42, %v2424_v9 }
 0x282   :  { %v1278_v31 = vadd.f32 %v1246_v7, %v1243_v45  ;;  %v1272_v40 = vrot.slane %v1271_v44, 4  ;;  %v2084_v33 = vadd.f32 %v2044_v6, %v2043_v39  ;;  %v2029_v7 = vunpack.c.l.bf16 %v2011_v57 }
 0x283   :  { %v1813_v45 = vadd.f32 %v1770_v15, %v1769_v24  ;;  %v1907_v54 = vunpack.c.l.bf16 %v1880_v17  ;;  %v1908_v30 = vunpack.c.h.bf16 %v1880_v17 }
 0x284   :  { %1945 = vadd.xlane.f32.xlu1 %v1944_v47  ;;  %1942 = vadd.xlane.f32.xlu0 %v1941_v2  ;;  %v1892_v47 = vunpack.c.h.bf16 %v1872_v58  ;;  %v1273_v20 = vadd.f32 %v1272_v40, %v1271_v44  ;;  %v2030_v2 = vunpack.c.h.bf16 %v2011_v57  ;;  %v2019_v44 = vmul.bf16 %v3251_v28, %v2431_v26 }
 0x285   :  { %v1252_v25 = vpop.xlane.xlu1 %1251  ;;  %v1249_v56 = vpop.xlane.xlu0 %1248  ;;  %v2150_v58 = vmul.bf16 %v3168_v22, %v2438_v63  ;;  %v1950_v59 = vadd.f32 %v1908_v30, %v1907_v54  ;;  %v2158_v57 = vmul.bf16 %v3233_v35, %v2438_v63 }
 0x286   :  { %v1279_v48 = vadd.f32 %v1278_v31, %v1249_v56  ;;  %v1926_v55 = vadd.f32 %v1892_v47, %v1891_v49  ;;  %v2149_v31 = vmul.bf16 %v3172_v23, %v2437_v51  ;;  %v1274_v32 = vrot.slane %v1273_v20, 2 }
 0x287   :  { %v2063_v14 = vadd.f32 %v2030_v2, %v2029_v7  ;;  %v2157_v56 = vmul.bf16 %v3237_v60, %v2437_v51  ;;  %v2046_v26 = vunpack.c.h.bf16 %v2019_v44  ;;  %v2167_v49 = vunpack.c.l.bf16 %v2150_v58 }
 0x288   :  { %1948 = vadd.xlane.f32.xlu1 %v1947_v62  ;;  %1924 = vadd.xlane.f32.xlu0 %v1923_v13  ;;  %v1280_v27 = vadd.f32 %v1279_v48, %v1252_v25  ;;  %v2165_v23 = vunpack.c.l.bf16 %v2149_v31  ;;  %v2166_v48 = vunpack.c.h.bf16 %v2149_v31  ;;  %v2168_v22 = vunpack.c.h.bf16 %v2150_v58 }
 0x289   :  { %v1258_v36 = vpop.xlane.xlu1 %1257  ;;  %v1255_v43 = vpop.xlane.xlu0 %1254  ;;  %v2181_v53 = vunpack.c.l.bf16 %v2157_v56  ;;  %v2183_v7 = vunpack.c.l.bf16 %v2158_v57 }
 0x28a   :  { %v1281_v10 = vadd.f32 %v1280_v27, %v1255_v43  ;;  %v2182_v43 = vunpack.c.h.bf16 %v2157_v56 }
 0x28c   :  { %2061 = vadd.xlane.f32.xlu1 %v2060_v19  ;;  %2058 = vadd.xlane.f32.xlu0 %v2057_v1  ;;  %v1282_v12 = vadd.f32 %v1281_v10, %v1258_v36  ;;  %v2045_v19 = vunpack.c.l.bf16 %v2019_v44  ;;  %v1275_v1 = vadd.f32 %v1274_v32, %v1273_v20  ;;  %v3312_v36 = vld [vmem:[#allocation2 + $0x68] sm:$0xff]  ;;  %v2197_v10 = vadd.f32 %v2166_v48, %v2165_v23 }
 0x28d   :  { %v1264_v5 = vpop.xlane.xlu1 %1263  ;;  %v1261_v18 = vpop.xlane.xlu0 %1260  ;;  %v1742_v27 = vmul.bf16 %v3312_v36, %v3200_v52  ;;  %v2221_v35 = vadd.f32 %v2182_v43, %v2181_v53  ;;  %v2426_v43 = vld [vmem:[%s3461_s3 + $0x1e8] sm:$0xff] }
 0x28e   :  { %v1283_v0 = vadd.f32 %v1282_v12, %v1261_v18  ;;  %v1276_v47 = vrot.slane %v1275_v1, 1  ;;  %v2087_v52 = vadd.f32 %v2046_v26, %v2045_v19 }
 0x28f   :  { %v1771_v12 = vunpack.c.l.bf16 %v1742_v27 }
 0x290   :  { %2085 = vadd.xlane.f32.xlu1 %v2084_v33  ;;  %v1284_v46 = vadd.f32 %v1283_v0, %v1264_v5  ;;  %2082 = vadd.xlane.f32.xlu0 %v2081_v41  ;;  %v2425_v33 = vld [vmem:[%s3461_s3 + $0x1e0] sm:$0xff]  ;;  %v1772_v41 = vunpack.c.h.bf16 %v1742_v27  ;;  %v2200_v0 = vadd.f32 %v2168_v22, %v2167_v49 }
 0x291   :  { %v1362_v62 = vpop.xlane.xlu1 %1361  ;;  %v1359_v9 = vpop.xlane.xlu0 %1358  ;;  %v1881_v18 = vmul.bf16 %v3293_v34, %v2425_v33  ;;  %v1873_v2 = vmul.bf16 %v3211_v8, %v2425_v33 }
 0x292   :  { %v1285_v25 = vrot.slane %v1284_v46, 4  ;;  %v1405_v13 = vadd.f32 %v1362_v62, %v1359_v9  ;;  %v1816_v54 = vadd.f32 %v1772_v41, %v1771_v12 }
 0x293   :  { %v1909_v9 = vunpack.c.l.bf16 %v1881_v18  ;;  %v1893_v56 = vunpack.c.l.bf16 %v1873_v2  ;;  %v1894_v23 = vunpack.c.h.bf16 %v1873_v2 }
 0x294   :  { %1927 = vadd.xlane.f32.xlu1 %v1926_v55  ;;  %v1286_v39 = vadd.f32 %v1285_v25, %v1284_v46  ;;  %1814 = vadd.xlane.f32.xlu0 %v1813_v45  ;;  %v2432_v55 = vld [vmem:[%s3461_s3 + $0x218] sm:$0xff]  ;;  %v1277_v45 = vadd.f32 %v1276_v47, %v1275_v1  ;;  %v2184_v46 = vunpack.c.h.bf16 %v2158_v57 }
 0x295   :  { %v1368_v6 = vpop.xlane.xlu1 %1367  ;;  %v1365_v40 = vpop.xlane.xlu0 %1364  ;;  %v2020_v25 = vmul.bf16 %v3244_v42, %v2432_v55  ;;  %v2012_v1 = vmul.bf16 %v3189_v38, %v2432_v55  ;;  %v1929_v49 = vadd.f32 %v1894_v23, %v1893_v56 }
 0x296   :  { %v1287_v37 = vrot.slane %v1286_v39, 2  ;;  %v1406_v60 = vadd.f32 %v1405_v13, %v1365_v40  ;;  %v2224_v58 = vadd.f32 %v2184_v46, %v2183_v7 }
 0x297   :  { %v2047_v40 = vunpack.c.l.bf16 %v2020_v25  ;;  %v2048_v27 = vunpack.c.h.bf16 %v2020_v25  ;;  %v2031_v22 = vunpack.c.l.bf16 %v2012_v1 }
 0x298   :  { %2064 = vadd.xlane.f32.xlu1 %v2063_v14  ;;  %v1288_v24 = vadd.f32 %v1287_v37, %v1286_v39  ;;  %1951 = vadd.xlane.f32.xlu0 %v1950_v59  ;;  %v1407_v20 = vadd.f32 %v1406_v60, %v1368_v6  ;;  %v1910_v14 = vunpack.c.h.bf16 %v1881_v18  ;;  %v2439_v39 = vld [vmem:[%s3461_s3 + $0x250] sm:$0xff]  ;;  %v2433_v18 = vld [vmem:[%s3461_s3 + $0x220] sm:$0xff] }
 0x299   :  { %v1374_v15 = vpop.xlane.xlu1 %1373  ;;  %v1371_v5 = vpop.xlane.xlu0 %1370  ;;  %v2159_v60 = vmul.bf16 %v3251_v28, %v2439_v39  ;;  %v2151_v53 = vmul.bf16 %v3193_v4, %v2439_v39  ;;  %v2090_v47 = vadd.f32 %v2048_v27, %v2047_v40 }
 0x29a   :  { %v1289_v17 = vrot.slane %v1288_v24, 1  ;;  %v1408_v51 = vadd.f32 %v1407_v20, %v1371_v5  ;;  %v1953_v37 = vadd.f32 %v1910_v14, %v1909_v9 }
 0x29b   :  { %v2186_v20 = vunpack.c.h.bf16 %v2159_v60  ;;  %v2169_v28 = vunpack.c.l.bf16 %v2151_v53 }
 0x29c   :  { %2198 = vadd.xlane.f32.xlu1 %v2197_v10  ;;  %v1290_v31 = vadd.f32 %v1289_v17, %v1288_v24  ;;  %2088 = vadd.xlane.f32.xlu0 %v2087_v52  ;;  %v1409_v32 = vadd.f32 %v1408_v51, %v1374_v15  ;;  %v1874_v24 = vmul.bf16 %v3207_v61, %v2426_v43  ;;  %v2185_v15 = vunpack.c.l.bf16 %v2159_v60  ;;  %v3343_v17 = vld [vmem:[#allocation2 + $0x70] sm:$0xff] }
 0x29d   :  { %v1380_v44 = vpop.xlane.xlu1 %1379  ;;  %v1377_v62 = vpop.xlane.xlu0 %1376  ;;  %v2170_v52 = vunpack.c.h.bf16 %v2151_v53  ;;  %v1743_v51 = vmul.bf16 %v3343_v17, %v3223_v11 }
 0x29e   :  { %v1296_v30 = vsel %vm1015_vm4, %v1290_v31, %v1277_v45  ;;  %v1410_v63 = vadd.f32 %v1409_v32, %v1377_v62  ;;  %v1895_v7 = vunpack.c.l.bf16 %v1874_v24  ;;  %v1896_v2 = vunpack.c.h.bf16 %v1874_v24  ;;  %v2440_v32 = vld [vmem:[%s3461_s3 + $0x258] sm:$0xff] }
 0x29f   :  { %v1298_v13 = vsel %vm1291_vm7, %v1296_v30, 0.0  ;;  %v2227_v55 = vadd.f32 %v2186_v20, %v2185_v15  ;;  %v2203_v45 = vadd.f32 %v2170_v52, %v2169_v28  ;;  %v2013_v31 = vmul.bf16 %v3211_v8, %v2433_v18 }
 0x2a0   :  { %2222 = vadd.xlane.f32.xlu1 %v2221_v35  ;;  %v1411_v48 = vadd.f32 %v1410_v63, %v1380_v44  ;;  %2201 = vadd.xlane.f32.xlu0 %v2200_v0  ;;  %v3335_v6 = vadd.f32 %v1298_v13, %v3285_v3  ;;  %v2032_v3 = vunpack.c.h.bf16 %v2012_v1  ;;  %v1882_v44 = vmul.bf16 %v3312_v36, %v2426_v43 }
 0x2a1   :  { %v1386_v19 = vpop.xlane.xlu1 %1385  ;;  %v1383_v59 = vpop.xlane.xlu0 %1382  ;;  %v1774_v30 = vunpack.c.h.bf16 %v1743_v51  ;;  %v1932_v25 = vadd.f32 %v1896_v2, %v1895_v7  ;;  %v2152_v13 = vmul.bf16 %v3189_v38, %v2440_v32  ;;  %v2033_v14 = vunpack.c.l.bf16 %v2013_v31  ;;  %v2427_v38 = vld [vmem:[%s3461_s3 + $0x1f0] sm:$0xff]  ;;  %v2434_v2 = vld [vmem:[%s3461_s3 + $0x228] sm:$0xff] }
 0x2a2   :  { %v1418_v26 = vadd.f32 %v1386_v19, %v1383_v59  ;;  %v1412_v4 = vrot.slane %v1411_v48, 4  ;;  %v2066_v41 = vadd.f32 %v2032_v3, %v2031_v22  ;;  %v2034_v56 = vunpack.c.h.bf16 %v2013_v31 }
 0x2a3   :  { %v1911_v23 = vunpack.c.l.bf16 %v1882_v44  ;;  %v1912_v19 = vunpack.c.h.bf16 %v1882_v44  ;;  %v2021_v59 = vmul.bf16 %v3293_v34, %v2433_v18  ;;  %v2172_v60 = vunpack.c.h.bf16 %v2152_v13 }
 0x2a4   :  { %1817 = vadd.xlane.f32.xlu1 %v1816_v54  ;;  %2225 = vadd.xlane.f32.xlu0 %v2224_v58  ;;  %v1413_v11 = vadd.f32 %v1412_v4, %v1411_v48  ;;  %v1773_v54 = vunpack.c.l.bf16 %v1743_v51  ;;  %v2069_v53 = vadd.f32 %v2034_v56, %v2033_v14  ;;  %v2160_v22 = vmul.bf16 %v3244_v42, %v2440_v32 }
 0x2a5   :  { %v1392_v10 = vpop.xlane.xlu1 %1391  ;;  %v1389_v57 = vpop.xlane.xlu0 %1388  ;;  %v1956_v43 = vadd.f32 %v1912_v19, %v1911_v23  ;;  %v2050_v24 = vunpack.c.h.bf16 %v2021_v59  ;;  %v1883_v20 = vmul.bf16 %v3343_v17, %v2427_v38 }
 0x2a6   :  { %v1419_v33 = vadd.f32 %v1418_v26, %v1389_v57  ;;  %v1414_v58 = vrot.slane %v1413_v11, 2  ;;  %v1819_v48 = vadd.f32 %v1774_v30, %v1773_v54  ;;  %v2188_v51 = vunpack.c.h.bf16 %v2160_v22 }
 0x2a7   :  { %v1914_v31 = vunpack.c.h.bf16 %v1883_v20  ;;  %v2022_v30 = vmul.bf16 %v3312_v36, %v2434_v2 }
 0x2a8   :  { %1954 = vadd.xlane.f32.xlu1 %v1953_v37  ;;  %1930 = vadd.xlane.f32.xlu0 %v1929_v49  ;;  %v1420_v12 = vadd.f32 %v1419_v33, %v1392_v10  ;;  %v2171_v37 = vunpack.c.l.bf16 %v2152_v13  ;;  %v3360_v10 = vld [vmem:[#allocation2 + $0x78] sm:$0xff]  ;;  %v1415_v3 = vadd.f32 %v1414_v58, %v1413_v11 }
 0x2a9   :  { %v1398_v5 = vpop.xlane.xlu1 %1397  ;;  %v1395_v35 = vpop.xlane.xlu0 %1394  ;;  %v1744_v49 = vmul.bf16 %v3360_v10, %v3218_v29  ;;  %v2187_v29 = vunpack.c.l.bf16 %v2160_v22 }
 0x2aa   :  { %v1421_v0 = vadd.f32 %v1420_v12, %v1395_v35  ;;  %v2206_v4 = vadd.f32 %v2172_v60, %v2171_v37  ;;  %v1416_v42 = vrot.slane %v1415_v3, 1 }
 0x2ab   :  { %v1775_v12 = vunpack.c.l.bf16 %v1744_v49  ;;  %v2230_v54 = vadd.f32 %v2188_v51, %v2187_v29 }
 0x2ac   :  { %2091 = vadd.xlane.f32.xlu1 %v2090_v47  ;;  %2067 = vadd.xlane.f32.xlu0 %v2066_v41  ;;  %v1422_v62 = vadd.f32 %v1421_v0, %v1398_v5  ;;  %v2049_v47 = vunpack.c.l.bf16 %v2021_v59  ;;  %v1875_v5 = vmul.bf16 %v3229_v16, %v2427_v38  ;;  %v1776_v41 = vunpack.c.h.bf16 %v1744_v49 }
 0x2ad   :  { %v1404_v46 = vpop.xlane.xlu1 %1403  ;;  %v1401_v63 = vpop.xlane.xlu0 %1400  ;;  %v2051_v59 = vunpack.c.l.bf16 %v2022_v30 }
 0x2ae   :  { %v1423_v9 = vadd.f32 %v1422_v62, %v1401_v63  ;;  %v2093_v7 = vadd.f32 %v2050_v24, %v2049_v47  ;;  %v1897_v11 = vunpack.c.l.bf16 %v1875_v5  ;;  %v1822_v62 = vadd.f32 %v1776_v41, %v1775_v12 }
 0x2af   :  { %v2014_v63 = vmul.bf16 %v3207_v61, %v2434_v2 }
 0x2b0   :  { %2228 = vadd.xlane.f32.xlu1 %v2227_v55  ;;  %v1424_v1 = vadd.f32 %v1423_v9, %v1404_v46  ;;  %2204 = vadd.xlane.f32.xlu0 %v2203_v45  ;;  %v1913_v45 = vunpack.c.l.bf16 %v1883_v20  ;;  %v1898_v46 = vunpack.c.h.bf16 %v1875_v5  ;;  %v2441_v9 = vld [vmem:[%s3461_s3 + $0x260] sm:$0xff] }
 0x2b1   :  { %v1502_v39 = vpop.xlane.xlu1 %1501  ;;  %v1499_v26 = vpop.xlane.xlu0 %1498  ;;  %v2036_v38 = vunpack.c.h.bf16 %v2014_v63 }
 0x2b2   :  { %v1425_v40 = vrot.slane %v1424_v1, 4  ;;  %v1545_v27 = vadd.f32 %v1502_v39, %v1499_v26  ;;  %v1959_v19 = vadd.f32 %v1914_v31, %v1913_v45  ;;  %v1935_v39 = vadd.f32 %v1898_v46, %v1897_v11 }
 0x2b3   :  { %v2052_v26 = vunpack.c.h.bf16 %v2022_v30 }
 0x2b4   :  { %1933 = vadd.xlane.f32.xlu1 %v1932_v25  ;;  %v1426_v57 = vadd.f32 %v1425_v40, %v1424_v1  ;;  %1820 = vadd.xlane.f32.xlu0 %v1819_v48  ;;  %v1417_v25 = vadd.f32 %v1416_v42, %v1415_v3  ;;  %v2161_v48 = vmul.bf16 %v3293_v34, %v2441_v9  ;;  %v2035_v40 = vunpack.c.l.bf16 %v2014_v63 }
 0x2b5   :  { %v1508_v33 = vpop.xlane.xlu1 %1507  ;;  %v1505_v15 = vpop.xlane.xlu0 %1504 }
 0x2b6   :  { %v1427_v28 = vrot.slane %v1426_v57, 2  ;;  %v1546_v52 = vadd.f32 %v1545_v27, %v1505_v15  ;;  %v2189_v3 = vunpack.c.l.bf16 %v2161_v48  ;;  %v2072_v20 = vadd.f32 %v2036_v38, %v2035_v40 }
 0x2b8   :  { %2070 = vadd.xlane.f32.xlu1 %v2069_v53  ;;  %v1428_v18 = vadd.f32 %v1427_v28, %v1426_v57  ;;  %1957 = vadd.xlane.f32.xlu0 %v1956_v43  ;;  %v1547_v0 = vadd.f32 %v1546_v52, %v1508_v33  ;;  %v2153_v53 = vmul.bf16 %v3211_v8, %v2441_v9  ;;  %v2428_v43 = vld [vmem:[%s3461_s3 + $0x1f8] sm:$0xff]  ;;  %v2190_v57 = vunpack.c.h.bf16 %v2161_v48  ;;  %v2435_v8 = vld [vmem:[%s3461_s3 + $0x230] sm:$0xff] }
 0x2b9   :  { %v1514_v35 = vpop.xlane.xlu1 %1513  ;;  %v1511_v55 = vpop.xlane.xlu0 %1510  ;;  %v2096_v33 = vadd.f32 %v2052_v26, %v2051_v59  ;;  %v1884_v47 = vmul.bf16 %v3360_v10, %v2428_v43  ;;  %v1876_v24 = vmul.bf16 %v3225_v21, %v2428_v43  ;;  %v2023_v12 = vmul.bf16 %v3343_v17, %v2435_v8 }
 0x2ba   :  { %v1429_v44 = vrot.slane %v1428_v18, 1  ;;  %v1548_v32 = vadd.f32 %v1547_v0, %v1511_v55  ;;  %v2173_v28 = vunpack.c.l.bf16 %v2153_v53  ;;  %v2233_v5 = vadd.f32 %v2190_v57, %v2189_v3 }
 0x2bb   :  { %v1915_v41 = vunpack.c.l.bf16 %v1884_v47  ;;  %v1916_v29 = vunpack.c.h.bf16 %v1884_v47  ;;  %v1899_v51 = vunpack.c.l.bf16 %v1876_v24  ;;  %v1900_v42 = vunpack.c.h.bf16 %v1876_v24 }
 0x2bc   :  { %2207 = vadd.xlane.f32.xlu1 %v2206_v4  ;;  %v1430_v13 = vadd.f32 %v1429_v44, %v1428_v18  ;;  %2094 = vadd.xlane.f32.xlu0 %v2093_v7  ;;  %v1549_v56 = vadd.f32 %v1548_v32, %v1514_v35  ;;  %v2442_v18 = vld [vmem:[%s3461_s3 + $0x268] sm:$0xff]  ;;  %v2015_v55 = vmul.bf16 %v3229_v16, %v2435_v8  ;;  %v2053_v44 = vunpack.c.l.bf16 %v2023_v12 }
 0x2bd   :  { %v1520_v14 = vpop.xlane.xlu1 %1519  ;;  %v1517_v23 = vpop.xlane.xlu0 %1516  ;;  %v2054_v32 = vunpack.c.h.bf16 %v2023_v12  ;;  %v2162_v11 = vmul.bf16 %v3312_v36, %v2442_v18  ;;  %v1962_v46 = vadd.f32 %v1916_v29, %v1915_v41  ;;  %v2443_v36 = vld [vmem:[%s3461_s3 + $0x270] sm:$0xff] }
 0x2be   :  { %v1436_v58 = vsel %vm1015_vm4, %v1430_v13, %v1417_v25  ;;  %v1550_v1 = vadd.f32 %v1549_v56, %v1517_v23  ;;  %v2037_v25 = vunpack.c.l.bf16 %v2015_v55  ;;  %v2038_v13 = vunpack.c.h.bf16 %v2015_v55 }
 0x2bf   :  { %v1438_v27 = vsel %vm1431_vm8, %v1436_v58, 0.0  ;;  %v2191_v58 = vunpack.c.l.bf16 %v2162_v11  ;;  %v2163_v38 = vmul.bf16 %v3343_v17, %v2443_v36 }
 0x2c0   :  { %1823 = vadd.xlane.f32.xlu1 %v1822_v62  ;;  %v1551_v37 = vadd.f32 %v1550_v1, %v1520_v14  ;;  %2231 = vadd.xlane.f32.xlu0 %v2230_v54  ;;  %v3383_v49 = vadd.f32 %v1438_v27, %v3335_v6  ;;  %v2174_v6 = vunpack.c.h.bf16 %v2153_v53  ;;  %v1938_v62 = vadd.f32 %v1900_v42, %v1899_v51  ;;  %v2436_v14 = vld [vmem:[%s3461_s3 + $0x238] sm:$0xff] }
 0x2c1   :  { %v1526_v60 = vpop.xlane.xlu1 %1525  ;;  %v1523_v22 = vpop.xlane.xlu0 %1522  ;;  %v2154_v54 = vmul.bf16 %v3207_v61, %v2442_v18  ;;  %v2192_v61 = vunpack.c.h.bf16 %v2162_v11  ;;  %v2024_v48 = vmul.bf16 %v3360_v10, %v2436_v14  ;;  %v2075_v27 = vadd.f32 %v2038_v13, %v2037_v25 }
 0x2c2   :  { %v1558_v34 = vadd.f32 %v1526_v60, %v1523_v22  ;;  %v1552_v35 = vrot.slane %v1551_v37, 4  ;;  %v2209_v2 = vadd.f32 %v2174_v6, %v2173_v28  ;;  %v2155_v22 = vmul.bf16 %v3229_v16, %v2443_v36  ;;  %v2444_v28 = vld [vmem:[%s3461_s3 + $0x278] sm:$0xff]  ;;  %s2523_s3 = smov [#allocation4]  }
 0x2c3   :  { %v2175_v1 = vunpack.c.l.bf16 %v2154_v54  ;;  %v2055_v57 = vunpack.c.l.bf16 %v2024_v48  ;;  %v2193_v6 = vunpack.c.l.bf16 %v2163_v38  ;;  %v2164_v29 = vmul.bf16 %v3360_v10, %v2444_v28  ;;  %s2287_s24 = sshll.u32 %s2523_s3, 4  ;;  %s2288_s24 = int_to_ptr.vmem [resolvable:$true] %s2287_s24 }
 0x2c4   :  { %1960 = vadd.xlane.f32.xlu1 %v1959_v19  ;;  %1936 = vadd.xlane.f32.xlu0 %v1935_v39  ;;  %v1553_v30 = vadd.f32 %v1552_v35, %v1551_v37  ;;  %v2099_v19 = vadd.f32 %v2054_v32, %v2053_v44  ;;  %v2176_v39 = vunpack.c.h.bf16 %v2154_v54  ;;  %v2016_v37 = vmul.bf16 %v3225_v21, %v2436_v14  ;;  %s2488_s25 = scalar_lea.vmem %s2288_s24, 32  ;;  %p2493_p2 = scmp.lt.s32.totalorder %s2288_s24, %s2288_s24 }
 0x2c5   :  { %v1532_v15 = vpop.xlane.xlu1 %1531  ;;  %v1529_v52 = vpop.xlane.xlu0 %1528  ;;  %v2178_v12 = vunpack.c.h.bf16 %v2155_v22  ;;  %v2156_v51 = vmul.bf16 %v3225_v21, %v2444_v28  ;;  %v2195_v32 = vunpack.c.l.bf16 %v2164_v29  ;;  %v2196_v11 = vunpack.c.h.bf16 %v2164_v29  ;;  %p2489_p1 = scmp.ne.s32.totalorder %s2288_s24, %s2488_s25  ;;  %p2494_p3 = scmp.lt.s32.totalorder %s2488_s25, %s2488_s25 }
 0x2c6   :  { %v1559_v4 = vadd.f32 %v1558_v34, %v1529_v52  ;;  %v1554_v59 = vrot.slane %v1553_v30, 2  ;;  %v2236_v34 = vadd.f32 %v2192_v61, %v2191_v58  ;;  %v2212_v3 = vadd.f32 %v2176_v39, %v2175_v1 }
 0x2c7   :  { %v2194_v52 = vunpack.c.h.bf16 %v2163_v38  ;;  %v2242_v13 = vadd.f32 %v2196_v11, %v2195_v32  ;;  %p2495_p4 = por %p2494_p3, %p2493_p2 }
 0x2c8   :  { %2097 = vadd.xlane.f32.xlu1 %v2096_v33  ;;  %2073 = vadd.xlane.f32.xlu0 %v2072_v20  ;;  %v1560_v7 = vadd.f32 %v1559_v4, %v1532_v15  ;;  %v2056_v33 = vunpack.c.h.bf16 %v2024_v48  ;;  %v1555_v47 = vadd.f32 %v1554_v59, %v1553_v30  ;;  %v2039_v15 = vunpack.c.l.bf16 %v2016_v37 }
 0x2c9   :  { %v1538_v0 = vpop.xlane.xlu1 %1537  ;;  %v1535_v45 = vpop.xlane.xlu0 %1534  ;;  %v2040_v20 = vunpack.c.h.bf16 %v2016_v37  ;;  %v2180_v30 = vunpack.c.h.bf16 %v2156_v51  ;;  %p2496_p5 = pnand %p2495_p4, %p2489_p1 }
 0x2ca   :  { %v1561_v31 = vadd.f32 %v1560_v7, %v1535_v45  ;;  %v2102_v41 = vadd.f32 %v2056_v33, %v2055_v57  ;;  %v1556_v42 = vrot.slane %v1555_v47, 1 }
 0x2cb   :  { %v2078_v7 = vadd.f32 %v2040_v20, %v2039_v15 }
 0x2cc   :  { %2234 = vadd.xlane.f32.xlu1 %v2233_v5  ;;  %2210 = vadd.xlane.f32.xlu0 %v2209_v2  ;;  %v1562_v9 = vadd.f32 %v1561_v31, %v1538_v0  ;;  %v2177_v5 = vunpack.c.l.bf16 %v2155_v22  ;;  %v2239_v31 = vadd.f32 %v2194_v52, %v2193_v6  ;;  %v1557_v10 = vadd.f32 %v1556_v42, %v1555_v47 }
 0x2cd   :  { %v1544_v63 = vpop.xlane.xlu1 %1543  ;;  %v1541_v56 = vpop.xlane.xlu0 %1540 }
 0x2ce   :  { %v1563_v23 = vadd.f32 %v1562_v9, %v1541_v56  ;;  %v2215_v44 = vadd.f32 %v2178_v12, %v2177_v5 }
 0x2d0   :  { %1963 = vadd.xlane.f32.xlu1 %v1962_v46  ;;  %v1564_v26 = vadd.f32 %v1563_v23, %v1544_v63  ;;  %1939 = vadd.xlane.f32.xlu0 %v1938_v62  ;;  %v2179_v46 = vunpack.c.l.bf16 %v2156_v51 }
 0x2d1   :  { %v1642_v40 = vpop.xlane.xlu1 %1641  ;;  %v1639_v60 = vpop.xlane.xlu0 %1638 }
 0x2d2   :  { %v1565_v53 = vrot.slane %v1564_v26, 4  ;;  %v1685_v43 = vadd.f32 %v1642_v40, %v1639_v60 }
 0x2d4   :  { %2100 = vadd.xlane.f32.xlu1 %v2099_v19  ;;  %v1566_v24 = vadd.f32 %v1565_v53, %v1564_v26  ;;  %2076 = vadd.xlane.f32.xlu0 %v2075_v27  ;;  %v2218_v19 = vadd.f32 %v2180_v30, %v2179_v46 }
 0x2d5   :  { %v1648_v8 = vpop.xlane.xlu1 %1647  ;;  %v1645_v17 = vpop.xlane.xlu0 %1644 }
 0x2d6   :  { %v1567_v4 = vrot.slane %v1566_v24, 2  ;;  %v1686_v16 = vadd.f32 %v1685_v43, %v1645_v17 }
 0x2d8   :  { %2237 = vadd.xlane.f32.xlu1 %v2236_v34  ;;  %v1568_v18 = vadd.f32 %v1567_v4, %v1566_v24  ;;  %2213 = vadd.xlane.f32.xlu0 %v2212_v3  ;;  %v1687_v0 = vadd.f32 %v1686_v16, %v1648_v8 }
 0x2d9   :  { %v1654_v35 = vpop.xlane.xlu1 %1653  ;;  %v1651_v2 = vpop.xlane.xlu0 %1650 }
 0x2da   :  { %v1569_v55 = vrot.slane %v1568_v18, 1  ;;  %v1688_v45 = vadd.f32 %v1687_v0, %v1651_v2 }
 0x2dc   :  { %2103 = vadd.xlane.f32.xlu1 %v2102_v41  ;;  %v1570_v62 = vadd.f32 %v1569_v55, %v1568_v18  ;;  %2079 = vadd.xlane.f32.xlu0 %v2078_v7  ;;  %v1689_v54 = vadd.f32 %v1688_v45, %v1654_v35 }
 0x2dd   :  { %v1660_v21 = vpop.xlane.xlu1 %1659  ;;  %v1657_v63 = vpop.xlane.xlu0 %1656 }
 0x2de   :  { %v1690_v9 = vadd.f32 %v1689_v54, %v1657_v63  ;;  %v1576_v25 = vsel %vm1015_vm4, %v1570_v62, %v1557_v10 }
 0x2df   :  { %v1578_v14 = vsel %vm1571_vm9, %v1576_v25, 0.0 }
 0x2e0   :  { %2240 = vadd.xlane.f32.xlu1 %v2239_v31  ;;  %v1691_v56 = vadd.f32 %v1690_v9, %v1660_v21  ;;  %2216 = vadd.xlane.f32.xlu0 %v2215_v44  ;;  %v1579_v58 = vadd.f32 %v1578_v14, %v3383_v49 }
 0x2e1   :  { %v1666_v23 = vpop.xlane.xlu1 %1665  ;;  %v1663_v36 = vpop.xlane.xlu0 %1662 }
 0x2e2   :  { %v1698_v61 = vadd.f32 %v1666_v23, %v1663_v36  ;;  %v1692_v59 = vrot.slane %v1691_v56, 4 }
 0x2e4   :  { %2243 = vadd.xlane.f32.xlu1 %v2242_v13  ;;  %2219 = vadd.xlane.f32.xlu0 %v2218_v19  ;;  %v1693_v60 = vadd.f32 %v1692_v59, %v1691_v56 }
 0x2e5   :  { %v1672_v1 = vpop.xlane.xlu1 %1671  ;;  %v1669_v39 = vpop.xlane.xlu0 %1668 }
 0x2e6   :  { %v1699_v48 = vadd.f32 %v1698_v61, %v1669_v39  ;;  %v1694_v34 = vrot.slane %v1693_v60, 2 }
 0x2e8   :  { %v1700_v40 = vadd.f32 %v1699_v48, %v1672_v1  ;;  %v1695_v24 = vadd.f32 %v1694_v34, %v1693_v60 }
 0x2e9   :  { %v1678_v26 = vpop.xlane.xlu1 %1677  ;;  %v1675_v27 = vpop.xlane.xlu0 %1674 }
 0x2ea   :  { %v1701_v37 = vadd.f32 %v1700_v40, %v1675_v27  ;;  %v1696_v6 = vrot.slane %v1695_v24, 1 }
 0x2ec   :  { %v1702_v53 = vadd.f32 %v1701_v37, %v1678_v26  ;;  %v1697_v29 = vadd.f32 %v1696_v6, %v1695_v24 }
 0x2ed   :  { %v1684_v38 = vpop.xlane.xlu1 %1683  ;;  %v1681_v43 = vpop.xlane.xlu0 %1680 }
 0x2ee   :  { %v1703_v22 = vadd.f32 %v1702_v53, %v1681_v43 }
 0x2f0   :  { %v1704_v3 = vadd.f32 %v1703_v22, %v1684_v38 }
 0x2f1   :  { %v1782_v49 = vpop.xlane.xlu1 %1781  ;;  %v1779_v57 = vpop.xlane.xlu0 %1778 }
 0x2f2   :  { %v1705_v33 = vrot.slane %v1704_v3, 4  ;;  %v1825_v47 = vadd.f32 %v1782_v49, %v1779_v57 }
 0x2f4   :  { %v1706_v8 = vadd.f32 %v1705_v33, %v1704_v3 }
 0x2f5   :  { %v1788_v15 = vpop.xlane.xlu1 %1787  ;;  %v1785_v20 = vpop.xlane.xlu0 %1784 }
 0x2f6   :  { %v1707_v28 = vrot.slane %v1706_v8, 2  ;;  %v1826_v17 = vadd.f32 %v1825_v47, %v1785_v20 }
 0x2f8   :  { %v1708_v52 = vadd.f32 %v1707_v28, %v1706_v8  ;;  %v1827_v16 = vadd.f32 %v1826_v17, %v1788_v15 }
 0x2f9   :  { %v1794_v4 = vpop.xlane.xlu1 %1793  ;;  %v1791_v5 = vpop.xlane.xlu0 %1790 }
 0x2fa   :  { %v1709_v12 = vrot.slane %v1708_v52, 1  ;;  %v1828_v41 = vadd.f32 %v1827_v16, %v1791_v5 }
 0x2fc   :  { %v1710_v51 = vadd.f32 %v1709_v12, %v1708_v52  ;;  %v1829_v18 = vadd.f32 %v1828_v41, %v1794_v4 }
 0x2fd   :  { %v1800_v42 = vpop.xlane.xlu1 %1799  ;;  %v1797_v35 = vpop.xlane.xlu0 %1796 }
 0x2fe   :  { %v1830_v0 = vadd.f32 %v1829_v18, %v1797_v35  ;;  %v1716_v7 = vsel %vm1015_vm4, %v1710_v51, %v1697_v29 }
 0x2ff   :  { %v1718_v2 = vsel %vm1711_vm10, %v1716_v7, 0.0 }
 0x300   :  { %v1831_v55 = vadd.f32 %v1830_v0, %v1800_v42  ;;  %v3417_v31 = vadd.f32 %v1718_v2, %v1579_v58 }
 0x301   :  { %v1806_v45 = vpop.xlane.xlu1 %1805  ;;  %v1803_v44 = vpop.xlane.xlu0 %1802 }
 0x302   :  { %v1838_v32 = vadd.f32 %v1806_v45, %v1803_v44  ;;  %v1832_v6 = vrot.slane %v1831_v55, 4 }
 0x304   :  { %v1833_v16 = vadd.f32 %v1832_v6, %v1831_v55 }
 0x305   :  { %v1812_v11 = vpop.xlane.xlu1 %1811  ;;  %v1809_v46 = vpop.xlane.xlu0 %1808 }
 0x306   :  { %v1839_v10 = vadd.f32 %v1838_v32, %v1809_v46  ;;  %v1834_v51 = vrot.slane %v1833_v16, 2 }
 0x308   :  { %v1840_v21 = vadd.f32 %v1839_v10, %v1812_v11  ;;  %v1835_v7 = vadd.f32 %v1834_v51, %v1833_v16 }
 0x309   :  { %v1922_v62 = vpop.xlane.xlu1 %1921  ;;  %v1919_v54 = vpop.xlane.xlu0 %1918 }
 0x30a   :  { %v1965_v30 = vadd.f32 %v1922_v62, %v1919_v54  ;;  %v1836_v11 = vrot.slane %v1835_v7, 1 }
 0x30d   :  { %v1946_v63 = vpop.xlane.xlu1 %1945  ;;  %v1943_v9 = vpop.xlane.xlu0 %1942 }
 0x30e   :  { %v1978_v25 = vadd.f32 %v1946_v63, %v1943_v9 }
 0x311   :  { %v1949_v13 = vpop.xlane.xlu1 %1948  ;;  %v1925_v56 = vpop.xlane.xlu0 %1924 }
 0x312   :  { %v1979_v14 = vadd.f32 %v1978_v25, %v1949_v13  ;;  %v1966_v23 = vadd.f32 %v1965_v30, %v1925_v56  ;;  %v1837_v30 = vadd.f32 %v1836_v11, %v1835_v7 }
 0x315   :  { %v2062_v19 = vpop.xlane.xlu1 %2061  ;;  %v2059_v36 = vpop.xlane.xlu0 %2058 }
 0x316   :  { %v2105_v58 = vadd.f32 %v2062_v19, %v2059_v36 }
 0x319   :  { %v2086_v61 = vpop.xlane.xlu1 %2085  ;;  %v2083_v1 = vpop.xlane.xlu0 %2082 }
 0x31a   :  { %v3419_v39 = vadd.f32 %v2086_v61, %v2083_v1 }
 0x31d   :  { %v1928_v48 = vpop.xlane.xlu1 %1927  ;;  %v1815_v26 = vpop.xlane.xlu0 %1814 }
 0x31e   :  { %v1967_v59 = vadd.f32 %v1966_v23, %v1928_v48  ;;  %v1841_v40 = vadd.f32 %v1840_v21, %v1815_v26 }
 0x321   :  { %v2065_v27 = vpop.xlane.xlu1 %2064  ;;  %v1952_v60 = vpop.xlane.xlu0 %1951 }
 0x322   :  { %v3421_v37 = vadd.f32 %v2105_v58, %v2065_v27  ;;  %v1980_v38 = vadd.f32 %v1979_v14, %v1952_v60 }
 0x325   :  { %v3423_v53 = vpop.xlane.xlu1 %2198  ;;  %v2089_v43 = vpop.xlane.xlu0 %2088 }
 0x329   :  { %v3425_v22 = vpop.xlane.xlu1 %2222  ;;  %v3427_v34 = vpop.xlane.xlu0 %2201 }
 0x32d   :  { %v1818_v3 = vpop.xlane.xlu1 %1817  ;;  %v3429_v49 = vpop.xlane.xlu0 %2225 }
 0x32e   :  { %v1842_v5 = vadd.f32 %v1841_v40, %v1818_v3 }
 0x331   :  { %v1955_v57 = vpop.xlane.xlu1 %1954  ;;  %v1931_v33 = vpop.xlane.xlu0 %1930 }
 0x332   :  { %v1981_v62 = vadd.f32 %v1980_v38, %v1955_v57  ;;  %v1968_v55 = vadd.f32 %v1967_v59, %v1931_v33  ;;  %v2119_v59 = vadd.f32 %v3419_v39, %v2089_v43  ;;  %v2245_v43 = vadd.f32 %v3427_v34, %v3423_v53 }
 0x335   :  { %v2092_v47 = vpop.xlane.xlu1 %2091  ;;  %v2068_v24 = vpop.xlane.xlu0 %2067 }
 0x336   :  { %v2120_v60 = vadd.f32 %v2119_v59, %v2092_v47  ;;  %v2107_v57 = vadd.f32 %v3421_v37, %v2068_v24 }
 0x339   :  { %v3431_v8 = vpop.xlane.xlu1 %2228  ;;  %v3433_v15 = vpop.xlane.xlu0 %2204 }
 0x33d   :  { %v1934_v20 = vpop.xlane.xlu1 %1933  ;;  %v1821_v28 = vpop.xlane.xlu0 %1820 }
 0x33e   :  { %v1843_v41 = vadd.f32 %v1842_v5, %v1821_v28  ;;  %v1969_v13 = vadd.f32 %v1968_v55, %v1934_v20 }
 0x341   :  { %v2071_v17 = vpop.xlane.xlu1 %2070  ;;  %v1958_v52 = vpop.xlane.xlu0 %1957 }
 0x342   :  { %v1982_v63 = vadd.f32 %v1981_v62, %v1958_v52  ;;  %v2108_v6 = vadd.f32 %v2107_v57, %v2071_v17 }
 0x345   :  { %v3435_v4 = vpop.xlane.xlu1 %2207  ;;  %v2095_v12 = vpop.xlane.xlu0 %2094 }
 0x346   :  { %v2121_v20 = vadd.f32 %v2120_v60, %v2095_v12  ;;  %v2246_v12 = vadd.f32 %v2245_v43, %v3433_v15 }
 0x349   :  { %v1824_v29 = vpop.xlane.xlu1 %1823  ;;  %v2232_v18 = vpop.xlane.xlu0 %2231 }
 0x34a   :  { %v1844_v42 = vadd.f32 %v1843_v41, %v1824_v29 }
 0x34c   :  { %v1845_v35 = vrot.slane %v1844_v42, 4 }
 0x34d   :  { %v1961_v0 = vpop.xlane.xlu1 %1960  ;;  %v1937_v45 = vpop.xlane.xlu0 %1936 }
 0x34e   :  { %v1846_v2 = vadd.f32 %v1845_v35, %v1844_v42  ;;  %v1983_v14 = vadd.f32 %v1982_v63, %v1961_v0  ;;  %v1970_v23 = vadd.f32 %v1969_v13, %v1937_v45 }
 0x350   :  { %v1847_v44 = vrot.slane %v1846_v2, 2 }
 0x351   :  { %v2098_v32 = vpop.xlane.xlu1 %2097  ;;  %v2074_v10 = vpop.xlane.xlu0 %2073 }
 0x352   :  { %v1848_v46 = vadd.f32 %v1847_v44, %v1846_v2  ;;  %v2122_v5 = vadd.f32 %v2121_v20, %v2098_v32  ;;  %v2109_v47 = vadd.f32 %v2108_v6, %v2074_v10  ;;  %v2247_v2 = vadd.f32 %v2246_v12, %v3435_v4 }
 0x354   :  { %v1849_v21 = vrot.slane %v1848_v46, 1 }
 0x355   :  { %v2235_v54 = vpop.xlane.xlu1 %2234  ;;  %v2211_v25 = vpop.xlane.xlu0 %2210 }
 0x356   :  { %v1850_v9 = vadd.f32 %v1849_v21, %v1848_v46 }
 0x358   :  { %v1856_v56 = vsel %vm1015_vm4, %v1850_v9, %v1837_v30 }
 0x359   :  { %v1964_v19 = vpop.xlane.xlu1 %1963  ;;  %v1858_v36 = vsel %vm1851_vm11, %v1856_v56, 0.0  ;;  %v1940_v61 = vpop.xlane.xlu0 %1939 }
 0x35a   :  { %v1984_v58 = vadd.f32 %v1983_v14, %v1964_v19  ;;  %v1859_v1 = vadd.f32 %v1858_v36, %v3417_v31  ;;  %v1971_v48 = vadd.f32 %v1970_v23, %v1940_v61  ;;  %v2258_v31 = vadd.f32 %v3429_v49, %v3425_v22 }
 0x35c   :  { %v1985_v26 = vrot.slane %v1984_v58, 4  ;;  %v1972_v40 = vrot.slane %v1971_v48, 4  ;;  %v2259_v51 = vadd.f32 %v2258_v31, %v3431_v8  ;;  %v2248_v8 = vadd.f32 %v2247_v2, %v2211_v25 }
 0x35d   :  { %v2101_v27 = vpop.xlane.xlu1 %2100  ;;  %v2077_v3 = vpop.xlane.xlu0 %2076 }
 0x35e   :  { %v1986_v38 = vadd.f32 %v1985_v26, %v1984_v58  ;;  %v1973_v33 = vadd.f32 %v1972_v40, %v1971_v48  ;;  %v2123_v24 = vadd.f32 %v2122_v5, %v2101_v27  ;;  %v2110_v42 = vadd.f32 %v2109_v47, %v2077_v3 }
 0x35f   :  { %v2260_v0 = vadd.f32 %v2259_v51, %v2232_v18 }
 0x360   :  { %v1987_v28 = vrot.slane %v1986_v38, 2  ;;  %v1974_v52 = vrot.slane %v1973_v33, 2 }
 0x361   :  { %v2238_v16 = vpop.xlane.xlu1 %2237  ;;  %v2214_v39 = vpop.xlane.xlu0 %2213  ;;  %v2261_v53 = vadd.f32 %v2260_v0, %v2235_v54 }
 0x362   :  { %v1988_v41 = vadd.f32 %v1987_v28, %v1986_v38  ;;  %v1975_v29 = vadd.f32 %v1974_v52, %v1973_v33  ;;  %v2249_v21 = vadd.f32 %v2248_v8, %v2214_v39 }
 0x363   :  { %v2262_v46 = vadd.f32 %v2261_v53, %v2238_v16 }
 0x364   :  { %v1989_v37 = vrot.slane %v1988_v41, 1  ;;  %v1976_v17 = vrot.slane %v1975_v29, 1 }
 0x365   :  { %v2104_v35 = vpop.xlane.xlu1 %2103  ;;  %v2080_v49 = vpop.xlane.xlu0 %2079 }
 0x366   :  { %v1990_v7 = vadd.f32 %v1989_v37, %v1988_v41  ;;  %v2124_v22 = vadd.f32 %v2123_v24, %v2104_v35  ;;  %v1977_v45 = vadd.f32 %v1976_v17, %v1975_v29  ;;  %v2111_v44 = vadd.f32 %v2110_v42, %v2080_v49 }
 0x368   :  { %v2125_v34 = vrot.slane %v2124_v22, 4  ;;  %v2112_v32 = vrot.slane %v2111_v44, 4  ;;  %v1996_v15 = vsel %vm1015_vm4, %v1990_v7, %v1977_v45 }
 0x369   :  { %v2241_v11 = vpop.xlane.xlu1 %2240  ;;  %v2217_v62 = vpop.xlane.xlu0 %2216  ;;  %v1998_v18 = vsel %vm1991_vm12, %v1996_v15, 0.0 }
 0x36a   :  { %v2126_v10 = vadd.f32 %v2125_v34, %v2124_v22  ;;  %v2113_v55 = vadd.f32 %v2112_v32, %v2111_v44  ;;  %v1999_v30 = vadd.f32 %v1998_v18, %v1859_v1  ;;  %v2263_v4 = vadd.f32 %v2262_v46, %v2241_v11 }
 0x36b   :  { %v2250_v13 = vadd.f32 %v2249_v21, %v2217_v62 }
 0x36c   :  { %v2127_v63 = vrot.slane %v2126_v10, 2  ;;  %v2114_v9 = vrot.slane %v2113_v55, 2 }
 0x36d   :  { %v2244_v14 = vpop.xlane.xlu1 %2243  ;;  %v2220_v23 = vpop.xlane.xlu0 %2219 }
 0x36e   :  { %v2128_v56 = vadd.f32 %v2127_v63, %v2126_v10  ;;  %v2264_v54 = vadd.f32 %v2263_v4, %v2244_v14  ;;  %v2115_v25 = vadd.f32 %v2114_v9, %v2113_v55  ;;  %v2251_v19 = vadd.f32 %v2250_v13, %v2220_v23 }
 0x370   :  { %v2129_v36 = vrot.slane %v2128_v56, 1  ;;  %v2265_v58 = vrot.slane %v2264_v54, 4  ;;  %v2116_v61 = vrot.slane %v2115_v25, 1  ;;  %v2252_v48 = vrot.slane %v2251_v19, 4 }
 0x372   :  { %v2130_v59 = vadd.f32 %v2129_v36, %v2128_v56  ;;  %v2266_v26 = vadd.f32 %v2265_v58, %v2264_v54  ;;  %v2117_v40 = vadd.f32 %v2116_v61, %v2115_v25  ;;  %v2253_v27 = vadd.f32 %v2252_v48, %v2251_v19 }
 0x374   :  { %v2267_v1 = vrot.slane %v2266_v26, 2  ;;  %v2254_v60 = vrot.slane %v2253_v27, 2  ;;  %v2136_v38 = vsel %vm1015_vm4, %v2130_v59, %v2117_v40 }
 0x375   :  { %v2138_v57 = vsel %vm2131_vm13, %v2136_v38, 0.0 }
 0x376   :  { %v2268_v3 = vadd.f32 %v2267_v1, %v2266_v26  ;;  %v2255_v33 = vadd.f32 %v2254_v60, %v2253_v27  ;;  %v2139_v20 = vadd.f32 %v2138_v57, %v1999_v30 }
 0x378   :  { %v2269_v28 = vrot.slane %v2268_v3, 1  ;;  %v2256_v6 = vrot.slane %v2255_v33, 1 }
 0x37a   :  { %v2270_v52 = vadd.f32 %v2269_v28, %v2268_v3  ;;  %v2257_v16 = vadd.f32 %v2256_v6, %v2255_v33 }
 0x37c   :  { %v2276_v31 = vsel %vm1015_vm4, %v2270_v52, %v2257_v16 }
 0x37d   :  { %v2278_v5 = vsel %vm2271_vm14, %v2276_v31, 0.0 }
 0x37e   :  { %v2279_v41 = vadd.f32 %v2278_v5, %v2139_v20 }
 0x380   :  { %2280 = vst [vmem:[#allocation4] sm:$0x3] %v2279_v41 }
 0x381   :  { %2499 = shalt.err (!%p2496_p5)
}
 0x382   :  { %2290 = dma.vmem_to_hbm [thread:$0]  %s2288_s24, 32, %s3463_s5, [#allocation5]  }
 0x383   :  { %2512 = dma.done.wait [#allocation5], 32  }
 0x384   :  { %2513 = vsyncadd [#allocation5], 4294967264 }
 0x385   :  { %2294 = vsyncpa [#allocation5], 1 }

</bundles_post_ra>
